<compile_context>
chip_gen: v7x
topology: tpu7x:2x2x1
jax: 0.10.0
libtpu: 0.0.40
codegen_flags: <defaults>
</compile_context>

<pallas_src>
import numpy as np
import jax
import jax.numpy as jnp
from jax import lax
from jax.experimental import pallas as pl
from jax.experimental.pallas import tpu as pltpu


# ----------------------------------------------------------------------------------------
# Kernel
# ----------------------------------------------------------------------------------------
def gated_upconv_kernel(x_ref, top_ref, bot_ref, w_ref, b_ref, out_ref, pad_ref):
    """One (batch sample, row band) per grid step.

    x_ref  : (1, TH, W, Cin)       bf16  row band of the original-resolution input
    top_ref: (1, 1,  W, Cin)       bf16  row just above the band (clamped; zeroed at r==0)
    bot_ref: (1, 1,  W, Cin)       bf16  row just below the band (clamped; zeroed at r==last)
    w_ref  : (9, Cin, 8*Cout)      bf16  folded sub-pixel weights, tap-major, cols=(hg,py,px,co)
    b_ref  : (1, 8*Cout)           f32   combined bias, cols=(hg,py,px,co)
    out_ref: (1, TH, 2, W, 2*Cout) f32   output band; dim2 = row parity py, last dim = (px,co)
    pad_ref: (TH+2, W+2, Cin)      bf16  zero-padded input band (VMEM scratch)
    """
    _, TH, W, C = x_ref.shape
    Co8 = w_ref.shape[2]
    Co4 = Co8 // 2        # width of the h / g column block  (py, px, co)
    Co2 = Co4 // 2        # one py parity                    (px, co)

    r = pl.program_id(1)
    last = pl.num_programs(1) - 1

    # --- assemble the zero-padded band (only the border strips are zeroed) --------------
    # TODO(synk): DMA the band straight from an ANY-space input into pad_ref's interior to
    #             drop this VMEM->VMEM copy (needs manual double buffering of the DMA).
    zcol = jnp.zeros((TH + 2, 1, C), jnp.bfloat16)
    pad_ref[:, 0:1, :] = zcol
    pad_ref[:, W + 1:W + 2, :] = zcol
    pad_ref[1:TH + 1, 1:W + 1, :] = x_ref[0]

    @pl.when(r > 0)
    def _():
        pad_ref[0:1, 1:W + 1, :] = top_ref[0]

    @pl.when(r == 0)
    def _():
        pad_ref[0:1, 1:W + 1, :] = jnp.zeros((1, W, C), jnp.bfloat16)

    @pl.when(r < last)
    def _():
        pad_ref[TH + 1:TH + 2, 1:W + 1, :] = bot_ref[0]

    @pl.when(r == last)
    def _():
        pad_ref[TH + 1:TH + 2, 1:W + 1, :] = jnp.zeros((1, W, C), jnp.bfloat16)

    # --- 9 accumulating bf16 MXU dots (no materialized im2col slab) ---------------------
    acc = jnp.zeros((TH * W, Co8), jnp.float32)
    for dy in range(3):
        for dx in range(3):
            a_tap = pad_ref[dy:dy + TH, dx:dx + W, :].reshape(TH * W, C)
            acc = acc + jnp.dot(a_tap, w_ref[dy * 3 + dx],
                                preferred_element_type=jnp.float32)
    R = acc + b_ref[...]                                   # f32 (TH*W, 8*Cout)

    # --- gating epilogue (activation=None): out = h * sigmoid(g) ------------------------
    # sigmoid via tanh: numerically stable (no exp overflow) and runs on the EUP slot.
    gated = R[:, :Co4] * (0.5 * jnp.tanh(0.5 * R[:, Co4:]) + 0.5)    # (TH*W, 4*Cout)

    # --- store both row parities with plain slice stores (no interleave copy) -----------
    out_ref[:, :, 0:1, :, :] = gated[:, :Co2].reshape(1, TH, 1, W, Co2)   # py = 0
    out_ref[:, :, 1:2, :, :] = gated[:, Co2:].reshape(1, TH, 1, W, Co2)   # py = 1


# ----------------------------------------------------------------------------------------
# Weight folding: Upsample(2, nearest) + 3x3/s1/p1 conv  ->  4 sub-pixel 3x3 kernels,
# both convs (h and g) packed into one tap-major weight tensor.
# ----------------------------------------------------------------------------------------
def _build_combined_weight(wh, wg):
    """wh, wg: (Cout, Cin, 3, 3) OIHW (f32).  Returns (9, Cin, 8*Cout) with tap index
    t = dy*3 + dx over ORIGINAL-resolution offsets and cols ordered (hg, py, px, co)."""
    c_out, c_in = wh.shape[0], wh.shape[1]
    w_cat = jnp.concatenate([wh, wg], axis=0)               # (2Cout, Cin, 3, 3)
    w_hwio = jnp.transpose(w_cat, (2, 3, 1, 0))             # (3, 3, Cin, 2Cout)

    # Parity tap-combination matrices: new_tap[a] = sum_d T[p, a, d] * old_tap[d]
    #   parity 0: [w0, w1+w2, 0]    parity 1: [0, w0+w1, w2]
    T = jnp.array([[[1., 0., 0.], [0., 1., 1.], [0., 0., 0.]],
                   [[0., 0., 0.], [1., 1., 0.], [0., 0., 1.]]], jnp.float32)

    # weff[py, px, a, b, ci, f] = sum_{dy,dx} T[py,a,dy] T[px,b,dx] w[dy,dx,ci,f]
    weff = jnp.einsum('pad,qbe,decf->pqabcf', T, T, w_hwio)  # (2,2,3,3,Cin,2Cout)
    weff = weff.reshape(2, 2, 3, 3, c_in, 2, c_out)          # split f -> (hg, co)
    wtap = jnp.transpose(weff, (2, 3, 4, 5, 0, 1, 6))        # (a, b, ci, hg, py, px, co)
    return wtap.reshape(9, c_in, 8 * c_out)


# ----------------------------------------------------------------------------------------
# Tiling / VMEM sizing
# ----------------------------------------------------------------------------------------
def _vmem_bytes_estimate(TH, W, c_in, c_out):
    bf2, f4 = 2, 4
    pad = (TH + 2) * (W + 2) * c_in * bf2                   # padded-band scratch
    xin = 2 * ((TH + 2) * W * c_in * bf2)                   # band + halo rows, double-buffered
    wgt = 2 * 9 * c_in * 8 * c_out * bf2                    # folded weights (worst case 2 bufs)
    outb = 2 * (TH * 2 * W * 2 * c_out * f4)                # output band, double-buffered
    tmp = TH * W * (2 * 8 * c_out * f4 + 4 * c_out * f4 + 2 * c_in * bf2)  # acc/R, gated, tap
    return pad + xin + wgt + outb + tmp


def _pick_row_tile(H, W, c_in, c_out, budget_bytes=20 * 1024 * 1024):
    """Largest divisor of H whose live-VMEM estimate fits the budget (budget chosen so the
    footprint also fits v7x's 64 MiB VMEM).  Prefer >= 2 row tiles: VAE batches are tiny and
    the spatial axis is the main source of grid parallelism for v7x's 2 TensorCores."""
    divisors = [d for d in range(1, H + 1) if H % d == 0]
    fits = [d for d in divisors if _vmem_bytes_estimate(d, W, c_in, c_out) <= budget_bytes]
    if not fits:
        return 1
    multi = [d for d in fits if H // d >= 2]
    return max(multi) if multi else max(fits)


# ----------------------------------------------------------------------------------------
# pallas_call wrapper
# ----------------------------------------------------------------------------------------
def _pallas_forward(x_nhwc, wbig, bbig, TH, single_buffer_weights):
    N, H, W, c_in = x_nhwc.shape
    co8 = wbig.shape[2]
    c_out = co8 // 8
    nr = H // TH

    # Grid-invariant operands: single buffering saves VMEM (notably on v7x's 64 MiB).
    const_kwargs = dict(pipeline_mode=pl.Buffered(1)) if single_buffer_weights else {}

    est = _vmem_bytes_estimate(TH, W, c_in, c_out)
    vmem_limit = int(min(48 * 1024 * 1024,
                         max(32 * 1024 * 1024, 2 * est + 8 * 1024 * 1024)))

    # TODO(synk): for C_out < 64 the output lane width (2*C_out) is < 128 -> masked stores;
    #             pad / fold channels into lanes if such layers matter in production.
    return pl.pallas_call(
        gated_upconv_kernel,
        out_shape=jax.ShapeDtypeStruct((N, H, 2, W, 2 * c_out), jnp.float32),
        grid=(N, nr),
        in_specs=[
            # current row band
            pl.BlockSpec((1, TH, W, c_in), lambda n, r: (n, r, 0, 0)),
            # 1-row halos above / below (clamped at image border; zeroed in-kernel there)
            pl.BlockSpec((1, 1, W, c_in),
                         lambda n, r: (n, jnp.maximum(r * TH - 1, 0), 0, 0)),
            pl.BlockSpec((1, 1, W, c_in),
                         lambda n, r: (n, jnp.minimum(r * TH + TH, H - 1), 0, 0)),
            # grid-invariant folded weights + bias
            pl.BlockSpec((9, c_in, co8), lambda n, r: (0, 0, 0), **const_kwargs),
            pl.BlockSpec((1, co8), lambda n, r: (0, 0), **const_kwargs),
        ],
        out_specs=pl.BlockSpec((1, TH, 2, W, 2 * c_out), lambda n, r: (n, r, 0, 0, 0)),
        scratch_shapes=[pltpu.VMEM((TH + 2, W + 2, c_in), jnp.bfloat16)],
        compiler_params=pltpu.CompilerParams(
            dimension_semantics=("parallel", "parallel"),
            vmem_limit_bytes=vmem_limit),
    )(x_nhwc, x_nhwc, x_nhwc, wbig, bbig)


def resize_gated_conv2d(x_nchw, wh, bh, wg, bg):
    """ResizeGatedConv2d forward.  NCHW in / NCHW out, matching the PyTorch module."""
    # TODO(synk): only the module defaults used in the VAE are implemented
    #             (kernel_size=3, stride=1, padding=1, dilation=1, scale_factor=2, activation=None).
    N, c_in, H, W = x_nchw.shape
    c_out = wh.shape[0]

    # NCHW -> NHWC; bf16 MXU operands (accumulation stays f32 inside the kernel).
    # TODO(synk): keep the surrounding model NHWC (and bf16) end-to-end to drop these passes.
    x = jnp.transpose(x_nchw, (0, 2, 3, 1)).astype(jnp.bfloat16)

    wbig = _build_combined_weight(wh.astype(jnp.float32),
                                  wg.astype(jnp.float32)).astype(jnp.bfloat16)
    bbig = jnp.concatenate([jnp.tile(bh.astype(jnp.float32), 4),
                            jnp.tile(bg.astype(jnp.float32), 4)]).reshape(1, 8 * c_out)

    TH = _pick_row_tile(H, W, c_in, c_out)
    try:
        out = _pallas_forward(x, wbig, bbig, TH, single_buffer_weights=True)
    except Exception:
        # pl.Buffered(1) (single-buffered invariant operands) not supported on this jax
        # build -> fall back to default double buffering (correctness unchanged).
        out = _pallas_forward(x, wbig, bbig, TH, single_buffer_weights=False)

    # (N, H, 2, W, 2, Cout) is already the final memory order -> free reshape, then NCHW.
    y = out.reshape(N, 2 * H, 2 * W, c_out)
    return jnp.transpose(y, (0, 3, 1, 2))


# ----------------------------------------------------------------------------------------
# Pure-JAX reference (correctness check only)
# ----------------------------------------------------------------------------------------
def ref_forward(x, wh, bh, wg, bg):
    up = jnp.repeat(jnp.repeat(x, 2, axis=2), 2, axis=3)             # nearest x2, NCHW
    dn = ('NCHW', 'OIHW', 'NCHW')
    h = lax.conv_general_dilated(up, wh, (1, 1), ((1, 1), (1, 1)),
                                 dimension_numbers=dn) + bh[None, :, None, None]
    g = lax.conv_general_dilated(up, wg, (1, 1), ((1, 1), (1, 1)),
                                 dimension_numbers=dn) + bg[None, :, None, None]
    return h * jax.nn.sigmoid(g)


if __name__ == "__main__":
    # Small shapes consistent with the module: NCHW input, 3x3 conv, pad 1, upsample x2.
    N, C_in, C_out, H, W = 2, 4, 4, 16, 16

    key = jax.random.PRNGKey(0)
    kx, k1, k2, k3, k4 = jax.random.split(key, 5)

    x = jax.random.normal(kx, (N, C_in, H, W), dtype=jnp.float32)

    bound = 1.0 / np.sqrt(C_in * 3 * 3)                              # PyTorch Conv2d init bound
    wh = jax.random.uniform(k1, (C_out, C_in, 3, 3), minval=-bound, maxval=bound,
                            dtype=jnp.float32)                       # OIHW
    bh = jax.random.uniform(k2, (C_out,), minval=-bound, maxval=bound, dtype=jnp.float32)
    wg = jax.random.uniform(k3, (C_out, C_in, 3, 3), minval=-bound, maxval=bound,
                            dtype=jnp.float32)
    bg = jax.random.uniform(k4, (C_out,), minval=-bound, maxval=bound, dtype=jnp.float32)

    out = jax.block_until_ready(resize_gated_conv2d(x, wh, bh, wg, bg))
    ref = jax.block_until_ready(ref_forward(x, wh, bh, wg, bg))

    # MXU operands are bf16 (accumulation is f32), so the tolerance vs. the f32 reference is
    # looser than the previous all-f32 version.
    np.testing.assert_allclose(np.asarray(out), np.asarray(ref), rtol=5e-2, atol=5e-2)

    print("KERNEL_OK")
</pallas_src>

<mosaic_0001>
module attributes {stable_mosaic.version = 11 : i64} {
  func.func @gated_upconv_kernel(%arg0: i32, %arg1: i32, %arg2: memref<1x8x16x4xbf16, #tpu.memory_space<vmem>>, %arg3: memref<1x1x16x4xbf16, #tpu.memory_space<vmem>>, %arg4: memref<1x1x16x4xbf16, #tpu.memory_space<vmem>>, %arg5: memref<9x4x32xbf16, #tpu.memory_space<vmem>>, %arg6: memref<1x32xf32, #tpu.memory_space<vmem>>, %arg7: memref<1x8x2x16x8xf32, #tpu.memory_space<vmem>>, %arg8: memref<10x18x4xbf16, #tpu.memory_space<vmem>>) attributes {dimension_semantics = [#tpu.dimension_semantics<parallel>, #tpu.dimension_semantics<parallel>], iteration_bounds = array<i64: 2, 2>, scalar_prefetch = 0 : i64, scratch_operands = 1 : i64, tpu.core_type = #tpu.core_type<tc>, window_params = [{transform_indices = @transform_0, window_bounds = array<i64: 1, 8, 16, 4>}, {transform_indices = @transform_1, window_bounds = array<i64: 1, 1, 16, 4>}, {transform_indices = @transform_2, window_bounds = array<i64: 1, 1, 16, 4>}, {pipeline_mode = #tpu.pipeline_mode<synchronous>, transform_indices = @transform_3, window_bounds = array<i64: 9, 4, 32>}, {pipeline_mode = #tpu.pipeline_mode<synchronous>, transform_indices = @transform_4, window_bounds = array<i64: 1, 32>}, {transform_indices = @transform_5, window_bounds = array<i64: 1, 8, 2, 16, 8>}]} {
    %cst = arith.constant 0.000000e+00 : bf16
    %0 = vector.broadcast %cst : bf16 to vector<10x1x4xbf16>
    %c0 = arith.constant 0 : index
    %c0_0 = arith.constant 0 : index
    %c0_1 = arith.constant 0 : index
    %1 = vector.load %arg8[%c0, %c0_0, %c0_1] : memref<10x18x4xbf16, #tpu.memory_space<vmem>>, vector<10x1x4xbf16>
    tpu.vector_store %arg8[%c0, %c0_0, %c0_1], %0 {strides = array<i32>} : memref<10x18x4xbf16, #tpu.memory_space<vmem>>, vector<10x1x4xbf16>,
    %c0_2 = arith.constant 0 : index
    %c17 = arith.constant 17 : index
    %c0_3 = arith.constant 0 : index
    %2 = vector.load %arg8[%c0_2, %c17, %c0_3] : memref<10x18x4xbf16, #tpu.memory_space<vmem>>, vector<10x1x4xbf16>
    tpu.vector_store %arg8[%c0_2, %c17, %c0_3], %0 {strides = array<i32>} : memref<10x18x4xbf16, #tpu.memory_space<vmem>>, vector<10x1x4xbf16>,
    %c0_4 = arith.constant 0 : index
    %c0_5 = arith.constant 0 : index
    %c0_6 = arith.constant 0 : index
    %c0_7 = arith.constant 0 : index
    %3 = vector.load %arg2[%c0_4, %c0_5, %c0_6, %c0_7] : memref<1x8x16x4xbf16, #tpu.memory_space<vmem>>, vector<1x8x16x4xbf16>
    %4 = vector.shape_cast %3 : vector<1x8x16x4xbf16> to vector<8x16x4xbf16>
    %c1 = arith.constant 1 : index
    %c1_8 = arith.constant 1 : index
    %c0_9 = arith.constant 0 : index
    %5 = vector.load %arg8[%c1, %c1_8, %c0_9] : memref<10x18x4xbf16, #tpu.memory_space<vmem>>, vector<8x16x4xbf16>
    tpu.vector_store %arg8[%c1, %c1_8, %c0_9], %4 {strides = array<i32>} : memref<10x18x4xbf16, #tpu.memory_space<vmem>>, vector<8x16x4xbf16>,
    %c0_i32 = arith.constant 0 : i32
    %6 = arith.cmpi sgt, %arg1, %c0_i32 : i32
    %7 = arith.extui %6 : i1 to i32
    %c0_i32_10 = arith.constant 0 : i32
    %8 = arith.cmpi ne, %7, %c0_i32_10 : i32
    scf.if %8 {
      %c0_88 = arith.constant 0 : index
      %c0_89 = arith.constant 0 : index
      %c0_90 = arith.constant 0 : index
      %c0_91 = arith.constant 0 : index
      %92 = vector.load %arg3[%c0_88, %c0_89, %c0_90, %c0_91] : memref<1x1x16x4xbf16, #tpu.memory_space<vmem>>, vector<1x1x16x4xbf16>
      %93 = vector.shape_cast %92 : vector<1x1x16x4xbf16> to vector<1x16x4xbf16>
      %c0_92 = arith.constant 0 : index
      %c1_93 = arith.constant 1 : index
      %c0_94 = arith.constant 0 : index
      %94 = vector.load %arg8[%c0_92, %c1_93, %c0_94] : memref<10x18x4xbf16, #tpu.memory_space<vmem>>, vector<1x16x4xbf16>
      tpu.vector_store %arg8[%c0_92, %c1_93, %c0_94], %93 {strides = array<i32>} : memref<10x18x4xbf16, #tpu.memory_space<vmem>>, vector<1x16x4xbf16>,
    } else {
    }
    %c0_i32_11 = arith.constant 0 : i32
    %9 = arith.cmpi eq, %arg1, %c0_i32_11 : i32
    %10 = arith.extui %9 : i1 to i32
    %c0_i32_12 = arith.constant 0 : i32
    %11 = arith.cmpi ne, %10, %c0_i32_12 : i32
    scf.if %11 {
      %cst_88 = arith.constant 0.000000e+00 : bf16
      %92 = vector.broadcast %cst_88 : bf16 to vector<1x16x4xbf16>
      %c0_89 = arith.constant 0 : index
      %c1_90 = arith.constant 1 : index
      %c0_91 = arith.constant 0 : index
      %93 = vector.load %arg8[%c0_89, %c1_90, %c0_91] : memref<10x18x4xbf16, #tpu.memory_space<vmem>>, vector<1x16x4xbf16>
      tpu.vector_store %arg8[%c0_89, %c1_90, %c0_91], %92 {strides = array<i32>} : memref<10x18x4xbf16, #tpu.memory_space<vmem>>, vector<1x16x4xbf16>,
    } else {
    }
    %c1_i32 = arith.constant 1 : i32
    %12 = arith.cmpi slt, %arg1, %c1_i32 : i32
    %13 = arith.extui %12 : i1 to i32
    %c0_i32_13 = arith.constant 0 : i32
    %14 = arith.cmpi ne, %13, %c0_i32_13 : i32
    scf.if %14 {
      %c0_88 = arith.constant 0 : index
      %c0_89 = arith.constant 0 : index
      %c0_90 = arith.constant 0 : index
      %c0_91 = arith.constant 0 : index
      %92 = vector.load %arg4[%c0_88, %c0_89, %c0_90, %c0_91] : memref<1x1x16x4xbf16, #tpu.memory_space<vmem>>, vector<1x1x16x4xbf16>
      %93 = vector.shape_cast %92 : vector<1x1x16x4xbf16> to vector<1x16x4xbf16>
      %c9 = arith.constant 9 : index
      %c1_92 = arith.constant 1 : index
      %c0_93 = arith.constant 0 : index
      %94 = vector.load %arg8[%c9, %c1_92, %c0_93] : memref<10x18x4xbf16, #tpu.memory_space<vmem>>, vector<1x16x4xbf16>
      tpu.vector_store %arg8[%c9, %c1_92, %c0_93], %93 {strides = array<i32>} : memref<10x18x4xbf16, #tpu.memory_space<vmem>>, vector<1x16x4xbf16>,
    } else {
    }
    %c1_i32_14 = arith.constant 1 : i32
    %15 = arith.cmpi eq, %arg1, %c1_i32_14 : i32
    %16 = arith.extui %15 : i1 to i32
    %c0_i32_15 = arith.constant 0 : i32
    %17 = arith.cmpi ne, %16, %c0_i32_15 : i32
    scf.if %17 {
      %cst_88 = arith.constant 0.000000e+00 : bf16
      %92 = vector.broadcast %cst_88 : bf16 to vector<1x16x4xbf16>
      %c9 = arith.constant 9 : index
      %c1_89 = arith.constant 1 : index
      %c0_90 = arith.constant 0 : index
      %93 = vector.load %arg8[%c9, %c1_89, %c0_90] : memref<10x18x4xbf16, #tpu.memory_space<vmem>>, vector<1x16x4xbf16>
      tpu.vector_store %arg8[%c9, %c1_89, %c0_90], %92 {strides = array<i32>} : memref<10x18x4xbf16, #tpu.memory_space<vmem>>, vector<1x16x4xbf16>,
    } else {
    }
    %cst_16 = arith.constant 0.000000e+00 : f32
    %18 = vector.broadcast %cst_16 : f32 to vector<128x32xf32>
    %c0_17 = arith.constant 0 : index
    %c0_18 = arith.constant 0 : index
    %c0_19 = arith.constant 0 : index
    %19 = vector.load %arg8[%c0_17, %c0_18, %c0_19] : memref<10x18x4xbf16, #tpu.memory_space<vmem>>, vector<8x16x4xbf16>
    %20 = vector.shape_cast %19 : vector<8x16x4xbf16> to vector<128x4xbf16>
    %c0_20 = arith.constant 0 : index
    %c0_21 = arith.constant 0 : index
    %c0_22 = arith.constant 0 : index
    %21 = vector.load %arg5[%c0_20, %c0_21, %c0_22] : memref<9x4x32xbf16, #tpu.memory_space<vmem>>, vector<1x4x32xbf16>
    %22 = vector.shape_cast %21 : vector<1x4x32xbf16> to vector<4x32xbf16>
    %cst_23 = arith.constant dense<0.000000e+00> : vector<128x32xf32>
    %23 = tpu.matmul %20, %22, %cst_23 {dimension_numbers = #tpu.dot_dimension_numbers<[1], [0], [0], [1], [0, 0, 1, 1], [], []>} : vector<128x4xbf16>, vector<4x32xbf16>, vector<128x32xf32> -> vector<128x32xf32>
    %24 = arith.addf %18, %23 : vector<128x32xf32>
    %c0_24 = arith.constant 0 : index
    %c1_25 = arith.constant 1 : index
    %c0_26 = arith.constant 0 : index
    %25 = vector.load %arg8[%c0_24, %c1_25, %c0_26] : memref<10x18x4xbf16, #tpu.memory_space<vmem>>, vector<8x16x4xbf16>
    %26 = vector.shape_cast %25 : vector<8x16x4xbf16> to vector<128x4xbf16>
    %c1_27 = arith.constant 1 : index
    %c0_28 = arith.constant 0 : index
    %c0_29 = arith.constant 0 : index
    %27 = vector.load %arg5[%c1_27, %c0_28, %c0_29] : memref<9x4x32xbf16, #tpu.memory_space<vmem>>, vector<1x4x32xbf16>
    %28 = vector.shape_cast %27 : vector<1x4x32xbf16> to vector<4x32xbf16>
    %cst_30 = arith.constant dense<0.000000e+00> : vector<128x32xf32>
    %29 = tpu.matmul %26, %28, %cst_30 {dimension_numbers = #tpu.dot_dimension_numbers<[1], [0], [0], [1], [0, 0, 1, 1], [], []>} : vector<128x4xbf16>, vector<4x32xbf16>, vector<128x32xf32> -> vector<128x32xf32>
    %30 = arith.addf %24, %29 : vector<128x32xf32>
    %c0_31 = arith.constant 0 : index
    %c2 = arith.constant 2 : index
    %c0_32 = arith.constant 0 : index
    %31 = vector.load %arg8[%c0_31, %c2, %c0_32] : memref<10x18x4xbf16, #tpu.memory_space<vmem>>, vector<8x16x4xbf16>
    %32 = vector.shape_cast %31 : vector<8x16x4xbf16> to vector<128x4xbf16>
    %c2_33 = arith.constant 2 : index
    %c0_34 = arith.constant 0 : index
    %c0_35 = arith.constant 0 : index
    %33 = vector.load %arg5[%c2_33, %c0_34, %c0_35] : memref<9x4x32xbf16, #tpu.memory_space<vmem>>, vector<1x4x32xbf16>
    %34 = vector.shape_cast %33 : vector<1x4x32xbf16> to vector<4x32xbf16>
    %cst_36 = arith.constant dense<0.000000e+00> : vector<128x32xf32>
    %35 = tpu.matmul %32, %34, %cst_36 {dimension_numbers = #tpu.dot_dimension_numbers<[1], [0], [0], [1], [0, 0, 1, 1], [], []>} : vector<128x4xbf16>, vector<4x32xbf16>, vector<128x32xf32> -> vector<128x32xf32>
    %36 = arith.addf %30, %35 : vector<128x32xf32>
    %c1_37 = arith.constant 1 : index
    %c0_38 = arith.constant 0 : index
    %c0_39 = arith.constant 0 : index
    %37 = vector.load %arg8[%c1_37, %c0_38, %c0_39] : memref<10x18x4xbf16, #tpu.memory_space<vmem>>, vector<8x16x4xbf16>
    %38 = vector.shape_cast %37 : vector<8x16x4xbf16> to vector<128x4xbf16>
    %c3 = arith.constant 3 : index
    %c0_40 = arith.constant 0 : index
    %c0_41 = arith.constant 0 : index
    %39 = vector.load %arg5[%c3, %c0_40, %c0_41] : memref<9x4x32xbf16, #tpu.memory_space<vmem>>, vector<1x4x32xbf16>
    %40 = vector.shape_cast %39 : vector<1x4x32xbf16> to vector<4x32xbf16>
    %cst_42 = arith.constant dense<0.000000e+00> : vector<128x32xf32>
    %41 = tpu.matmul %38, %40, %cst_42 {dimension_numbers = #tpu.dot_dimension_numbers<[1], [0], [0], [1], [0, 0, 1, 1], [], []>} : vector<128x4xbf16>, vector<4x32xbf16>, vector<128x32xf32> -> vector<128x32xf32>
    %42 = arith.addf %36, %41 : vector<128x32xf32>
    %c1_43 = arith.constant 1 : index
    %c1_44 = arith.constant 1 : index
    %c0_45 = arith.constant 0 : index
    %43 = vector.load %arg8[%c1_43, %c1_44, %c0_45] : memref<10x18x4xbf16, #tpu.memory_space<vmem>>, vector<8x16x4xbf16>
    %44 = vector.shape_cast %43 : vector<8x16x4xbf16> to vector<128x4xbf16>
    %c4 = arith.constant 4 : index
    %c0_46 = arith.constant 0 : index
    %c0_47 = arith.constant 0 : index
    %45 = vector.load %arg5[%c4, %c0_46, %c0_47] : memref<9x4x32xbf16, #tpu.memory_space<vmem>>, vector<1x4x32xbf16>
    %46 = vector.shape_cast %45 : vector<1x4x32xbf16> to vector<4x32xbf16>
    %cst_48 = arith.constant dense<0.000000e+00> : vector<128x32xf32>
    %47 = tpu.matmul %44, %46, %cst_48 {dimension_numbers = #tpu.dot_dimension_numbers<[1], [0], [0], [1], [0, 0, 1, 1], [], []>} : vector<128x4xbf16>, vector<4x32xbf16>, vector<128x32xf32> -> vector<128x32xf32>
    %48 = arith.addf %42, %47 : vector<128x32xf32>
    %c1_49 = arith.constant 1 : index
    %c2_50 = arith.constant 2 : index
    %c0_51 = arith.constant 0 : index
    %49 = vector.load %arg8[%c1_49, %c2_50, %c0_51] : memref<10x18x4xbf16, #tpu.memory_space<vmem>>, vector<8x16x4xbf16>
    %50 = vector.shape_cast %49 : vector<8x16x4xbf16> to vector<128x4xbf16>
    %c5 = arith.constant 5 : index
    %c0_52 = arith.constant 0 : index
    %c0_53 = arith.constant 0 : index
    %51 = vector.load %arg5[%c5, %c0_52, %c0_53] : memref<9x4x32xbf16, #tpu.memory_space<vmem>>, vector<1x4x32xbf16>
    %52 = vector.shape_cast %51 : vector<1x4x32xbf16> to vector<4x32xbf16>
    %cst_54 = arith.constant dense<0.000000e+00> : vector<128x32xf32>
    %53 = tpu.matmul %50, %52, %cst_54 {dimension_numbers = #tpu.dot_dimension_numbers<[1], [0], [0], [1], [0, 0, 1, 1], [], []>} : vector<128x4xbf16>, vector<4x32xbf16>, vector<128x32xf32> -> vector<128x32xf32>
    %54 = arith.addf %48, %53 : vector<128x32xf32>
    %c2_55 = arith.constant 2 : index
    %c0_56 = arith.constant 0 : index
    %c0_57 = arith.constant 0 : index
    %55 = vector.load %arg8[%c2_55, %c0_56, %c0_57] : memref<10x18x4xbf16, #tpu.memory_space<vmem>>, vector<8x16x4xbf16>
    %56 = vector.shape_cast %55 : vector<8x16x4xbf16> to vector<128x4xbf16>
    %c6 = arith.constant 6 : index
    %c0_58 = arith.constant 0 : index
    %c0_59 = arith.constant 0 : index
    %57 = vector.load %arg5[%c6, %c0_58, %c0_59] : memref<9x4x32xbf16, #tpu.memory_space<vmem>>, vector<1x4x32xbf16>
    %58 = vector.shape_cast %57 : vector<1x4x32xbf16> to vector<4x32xbf16>
    %cst_60 = arith.constant dense<0.000000e+00> : vector<128x32xf32>
    %59 = tpu.matmul %56, %58, %cst_60 {dimension_numbers = #tpu.dot_dimension_numbers<[1], [0], [0], [1], [0, 0, 1, 1], [], []>} : vector<128x4xbf16>, vector<4x32xbf16>, vector<128x32xf32> -> vector<128x32xf32>
    %60 = arith.addf %54, %59 : vector<128x32xf32>
    %c2_61 = arith.constant 2 : index
    %c1_62 = arith.constant 1 : index
    %c0_63 = arith.constant 0 : index
    %61 = vector.load %arg8[%c2_61, %c1_62, %c0_63] : memref<10x18x4xbf16, #tpu.memory_space<vmem>>, vector<8x16x4xbf16>
    %62 = vector.shape_cast %61 : vector<8x16x4xbf16> to vector<128x4xbf16>
    %c7 = arith.constant 7 : index
    %c0_64 = arith.constant 0 : index
    %c0_65 = arith.constant 0 : index
    %63 = vector.load %arg5[%c7, %c0_64, %c0_65] : memref<9x4x32xbf16, #tpu.memory_space<vmem>>, vector<1x4x32xbf16>
    %64 = vector.shape_cast %63 : vector<1x4x32xbf16> to vector<4x32xbf16>
    %cst_66 = arith.constant dense<0.000000e+00> : vector<128x32xf32>
    %65 = tpu.matmul %62, %64, %cst_66 {dimension_numbers = #tpu.dot_dimension_numbers<[1], [0], [0], [1], [0, 0, 1, 1], [], []>} : vector<128x4xbf16>, vector<4x32xbf16>, vector<128x32xf32> -> vector<128x32xf32>
    %66 = arith.addf %60, %65 : vector<128x32xf32>
    %c2_67 = arith.constant 2 : index
    %c2_68 = arith.constant 2 : index
    %c0_69 = arith.constant 0 : index
    %67 = vector.load %arg8[%c2_67, %c2_68, %c0_69] : memref<10x18x4xbf16, #tpu.memory_space<vmem>>, vector<8x16x4xbf16>
    %68 = vector.shape_cast %67 : vector<8x16x4xbf16> to vector<128x4xbf16>
    %c8 = arith.constant 8 : index
    %c0_70 = arith.constant 0 : index
    %c0_71 = arith.constant 0 : index
    %69 = vector.load %arg5[%c8, %c0_70, %c0_71] : memref<9x4x32xbf16, #tpu.memory_space<vmem>>, vector<1x4x32xbf16>
    %70 = vector.shape_cast %69 : vector<1x4x32xbf16> to vector<4x32xbf16>
    %cst_72 = arith.constant dense<0.000000e+00> : vector<128x32xf32>
    %71 = tpu.matmul %68, %70, %cst_72 {dimension_numbers = #tpu.dot_dimension_numbers<[1], [0], [0], [1], [0, 0, 1, 1], [], []>} : vector<128x4xbf16>, vector<4x32xbf16>, vector<128x32xf32> -> vector<128x32xf32>
    %72 = arith.addf %66, %71 : vector<128x32xf32>
    %c0_73 = arith.constant 0 : index
    %c0_74 = arith.constant 0 : index
    %73 = vector.load %arg6[%c0_73, %c0_74] : memref<1x32xf32, #tpu.memory_space<vmem>>, vector<1x32xf32>
    %74 = vector.broadcast %73 : vector<1x32xf32> to vector<128x32xf32>
    %75 = arith.addf %72, %74 : vector<128x32xf32>
    %76 = vector.extract_strided_slice %75 {offsets = [0, 0], sizes = [128, 16], strides = [1, 1]} : vector<128x32xf32> to vector<128x16xf32>
    %77 = vector.extract_strided_slice %75 {offsets = [0, 16], sizes = [128, 16], strides = [1, 1]} : vector<128x32xf32> to vector<128x16xf32>
    %cst_75 = arith.constant 5.000000e-01 : f32
    %78 = vector.broadcast %cst_75 : f32 to vector<128x16xf32>
    %79 = arith.mulf %78, %77 : vector<128x16xf32>
    %80 = math.tanh %79 : vector<128x16xf32>
    %cst_76 = arith.constant 5.000000e-01 : f32
    %81 = vector.broadcast %cst_76 : f32 to vector<128x16xf32>
    %82 = arith.mulf %81, %80 : vector<128x16xf32>
    %cst_77 = arith.constant 5.000000e-01 : f32
    %83 = vector.broadcast %cst_77 : f32 to vector<128x16xf32>
    %84 = arith.addf %82, %83 : vector<128x16xf32>
    %85 = arith.mulf %76, %84 : vector<128x16xf32>
    %86 = vector.extract_strided_slice %85 {offsets = [0, 0], sizes = [128, 8], strides = [1, 1]} : vector<128x16xf32> to vector<128x8xf32>
    %87 = vector.shape_cast %86 : vector<128x8xf32> to vector<1x8x1x16x8xf32>
    %c0_78 = arith.constant 0 : index
    %c0_79 = arith.constant 0 : index
    %c0_80 = arith.constant 0 : index
    %c0_81 = arith.constant 0 : index
    %c0_82 = arith.constant 0 : index
    %88 = vector.load %arg7[%c0_78, %c0_79, %c0_80, %c0_81, %c0_82] : memref<1x8x2x16x8xf32, #tpu.memory_space<vmem>>, vector<1x8x1x16x8xf32>
    tpu.vector_store %arg7[%c0_78, %c0_79, %c0_80, %c0_81, %c0_82], %87 {strides = array<i32>} : memref<1x8x2x16x8xf32, #tpu.memory_space<vmem>>, vector<1x8x1x16x8xf32>,
    %89 = vector.extract_strided_slice %85 {offsets = [0, 8], sizes = [128, 8], strides = [1, 1]} : vector<128x16xf32> to vector<128x8xf32>
    %90 = vector.shape_cast %89 : vector<128x8xf32> to vector<1x8x1x16x8xf32>
    %c0_83 = arith.constant 0 : index
    %c0_84 = arith.constant 0 : index
    %c1_85 = arith.constant 1 : index
    %c0_86 = arith.constant 0 : index
    %c0_87 = arith.constant 0 : index
    %91 = vector.load %arg7[%c0_83, %c0_84, %c1_85, %c0_86, %c0_87] : memref<1x8x2x16x8xf32, #tpu.memory_space<vmem>>, vector<1x8x1x16x8xf32>
    tpu.vector_store %arg7[%c0_83, %c0_84, %c1_85, %c0_86, %c0_87], %90 {strides = array<i32>} : memref<1x8x2x16x8xf32, #tpu.memory_space<vmem>>, vector<1x8x1x16x8xf32>,
    return
  }
  func.func @transform_0(%arg0: i32, %arg1: i32) -> (i32, i32, i32, i32) {
    %c0_i32 = arith.constant 0 : i32
    %c0_i32_0 = arith.constant 0 : i32
    %c0_i32_1 = arith.constant 0 : i32
    return %arg0, %arg1, %c0_i32, %c0_i32_0 : i32, i32, i32, i32
  }
  func.func @transform_1(%arg0: i32, %arg1: i32) -> (i32, i32, i32, i32) {
    %c8_i32 = arith.constant 8 : i32
    %0 = arith.muli %arg1, %c8_i32 : i32
    %c1_i32 = arith.constant 1 : i32
    %1 = arith.subi %0, %c1_i32 : i32
    %c0_i32 = arith.constant 0 : i32
    %2 = arith.maxsi %1, %c0_i32 : i32
    %c0_i32_0 = arith.constant 0 : i32
    %c0_i32_1 = arith.constant 0 : i32
    %c0_i32_2 = arith.constant 0 : i32
    return %arg0, %2, %c0_i32_0, %c0_i32_1 : i32, i32, i32, i32
  }
  func.func @transform_2(%arg0: i32, %arg1: i32) -> (i32, i32, i32, i32) {
    %c8_i32 = arith.constant 8 : i32
    %0 = arith.muli %arg1, %c8_i32 : i32
    %c8_i32_0 = arith.constant 8 : i32
    %1 = arith.addi %0, %c8_i32_0 : i32
    %c15_i32 = arith.constant 15 : i32
    %2 = arith.minsi %1, %c15_i32 : i32
    %c0_i32 = arith.constant 0 : i32
    %c0_i32_1 = arith.constant 0 : i32
    %c0_i32_2 = arith.constant 0 : i32
    return %arg0, %2, %c0_i32, %c0_i32_1 : i32, i32, i32, i32
  }
  func.func @transform_3(%arg0: i32, %arg1: i32) -> (i32, i32, i32) {
    %c0_i32 = arith.constant 0 : i32
    %c0_i32_0 = arith.constant 0 : i32
    %c0_i32_1 = arith.constant 0 : i32
    %c0_i32_2 = arith.constant 0 : i32
    return %c0_i32, %c0_i32_0, %c0_i32_1 : i32, i32, i32
  }
  func.func @transform_4(%arg0: i32, %arg1: i32) -> (i32, i32) {
    %c0_i32 = arith.constant 0 : i32
    %c0_i32_0 = arith.constant 0 : i32
    %c0_i32_1 = arith.constant 0 : i32
    return %c0_i32, %c0_i32_0 : i32, i32
  }
  func.func @transform_5(%arg0: i32, %arg1: i32) -> (i32, i32, i32, i32, i32) {
    %c0_i32 = arith.constant 0 : i32
    %c0_i32_0 = arith.constant 0 : i32
    %c0_i32_1 = arith.constant 0 : i32
    %c0_i32_2 = arith.constant 0 : i32
    return %arg0, %arg1, %c0_i32, %c0_i32_0, %c0_i32_1 : i32, i32, i32, i32, i32
  }
}

module attributes {stable_mosaic.version = 11 : i64} {
  func.func @gated_upconv_kernel(%arg0: i32, %arg1: i32, %arg2: memref<1x8x16x4xbf16, #tpu.memory_space<vmem>>, %arg3: memref<1x1x16x4xbf16, #tpu.memory_space<vmem>>, %arg4: memref<1x1x16x4xbf16, #tpu.memory_space<vmem>>, %arg5: memref<9x4x32xbf16, #tpu.memory_space<vmem>>, %arg6: memref<1x32xf32, #tpu.memory_space<vmem>>, %arg7: memref<1x8x2x16x8xf32, #tpu.memory_space<vmem>>, %arg8: memref<10x18x4xbf16, #tpu.memory_space<vmem>>) attributes {dimension_semantics = [#tpu.dimension_semantics<parallel>, #tpu.dimension_semantics<parallel>], iteration_bounds = array<i64: 2, 2>, scalar_prefetch = 0 : i64, scratch_operands = 1 : i64, tpu.core_type = #tpu.core_type<tc>, window_params = [{transform_indices = @transform_0, window_bounds = array<i64: 1, 8, 16, 4>}, {transform_indices = @transform_1, window_bounds = array<i64: 1, 1, 16, 4>}, {transform_indices = @transform_2, window_bounds = array<i64: 1, 1, 16, 4>}, {pipeline_mode = #tpu.pipeline_mode<synchronous>, transform_indices = @transform_3, window_bounds = array<i64: 9, 4, 32>}, {pipeline_mode = #tpu.pipeline_mode<synchronous>, transform_indices = @transform_4, window_bounds = array<i64: 1, 32>}, {transform_indices = @transform_5, window_bounds = array<i64: 1, 8, 2, 16, 8>}]} {
    %cst = arith.constant 0.000000e+00 : bf16
    %0 = vector.broadcast %cst : bf16 to vector<10x1x4xbf16>
    %c0 = arith.constant 0 : index
    %c0_0 = arith.constant 0 : index
    %c0_1 = arith.constant 0 : index
    %1 = vector.load %arg8[%c0, %c0_0, %c0_1] : memref<10x18x4xbf16, #tpu.memory_space<vmem>>, vector<10x1x4xbf16>
    tpu.vector_store %arg8[%c0, %c0_0, %c0_1], %0 {strides = array<i32>} : memref<10x18x4xbf16, #tpu.memory_space<vmem>>, vector<10x1x4xbf16>,
    %c0_2 = arith.constant 0 : index
    %c17 = arith.constant 17 : index
    %c0_3 = arith.constant 0 : index
    %2 = vector.load %arg8[%c0_2, %c17, %c0_3] : memref<10x18x4xbf16, #tpu.memory_space<vmem>>, vector<10x1x4xbf16>
    tpu.vector_store %arg8[%c0_2, %c17, %c0_3], %0 {strides = array<i32>} : memref<10x18x4xbf16, #tpu.memory_space<vmem>>, vector<10x1x4xbf16>,
    %c0_4 = arith.constant 0 : index
    %c0_5 = arith.constant 0 : index
    %c0_6 = arith.constant 0 : index
    %c0_7 = arith.constant 0 : index
    %3 = vector.load %arg2[%c0_4, %c0_5, %c0_6, %c0_7] : memref<1x8x16x4xbf16, #tpu.memory_space<vmem>>, vector<1x8x16x4xbf16>
    %4 = vector.shape_cast %3 : vector<1x8x16x4xbf16> to vector<8x16x4xbf16>
    %c1 = arith.constant 1 : index
    %c1_8 = arith.constant 1 : index
    %c0_9 = arith.constant 0 : index
    %5 = vector.load %arg8[%c1, %c1_8, %c0_9] : memref<10x18x4xbf16, #tpu.memory_space<vmem>>, vector<8x16x4xbf16>
    tpu.vector_store %arg8[%c1, %c1_8, %c0_9], %4 {strides = array<i32>} : memref<10x18x4xbf16, #tpu.memory_space<vmem>>, vector<8x16x4xbf16>,
    %c0_i32 = arith.constant 0 : i32
    %6 = arith.cmpi sgt, %arg1, %c0_i32 : i32
    %7 = arith.extui %6 : i1 to i32
    %c0_i32_10 = arith.constant 0 : i32
    %8 = arith.cmpi ne, %7, %c0_i32_10 : i32
    scf.if %8 {
      %c0_88 = arith.constant 0 : index
      %c0_89 = arith.constant 0 : index
      %c0_90 = arith.constant 0 : index
      %c0_91 = arith.constant 0 : index
      %92 = vector.load %arg3[%c0_88, %c0_89, %c0_90, %c0_91] : memref<1x1x16x4xbf16, #tpu.memory_space<vmem>>, vector<1x1x16x4xbf16>
      %93 = vector.shape_cast %92 : vector<1x1x16x4xbf16> to vector<1x16x4xbf16>
      %c0_92 = arith.constant 0 : index
      %c1_93 = arith.constant 1 : index
      %c0_94 = arith.constant 0 : index
      %94 = vector.load %arg8[%c0_92, %c1_93, %c0_94] : memref<10x18x4xbf16, #tpu.memory_space<vmem>>, vector<1x16x4xbf16>
      tpu.vector_store %arg8[%c0_92, %c1_93, %c0_94], %93 {strides = array<i32>} : memref<10x18x4xbf16, #tpu.memory_space<vmem>>, vector<1x16x4xbf16>,
    } else {
    }
    %c0_i32_11 = arith.constant 0 : i32
    %9 = arith.cmpi eq, %arg1, %c0_i32_11 : i32
    %10 = arith.extui %9 : i1 to i32
    %c0_i32_12 = arith.constant 0 : i32
    %11 = arith.cmpi ne, %10, %c0_i32_12 : i32
    scf.if %11 {
      %cst_88 = arith.constant 0.000000e+00 : bf16
      %92 = vector.broadcast %cst_88 : bf16 to vector<1x16x4xbf16>
      %c0_89 = arith.constant 0 : index
      %c1_90 = arith.constant 1 : index
      %c0_91 = arith.constant 0 : index
      %93 = vector.load %arg8[%c0_89, %c1_90, %c0_91] : memref<10x18x4xbf16, #tpu.memory_space<vmem>>, vector<1x16x4xbf16>
      tpu.vector_store %arg8[%c0_89, %c1_90, %c0_91], %92 {strides = array<i32>} : memref<10x18x4xbf16, #tpu.memory_space<vmem>>, vector<1x16x4xbf16>,
    } else {
    }
    %c1_i32 = arith.constant 1 : i32
    %12 = arith.cmpi slt, %arg1, %c1_i32 : i32
    %13 = arith.extui %12 : i1 to i32
    %c0_i32_13 = arith.constant 0 : i32
    %14 = arith.cmpi ne, %13, %c0_i32_13 : i32
    scf.if %14 {
      %c0_88 = arith.constant 0 : index
      %c0_89 = arith.constant 0 : index
      %c0_90 = arith.constant 0 : index
      %c0_91 = arith.constant 0 : index
      %92 = vector.load %arg4[%c0_88, %c0_89, %c0_90, %c0_91] : memref<1x1x16x4xbf16, #tpu.memory_space<vmem>>, vector<1x1x16x4xbf16>
      %93 = vector.shape_cast %92 : vector<1x1x16x4xbf16> to vector<1x16x4xbf16>
      %c9 = arith.constant 9 : index
      %c1_92 = arith.constant 1 : index
      %c0_93 = arith.constant 0 : index
      %94 = vector.load %arg8[%c9, %c1_92, %c0_93] : memref<10x18x4xbf16, #tpu.memory_space<vmem>>, vector<1x16x4xbf16>
      tpu.vector_store %arg8[%c9, %c1_92, %c0_93], %93 {strides = array<i32>} : memref<10x18x4xbf16, #tpu.memory_space<vmem>>, vector<1x16x4xbf16>,
    } else {
    }
    %c1_i32_14 = arith.constant 1 : i32
    %15 = arith.cmpi eq, %arg1, %c1_i32_14 : i32
    %16 = arith.extui %15 : i1 to i32
    %c0_i32_15 = arith.constant 0 : i32
    %17 = arith.cmpi ne, %16, %c0_i32_15 : i32
    scf.if %17 {
      %cst_88 = arith.constant 0.000000e+00 : bf16
      %92 = vector.broadcast %cst_88 : bf16 to vector<1x16x4xbf16>
      %c9 = arith.constant 9 : index
      %c1_89 = arith.constant 1 : index
      %c0_90 = arith.constant 0 : index
      %93 = vector.load %arg8[%c9, %c1_89, %c0_90] : memref<10x18x4xbf16, #tpu.memory_space<vmem>>, vector<1x16x4xbf16>
      tpu.vector_store %arg8[%c9, %c1_89, %c0_90], %92 {strides = array<i32>} : memref<10x18x4xbf16, #tpu.memory_space<vmem>>, vector<1x16x4xbf16>,
    } else {
    }
    %cst_16 = arith.constant 0.000000e+00 : f32
    %18 = vector.broadcast %cst_16 : f32 to vector<128x32xf32>
    %c0_17 = arith.constant 0 : index
    %c0_18 = arith.constant 0 : index
    %c0_19 = arith.constant 0 : index
    %19 = vector.load %arg8[%c0_17, %c0_18, %c0_19] : memref<10x18x4xbf16, #tpu.memory_space<vmem>>, vector<8x16x4xbf16>
    %20 = vector.shape_cast %19 : vector<8x16x4xbf16> to vector<128x4xbf16>
    %c0_20 = arith.constant 0 : index
    %c0_21 = arith.constant 0 : index
    %c0_22 = arith.constant 0 : index
    %21 = vector.load %arg5[%c0_20, %c0_21, %c0_22] : memref<9x4x32xbf16, #tpu.memory_space<vmem>>, vector<1x4x32xbf16>
    %22 = vector.shape_cast %21 : vector<1x4x32xbf16> to vector<4x32xbf16>
    %cst_23 = arith.constant dense<0.000000e+00> : vector<128x32xf32>
    %23 = tpu.matmul %20, %22, %cst_23 {dimension_numbers = #tpu.dot_dimension_numbers<[1], [0], [0], [1], [0, 0, 1, 1], [], []>} : vector<128x4xbf16>, vector<4x32xbf16>, vector<128x32xf32> -> vector<128x32xf32>
    %24 = arith.addf %18, %23 : vector<128x32xf32>
    %c0_24 = arith.constant 0 : index
    %c1_25 = arith.constant 1 : index
    %c0_26 = arith.constant 0 : index
    %25 = vector.load %arg8[%c0_24, %c1_25, %c0_26] : memref<10x18x4xbf16, #tpu.memory_space<vmem>>, vector<8x16x4xbf16>
    %26 = vector.shape_cast %25 : vector<8x16x4xbf16> to vector<128x4xbf16>
    %c1_27 = arith.constant 1 : index
    %c0_28 = arith.constant 0 : index
    %c0_29 = arith.constant 0 : index
    %27 = vector.load %arg5[%c1_27, %c0_28, %c0_29] : memref<9x4x32xbf16, #tpu.memory_space<vmem>>, vector<1x4x32xbf16>
    %28 = vector.shape_cast %27 : vector<1x4x32xbf16> to vector<4x32xbf16>
    %cst_30 = arith.constant dense<0.000000e+00> : vector<128x32xf32>
    %29 = tpu.matmul %26, %28, %cst_30 {dimension_numbers = #tpu.dot_dimension_numbers<[1], [0], [0], [1], [0, 0, 1, 1], [], []>} : vector<128x4xbf16>, vector<4x32xbf16>, vector<128x32xf32> -> vector<128x32xf32>
    %30 = arith.addf %24, %29 : vector<128x32xf32>
    %c0_31 = arith.constant 0 : index
    %c2 = arith.constant 2 : index
    %c0_32 = arith.constant 0 : index
    %31 = vector.load %arg8[%c0_31, %c2, %c0_32] : memref<10x18x4xbf16, #tpu.memory_space<vmem>>, vector<8x16x4xbf16>
    %32 = vector.shape_cast %31 : vector<8x16x4xbf16> to vector<128x4xbf16>
    %c2_33 = arith.constant 2 : index
    %c0_34 = arith.constant 0 : index
    %c0_35 = arith.constant 0 : index
    %33 = vector.load %arg5[%c2_33, %c0_34, %c0_35] : memref<9x4x32xbf16, #tpu.memory_space<vmem>>, vector<1x4x32xbf16>
    %34 = vector.shape_cast %33 : vector<1x4x32xbf16> to vector<4x32xbf16>
    %cst_36 = arith.constant dense<0.000000e+00> : vector<128x32xf32>
    %35 = tpu.matmul %32, %34, %cst_36 {dimension_numbers = #tpu.dot_dimension_numbers<[1], [0], [0], [1], [0, 0, 1, 1], [], []>} : vector<128x4xbf16>, vector<4x32xbf16>, vector<128x32xf32> -> vector<128x32xf32>
    %36 = arith.addf %30, %35 : vector<128x32xf32>
    %c1_37 = arith.constant 1 : index
    %c0_38 = arith.constant 0 : index
    %c0_39 = arith.constant 0 : index
    %37 = vector.load %arg8[%c1_37, %c0_38, %c0_39] : memref<10x18x4xbf16, #tpu.memory_space<vmem>>, vector<8x16x4xbf16>
    %38 = vector.shape_cast %37 : vector<8x16x4xbf16> to vector<128x4xbf16>
    %c3 = arith.constant 3 : index
    %c0_40 = arith.constant 0 : index
    %c0_41 = arith.constant 0 : index
    %39 = vector.load %arg5[%c3, %c0_40, %c0_41] : memref<9x4x32xbf16, #tpu.memory_space<vmem>>, vector<1x4x32xbf16>
    %40 = vector.shape_cast %39 : vector<1x4x32xbf16> to vector<4x32xbf16>
    %cst_42 = arith.constant dense<0.000000e+00> : vector<128x32xf32>
    %41 = tpu.matmul %38, %40, %cst_42 {dimension_numbers = #tpu.dot_dimension_numbers<[1], [0], [0], [1], [0, 0, 1, 1], [], []>} : vector<128x4xbf16>, vector<4x32xbf16>, vector<128x32xf32> -> vector<128x32xf32>
    %42 = arith.addf %36, %41 : vector<128x32xf32>
    %c1_43 = arith.constant 1 : index
    %c1_44 = arith.constant 1 : index
    %c0_45 = arith.constant 0 : index
    %43 = vector.load %arg8[%c1_43, %c1_44, %c0_45] : memref<10x18x4xbf16, #tpu.memory_space<vmem>>, vector<8x16x4xbf16>
    %44 = vector.shape_cast %43 : vector<8x16x4xbf16> to vector<128x4xbf16>
    %c4 = arith.constant 4 : index
    %c0_46 = arith.constant 0 : index
    %c0_47 = arith.constant 0 : index
    %45 = vector.load %arg5[%c4, %c0_46, %c0_47] : memref<9x4x32xbf16, #tpu.memory_space<vmem>>, vector<1x4x32xbf16>
    %46 = vector.shape_cast %45 : vector<1x4x32xbf16> to vector<4x32xbf16>
    %cst_48 = arith.constant dense<0.000000e+00> : vector<128x32xf32>
    %47 = tpu.matmul %44, %46, %cst_48 {dimension_numbers = #tpu.dot_dimension_numbers<[1], [0], [0], [1], [0, 0, 1, 1], [], []>} : vector<128x4xbf16>, vector<4x32xbf16>, vector<128x32xf32> -> vector<128x32xf32>
    %48 = arith.addf %42, %47 : vector<128x32xf32>
    %c1_49 = arith.constant 1 : index
    %c2_50 = arith.constant 2 : index
    %c0_51 = arith.constant 0 : index
    %49 = vector.load %arg8[%c1_49, %c2_50, %c0_51] : memref<10x18x4xbf16, #tpu.memory_space<vmem>>, vector<8x16x4xbf16>
    %50 = vector.shape_cast %49 : vector<8x16x4xbf16> to vector<128x4xbf16>
    %c5 = arith.constant 5 : index
    %c0_52 = arith.constant 0 : index
    %c0_53 = arith.constant 0 : index
    %51 = vector.load %arg5[%c5, %c0_52, %c0_53] : memref<9x4x32xbf16, #tpu.memory_space<vmem>>, vector<1x4x32xbf16>
    %52 = vector.shape_cast %51 : vector<1x4x32xbf16> to vector<4x32xbf16>
    %cst_54 = arith.constant dense<0.000000e+00> : vector<128x32xf32>
    %53 = tpu.matmul %50, %52, %cst_54 {dimension_numbers = #tpu.dot_dimension_numbers<[1], [0], [0], [1], [0, 0, 1, 1], [], []>} : vector<128x4xbf16>, vector<4x32xbf16>, vector<128x32xf32> -> vector<128x32xf32>
    %54 = arith.addf %48, %53 : vector<128x32xf32>
    %c2_55 = arith.constant 2 : index
    %c0_56 = arith.constant 0 : index
    %c0_57 = arith.constant 0 : index
    %55 = vector.load %arg8[%c2_55, %c0_56, %c0_57] : memref<10x18x4xbf16, #tpu.memory_space<vmem>>, vector<8x16x4xbf16>
    %56 = vector.shape_cast %55 : vector<8x16x4xbf16> to vector<128x4xbf16>
    %c6 = arith.constant 6 : index
    %c0_58 = arith.constant 0 : index
    %c0_59 = arith.constant 0 : index
    %57 = vector.load %arg5[%c6, %c0_58, %c0_59] : memref<9x4x32xbf16, #tpu.memory_space<vmem>>, vector<1x4x32xbf16>
    %58 = vector.shape_cast %57 : vector<1x4x32xbf16> to vector<4x32xbf16>
    %cst_60 = arith.constant dense<0.000000e+00> : vector<128x32xf32>
    %59 = tpu.matmul %56, %58, %cst_60 {dimension_numbers = #tpu.dot_dimension_numbers<[1], [0], [0], [1], [0, 0, 1, 1], [], []>} : vector<128x4xbf16>, vector<4x32xbf16>, vector<128x32xf32> -> vector<128x32xf32>
    %60 = arith.addf %54, %59 : vector<128x32xf32>
    %c2_61 = arith.constant 2 : index
    %c1_62 = arith.constant 1 : index
    %c0_63 = arith.constant 0 : index
    %61 = vector.load %arg8[%c2_61, %c1_62, %c0_63] : memref<10x18x4xbf16, #tpu.memory_space<vmem>>, vector<8x16x4xbf16>
    %62 = vector.shape_cast %61 : vector<8x16x4xbf16> to vector<128x4xbf16>
    %c7 = arith.constant 7 : index
    %c0_64 = arith.constant 0 : index
    %c0_65 = arith.constant 0 : index
    %63 = vector.load %arg5[%c7, %c0_64, %c0_65] : memref<9x4x32xbf16, #tpu.memory_space<vmem>>, vector<1x4x32xbf16>
    %64 = vector.shape_cast %63 : vector<1x4x32xbf16> to vector<4x32xbf16>
    %cst_66 = arith.constant dense<0.000000e+00> : vector<128x32xf32>
    %65 = tpu.matmul %62, %64, %cst_66 {dimension_numbers = #tpu.dot_dimension_numbers<[1], [0], [0], [1], [0, 0, 1, 1], [], []>} : vector<128x4xbf16>, vector<4x32xbf16>, vector<128x32xf32> -> vector<128x32xf32>
    %66 = arith.addf %60, %65 : vector<128x32xf32>
    %c2_67 = arith.constant 2 : index
    %c2_68 = arith.constant 2 : index
    %c0_69 = arith.constant 0 : index
    %67 = vector.load %arg8[%c2_67, %c2_68, %c0_69] : memref<10x18x4xbf16, #tpu.memory_space<vmem>>, vector<8x16x4xbf16>
    %68 = vector.shape_cast %67 : vector<8x16x4xbf16> to vector<128x4xbf16>
    %c8 = arith.constant 8 : index
    %c0_70 = arith.constant 0 : index
    %c0_71 = arith.constant 0 : index
    %69 = vector.load %arg5[%c8, %c0_70, %c0_71] : memref<9x4x32xbf16, #tpu.memory_space<vmem>>, vector<1x4x32xbf16>
    %70 = vector.shape_cast %69 : vector<1x4x32xbf16> to vector<4x32xbf16>
    %cst_72 = arith.constant dense<0.000000e+00> : vector<128x32xf32>
    %71 = tpu.matmul %68, %70, %cst_72 {dimension_numbers = #tpu.dot_dimension_numbers<[1], [0], [0], [1], [0, 0, 1, 1], [], []>} : vector<128x4xbf16>, vector<4x32xbf16>, vector<128x32xf32> -> vector<128x32xf32>
    %72 = arith.addf %66, %71 : vector<128x32xf32>
    %c0_73 = arith.constant 0 : index
    %c0_74 = arith.constant 0 : index
    %73 = vector.load %arg6[%c0_73, %c0_74] : memref<1x32xf32, #tpu.memory_space<vmem>>, vector<1x32xf32>
    %74 = vector.broadcast %73 : vector<1x32xf32> to vector<128x32xf32>
    %75 = arith.addf %72, %74 : vector<128x32xf32>
    %76 = vector.extract_strided_slice %75 {offsets = [0, 0], sizes = [128, 16], strides = [1, 1]} : vector<128x32xf32> to vector<128x16xf32>
    %77 = vector.extract_strided_slice %75 {offsets = [0, 16], sizes = [128, 16], strides = [1, 1]} : vector<128x32xf32> to vector<128x16xf32>
    %cst_75 = arith.constant 5.000000e-01 : f32
    %78 = vector.broadcast %cst_75 : f32 to vector<128x16xf32>
    %79 = arith.mulf %78, %77 : vector<128x16xf32>
    %80 = math.tanh %79 : vector<128x16xf32>
    %cst_76 = arith.constant 5.000000e-01 : f32
    %81 = vector.broadcast %cst_76 : f32 to vector<128x16xf32>
    %82 = arith.mulf %81, %80 : vector<128x16xf32>
    %cst_77 = arith.constant 5.000000e-01 : f32
    %83 = vector.broadcast %cst_77 : f32 to vector<128x16xf32>
    %84 = arith.addf %82, %83 : vector<128x16xf32>
    %85 = arith.mulf %76, %84 : vector<128x16xf32>
    %86 = vector.extract_strided_slice %85 {offsets = [0, 0], sizes = [128, 8], strides = [1, 1]} : vector<128x16xf32> to vector<128x8xf32>
    %87 = vector.shape_cast %86 : vector<128x8xf32> to vector<1x8x1x16x8xf32>
    %c0_78 = arith.constant 0 : index
    %c0_79 = arith.constant 0 : index
    %c0_80 = arith.constant 0 : index
    %c0_81 = arith.constant 0 : index
    %c0_82 = arith.constant 0 : index
    %88 = vector.load %arg7[%c0_78, %c0_79, %c0_80, %c0_81, %c0_82] : memref<1x8x2x16x8xf32, #tpu.memory_space<vmem>>, vector<1x8x1x16x8xf32>
    tpu.vector_store %arg7[%c0_78, %c0_79, %c0_80, %c0_81, %c0_82], %87 {strides = array<i32>} : memref<1x8x2x16x8xf32, #tpu.memory_space<vmem>>, vector<1x8x1x16x8xf32>,
    %89 = vector.extract_strided_slice %85 {offsets = [0, 8], sizes = [128, 8], strides = [1, 1]} : vector<128x16xf32> to vector<128x8xf32>
    %90 = vector.shape_cast %89 : vector<128x8xf32> to vector<1x8x1x16x8xf32>
    %c0_83 = arith.constant 0 : index
    %c0_84 = arith.constant 0 : index
    %c1_85 = arith.constant 1 : index
    %c0_86 = arith.constant 0 : index
    %c0_87 = arith.constant 0 : index
    %91 = vector.load %arg7[%c0_83, %c0_84, %c1_85, %c0_86, %c0_87] : memref<1x8x2x16x8xf32, #tpu.memory_space<vmem>>, vector<1x8x1x16x8xf32>
    tpu.vector_store %arg7[%c0_83, %c0_84, %c1_85, %c0_86, %c0_87], %90 {strides = array<i32>} : memref<1x8x2x16x8xf32, #tpu.memory_space<vmem>>, vector<1x8x1x16x8xf32>,
    return
  }
  func.func @transform_0(%arg0: i32, %arg1: i32) -> (i32, i32, i32, i32) {
    %c0_i32 = arith.constant 0 : i32
    %c0_i32_0 = arith.constant 0 : i32
    %c0_i32_1 = arith.constant 0 : i32
    return %arg0, %arg1, %c0_i32, %c0_i32_0 : i32, i32, i32, i32
  }
  func.func @transform_1(%arg0: i32, %arg1: i32) -> (i32, i32, i32, i32) {
    %c8_i32 = arith.constant 8 : i32
    %0 = arith.muli %arg1, %c8_i32 : i32
    %c1_i32 = arith.constant 1 : i32
    %1 = arith.subi %0, %c1_i32 : i32
    %c0_i32 = arith.constant 0 : i32
    %2 = arith.maxsi %1, %c0_i32 : i32
    %c0_i32_0 = arith.constant 0 : i32
    %c0_i32_1 = arith.constant 0 : i32
    %c0_i32_2 = arith.constant 0 : i32
    return %arg0, %2, %c0_i32_0, %c0_i32_1 : i32, i32, i32, i32
  }
  func.func @transform_2(%arg0: i32, %arg1: i32) -> (i32, i32, i32, i32) {
    %c8_i32 = arith.constant 8 : i32
    %0 = arith.muli %arg1, %c8_i32 : i32
    %c8_i32_0 = arith.constant 8 : i32
    %1 = arith.addi %0, %c8_i32_0 : i32
    %c15_i32 = arith.constant 15 : i32
    %2 = arith.minsi %1, %c15_i32 : i32
    %c0_i32 = arith.constant 0 : i32
    %c0_i32_1 = arith.constant 0 : i32
    %c0_i32_2 = arith.constant 0 : i32
    return %arg0, %2, %c0_i32, %c0_i32_1 : i32, i32, i32, i32
  }
  func.func @transform_3(%arg0: i32, %arg1: i32) -> (i32, i32, i32) {
    %c0_i32 = arith.constant 0 : i32
    %c0_i32_0 = arith.constant 0 : i32
    %c0_i32_1 = arith.constant 0 : i32
    %c0_i32_2 = arith.constant 0 : i32
    return %c0_i32, %c0_i32_0, %c0_i32_1 : i32, i32, i32
  }
  func.func @transform_4(%arg0: i32, %arg1: i32) -> (i32, i32) {
    %c0_i32 = arith.constant 0 : i32
    %c0_i32_0 = arith.constant 0 : i32
    %c0_i32_1 = arith.constant 0 : i32
    return %c0_i32, %c0_i32_0 : i32, i32
  }
  func.func @transform_5(%arg0: i32, %arg1: i32) -> (i32, i32, i32, i32, i32) {
    %c0_i32 = arith.constant 0 : i32
    %c0_i32_0 = arith.constant 0 : i32
    %c0_i32_1 = arith.constant 0 : i32
    %c0_i32_2 = arith.constant 0 : i32
    return %arg0, %arg1, %c0_i32, %c0_i32_0, %c0_i32_1 : i32, i32, i32, i32, i32
  }
}

</mosaic_0001>

<bundles_post_ra>
// kernel: tpu_custom_call.1
= control target key start
LH: loop header
LB: loop body
LE: loop exit
PB: predicated region body
PF: predicated region fallthrough
CT: control target
= control target key end

     0   :  { %s4442_s18 = smov 0   ;;  %s4444_s19 = smov 0   ;;  %s5636_s0 = inlined_call_operand.vmem [shape: bf16[2,16,16,4], index: 0, kind: input, shape index: {}]   ;;  %s5637_s1 = inlined_call_operand.vmem [shape: bf16[2,16,16,4], index: 1, kind: input, shape index: {}]   ;;  %s5638_s2 = inlined_call_operand.vmem [shape: bf16[2,16,16,4], index: 2, kind: input, shape index: {}]   ;;  %s5639_s3 = inlined_call_operand.vmem [shape: bf16[9,4,32], index: 3, kind: input, shape index: {}]   ;;  %s5640_s4 = inlined_call_operand.vmem [shape: f32[1,32], index: 4, kind: input, shape index: {}]   ;;  %s5641_s5 = inlined_call_operand.vmem [shape: f32[2,16,2,16,8], index: 5, kind: output, shape index: {}]  }
   0x1   :  { %s4446_s20 = smov 0   ;;  %s4448_s21 = smov 0  }
   0x2   :  { %s4450_s22 = smov 0  }
   0x3 LB: > { %s24_s23 = sadd.s32 1, %s4398_s20  ;;  %s27_s24 = sadd.s32 1, %s4402_s21  ;;  %s4406_s22 = sphi %s4450_s22, %s15_s22   ;;  %s4402_s21 = sphi %s4448_s21, %s5675_s21   ;;  %s4398_s20 = sphi %s4446_s20, %s5674_s20   ;;  %s4394_s19 = sphi %s4444_s19, %s5673_s19   ;;  %s4390_s18 = sphi %s4442_s18, %s5672_s18  }
   0x4   : > { %p25_p0 = scmp.ge.s32.totalorder %s24_s23, 2  ;;  %p3657_p1 = scmp.ge.s32.totalorder %s4406_s22, 1 }
   0x5   : > { %p273_p2 = scmp.lt.s32.totalorder %s4406_s22, 5 }
   0x6   : > { %s5677_s23 = smov (%p25_p0, %s24_s23), 0  ;;  %s5679_s24 = smov (!%p25_p0, %s27_s24), %s4402_s21 }
   0x7   : > { %p274_p3 = pnand %p3657_p1, %p273_p2  ;;  %p29_p4 = scmp.ge.s32.totalorder %s5679_s24, 2 }
   0x9   : > { %s5681_s24 = smov (%p29_p4, %s5679_s24), 0  ;;  %277 = sbr.rel (%p274_p3) target bundleno = 763 (0x2fb), region = 40 }
  0x10   : > { %vm394_vm0 = vcmask 24576   ;;  %vm395_vm1 = vsmask.f32 256  ;;  %v400_v0 = vld [vmem:[#allocation2 + $0xc] sm:$0x1]  ;;  %s4477_s25 = sshll.u32 %s4390_s18, 3 }
  0x11   : > { %vm4481_vm2 = vmand %vm394_vm0, %vm395_vm1  ;;  %v403_v2 = vld [vmem:[#allocation2 + $0x18] sm:$0x1]  ;;  %v406_v3 = vld [vmem:[#allocation2 + $0x24] sm:$0x1]  ;;  %vm427_vm3 = vsmask.f32 7938 }
  0x12   : > { %v401_v4 = vsel %vm4481_vm2, 0, %v400_v0  ;;  %v404_v5 = vsel %vm4481_vm2, 0, %v403_v2  ;;  %v407_v6 = vsel %vm4481_vm2, 0, %v406_v3  ;;  %v409_v7 = vld [vmem:[#allocation2 + $0x30] sm:$0x1]  ;;  %p338_p5 = scmp.lt.s32.totalorder %s4394_s19, 1  ;;  %vm4496_vm4 = vmand %vm394_vm0, %vm427_vm3 }
  0x13   : > { %402 = vst [vmem:[#allocation2 + $0xc] sm:$0x1] %v401_v4  ;;  %405 = vst [vmem:[#allocation2 + $0x18] sm:$0x1] %v404_v5  ;;  %v410_v8 = vsel %vm4481_vm2, 0, %v409_v7  ;;  %p340_p6 = scmp.lt.s32.totalorder %s4477_s25, 15 }
  0x14   : > { %408 = vst [vmem:[#allocation2 + $0x24] sm:$0x1] %v407_v6  ;;  %v412_v9 = vld [vmem:[#allocation2 + $0x3c] sm:$0x1]  ;;  %v415_v10 = vld [vmem:[#allocation2 + $0x48] sm:$0x1] }
  0x15   : > { %411 = vst [vmem:[#allocation2 + $0x30] sm:$0x1] %v410_v8  ;;  %v413_v12 = vsel %vm4481_vm2, 0, %v412_v9  ;;  %v416_v13 = vsel %vm4481_vm2, 0, %v415_v10  ;;  %v418_v14 = vld [vmem:[#allocation2 + $0x54] sm:$0x1] }
  0x16   : > { %v421_v15 = vld [vmem:[#allocation2 + $0x60] sm:$0x1]  ;;  %414 = vst [vmem:[#allocation2 + $0x3c] sm:$0x1] %v413_v12  ;;  %417 = vst [vmem:[#allocation2 + $0x48] sm:$0x1] %v416_v13 }
  0x17   : > { %v419_v16 = vsel %vm4481_vm2, 0, %v418_v14  ;;  %v422_v17 = vsel %vm4481_vm2, 0, %v421_v15  ;;  %v432_v18 = vld [vmem:[#allocation2 + $0x14] sm:$0x1]  ;;  %v435_v19 = vld [vmem:[#allocation2 + $0x20] sm:$0x1] }
  0x18   : > { %420 = vst [vmem:[#allocation2 + $0x54] sm:$0x1] %v419_v16  ;;  %423 = vst [vmem:[#allocation2 + $0x60] sm:$0x1] %v422_v17  ;;  %v433_v20 = vsel %vm4496_vm4, 0, %v432_v18  ;;  %v436_v21 = vsel %vm4496_vm4, 0, %v435_v19 }
  0x19   : > { %v438_v22 = vld [vmem:[#allocation2 + $0x2c] sm:$0x1]  ;;  %v441_v23 = vld [vmem:[#allocation2 + $0x38] sm:$0x1]  ;;  %434 = vst [vmem:[#allocation2 + $0x14] sm:$0x1] %v433_v20 }
  0x1a   : > { %437 = vst [vmem:[#allocation2 + $0x20] sm:$0x1] %v436_v21  ;;  %v439_v24 = vsel %vm4496_vm4, 0, %v438_v22  ;;  %v442_v25 = vsel %vm4496_vm4, 0, %v441_v23  ;;  %v444_v26 = vld [vmem:[#allocation2 + $0x44] sm:$0x1] }
  0x1b   : > { %v447_v27 = vld [vmem:[#allocation2 + $0x50] sm:$0x1]  ;;  %440 = vst [vmem:[#allocation2 + $0x2c] sm:$0x1] %v439_v24  ;;  %443 = vst [vmem:[#allocation2 + $0x38] sm:$0x1] %v442_v25 }
  0x1c   : > { %v445_v28 = vsel %vm4496_vm4, 0, %v444_v26  ;;  %v448_v29 = vsel %vm4496_vm4, 0, %v447_v27  ;;  %v450_v30 = vld [vmem:[#allocation2 + $0x5c] sm:$0x1]  ;;  %v453_v31 = vld [vmem:[#allocation2 + $0x68] sm:$0x1] }
  0x1d   : > { %446 = vst [vmem:[#allocation2 + $0x44] sm:$0x1] %v445_v28  ;;  %449 = vst [vmem:[#allocation2 + $0x50] sm:$0x1] %v448_v29  ;;  %v451_v32 = vsel %vm4496_vm4, 0, %v450_v30  ;;  %v454_v33 = vsel %vm4496_vm4, 0, %v453_v31 }
  0x1e   : > { %v397_v34 = vld [vmem:[#allocation2] sm:$0x1]  ;;  %v424_v35 = vld [vmem:[#allocation2 + $0x6c] sm:$0x1]  ;;  %452 = vst [vmem:[#allocation2 + $0x5c] sm:$0x1] %v451_v32 }
  0x1f   : > { %455 = vst [vmem:[#allocation2 + $0x68] sm:$0x1] %v454_v33  ;;  %v398_v36 = vsel %vm4481_vm2, 0, %v397_v34  ;;  %v425_v37 = vsel %vm4481_vm2, 0, %v424_v35  ;;  %v429_v38 = vld [vmem:[#allocation2 + $0x8] sm:$0x1] }
  0x20   : > { %v456_v39 = vld [vmem:[#allocation2 + $0x74] sm:$0x1]  ;;  %399 = vst [vmem:[#allocation2] sm:$0x1] %v398_v36  ;;  %426 = vst [vmem:[#allocation2 + $0x6c] sm:$0x1] %v425_v37 }
  0x21   : > { %v430_v40 = vsel %vm4496_vm4, 0, %v429_v38  ;;  %v457_v41 = vsel %vm4496_vm4, 0, %v456_v39  ;;  %s5683_s19 = smov (!%p338_p5, %s4394_s19), 1  ;;  %s3663_s28 = sadd.s32 4294967295, %s4477_s25  ;;  %vm475_vm5 = vsmask.f32 4368 }
  0x22   : > { %431 = vst [vmem:[#allocation2 + $0x8] sm:$0x1] %v430_v40  ;;  %458 = vst [vmem:[#allocation2 + $0x74] sm:$0x1] %v457_v41  ;;  %s4541_s26 = scalar_select %p340_p6, %s4477_s25, 15  ;;  %vm638_vm6 = vcmask 27648  }
  0x23   : > { %s4544_s27 = sshll.u32 %s5683_s19, 5  ;;  %p350_p7 = scmp.gt.s32.totalorder %s3663_s28, 0  ;;  %v640_v48 = vld [vmem:[#allocation2 + $0xc] sm:$0xf]  ;;  %v645_v49 = vld [vmem:[#allocation2 + $0x14] sm:$0x1]  ;;  %vm4570_vm7 = vmand %vm638_vm6, %vm427_vm3 }
  0x24   : > { %s3659_s29 = sshll.u32 %s4541_s26, 1  ;;  %p3664_p8 = scmp.lt.s32.totalorder %s3663_s28, 15  ;;  %vm4577_vm8 = vmor %vm395_vm1, %vm475_vm5  ;;  %v648_v2 = vld [vmem:[#allocation2 + $0x18] sm:$0xf]  ;;  %v652_v11 = vld [vmem:[#allocation2 + $0x20] sm:$0x1] }
  0x25   : > { %s344_s30 = sadd.s32 %s4544_s27, %s3659_s29  ;;  %s366_s7 = sadd.s32 8, %s4477_s25  ;;  %v655_v27 = vld [vmem:[#allocation2 + $0x24] sm:$0xf]  ;;  %v659_v28 = vld [vmem:[#allocation2 + $0x2c] sm:$0x1] }
  0x26   : > { %s3661_s6 = sshll.u32 %s344_s30, 2  ;;  %p4555_p9 = scmp.lt.s32.totalorder %s366_s7, 15 }
  0x27   : > { %s4553_s10 = scalar_lea.vmem %s5636_s0, %s3661_s6  ;;  %s3680_s14 = sshll.u32 %s4541_s26, 2 }
  0x28   : > { %s351_s12 = scalar_select %p350_p7, %s3663_s28, 0  ;;  %v459_v42 = vld [vmem:[%s4553_s10] sm:$0xf]  ;;  %v460_v43 = vld [vmem:[%s4553_s10 + $0x4] sm:$0xf] }
  0x29   : > { %s5685_s7 = smov (!%p4555_p9, %s366_s7), 15  ;;  %v478_v44 = vshrl.u32 %v459_v42, 16  ;;  %v481_v45 = vshll.u32 %v459_v42, 16  ;;  %v486_v46 = vshrl.u32 %v460_v43, 16  ;;  %v489_v47 = vshll.u32 %v460_v43, 16  ;;  %s3681_s9 = sshll.u32 %s5683_s19, 6 }
  0x2a   : > { %s5687_s12 = smov (!%p3664_p8, %s351_s12), 15  ;;  %v461_v50 = vld [vmem:[%s4553_s10 + $0x8] sm:$0xf]  ;;  %v462_v51 = vld [vmem:[%s4553_s10 + $0xc] sm:$0xf]  ;;  %s5689_s7 = smov (!%p4555_p9, %s5685_s7), 15 }
  0x2b   : > { %v480_v52 = vrot.slane %v478_v44, 7  ;;  %v488_v54 = vrot.slane %v486_v46, 7  ;;  %v495_v55 = vshrl.u32 %v461_v50, 16  ;;  %v498_v56 = vshll.u32 %v461_v50, 16  ;;  %s3669_s13 = sshll.u32 %s5687_s12, 1  ;;  %s3676_s16 = sshll.u32 %s5689_s7, 1 }
  0x2c   : > { %v503_v58 = vshrl.u32 %v462_v51, 16  ;;  %v506_v59 = vshll.u32 %v462_v51, 16  ;;  %v463_v60 = vld [vmem:[%s4553_s10 + $0x10] sm:$0xf]  ;;  %s358_s15 = sadd.s32 %s3669_s13, %s4544_s27  ;;  %v464_v3 = vld [vmem:[%s4553_s10 + $0x14] sm:$0xf]  ;;  %s375_s25 = sadd.s32 %s3676_s16, %s4544_s27 }
  0x2d   : > { %v483_v61 = vor.u32 %v481_v45, %v480_v52  ;;  %v484_v62 = vrot.slane %v480_v52, 4  ;;  %v491_v63 = vor.u32 %v489_v47, %v488_v54  ;;  %v493_v0 = vrot.slane %v488_v54, 4  ;;  %s3671_s17 = sshll.u32 %s358_s15, 2  ;;  %s3678_s6 = sshll.u32 %s375_s25, 2  ;;  %v465_v13 = vld [vmem:[%s4553_s10 + $0x18] sm:$0xf] }
  0x2e   : > { %v497_v4 = vrot.slane %v495_v55, 7  ;;  %v505_v5 = vrot.slane %v503_v58, 7  ;;  %v512_v6 = vshrl.u32 %v463_v60, 16  ;;  %v515_v7 = vshll.u32 %v463_v60, 16  ;;  %s4588_s30 = scalar_lea.vmem %s5637_s1, %s3671_s17  ;;  %s4600_s8 = scalar_lea.vmem %s5638_s2, %s3678_s6  ;;  %v466_v18 = vld [vmem:[%s4553_s10 + $0x1c] sm:$0xf] }
  0x2f   : > { %v641_v8 = vsel %vm4570_vm7, %v483_v61, %v640_v48  ;;  %v492_v9 = vsel %vm4577_vm8, %v484_v62, %v491_v63  ;;  %v646_v10 = vsel %vm4481_vm2, %v493_v0, %v645_v49  ;;  %v520_v12 = vshrl.u32 %v464_v3, 16  ;;  %s389_s11 = sadd.s32 %s3681_s9, %s3680_s14  ;;  %v467_v23 = vld [vmem:[%s4553_s10 + $0x20] sm:$0xf]  ;;  %v468_v34 = vld [vmem:[%s4553_s10 + $0x24] sm:$0xf]  ;;  %p3683_p10 = scmp.le.s32.totalorder %s4390_s18, 0 }
  0x30   : > { %642 = vst [vmem:[#allocation2 + $0xc] sm:$0xf] %v641_v8  ;;  %644 = vst.msk [vmem:[#allocation2 + $0x10] sm:$0xf] %vm638_vm6, %v492_v9  ;;  %v500_v14 = vor.u32 %v498_v56, %v497_v4  ;;  %v501_v15 = vrot.slane %v497_v4, 4  ;;  %v508_v16 = vor.u32 %v506_v59, %v505_v5  ;;  %v510_v17 = vrot.slane %v505_v5, 4 }
  0x31   : > { %647 = vst [vmem:[#allocation2 + $0x14] sm:$0x1] %v646_v10  ;;  %v514_v19 = vrot.slane %v512_v6, 7  ;;  %v522_v20 = vrot.slane %v520_v12, 7  ;;  %v523_v21 = vshll.u32 %v464_v3, 16  ;;  %v529_v22 = vshrl.u32 %v465_v13, 16 }
  0x32   : > { %s3682_s12 = sshll.u32 %s389_s11, 3  ;;  %v649_v24 = vsel %vm4570_vm7, %v500_v14, %v648_v2  ;;  %v509_v25 = vsel %vm4577_vm8, %v501_v15, %v508_v16  ;;  %v653_v26 = vsel %vm4481_vm2, %v510_v17, %v652_v11  ;;  %v532_v29 = vshll.u32 %v465_v13, 16  ;;  %v469_v39 = vld [vmem:[%s4553_s10 + $0x28] sm:$0xf]  ;;  %v662_v43 = vld [vmem:[#allocation2 + $0x30] sm:$0xf] }
  0x33   : > { %s4617_s13 = scalar_lea.vmem %s5641_s5, %s3682_s12  ;;  %650 = vst [vmem:[#allocation2 + $0x18] sm:$0xf] %v649_v24  ;;  %651 = vst.msk [vmem:[#allocation2 + $0x1c] sm:$0xf] %vm638_vm6, %v509_v25  ;;  %v517_v30 = vor.u32 %v515_v7, %v514_v19  ;;  %v518_v31 = vrot.slane %v514_v19, 4  ;;  %v525_v32 = vor.u32 %v523_v21, %v522_v20  ;;  %v527_v33 = vrot.slane %v522_v20, 4 }
  0x34   : > { %654 = vst [vmem:[#allocation2 + $0x20] sm:$0x1] %v653_v26  ;;  %v531_v35 = vrot.slane %v529_v22, 7  ;;  %v537_v36 = vshrl.u32 %v466_v18, 16  ;;  %v540_v37 = vshll.u32 %v466_v18, 16  ;;  %v546_v38 = vshrl.u32 %v467_v23, 16 }
  0x35   : > { %v656_v40 = vsel %vm4570_vm7, %v517_v30, %v655_v27  ;;  %v526_v41 = vsel %vm4577_vm8, %v518_v31, %v525_v32  ;;  %v660_v42 = vsel %vm4481_vm2, %v527_v33, %v659_v28  ;;  %v666_v44 = vld [vmem:[#allocation2 + $0x38] sm:$0x1]  ;;  %v549_v45 = vshll.u32 %v467_v23, 16  ;;  %v470_v50 = vld [vmem:[%s4553_s10 + $0x2c] sm:$0xf] }
  0x36   : > { %657 = vst [vmem:[#allocation2 + $0x24] sm:$0xf] %v656_v40  ;;  %658 = vst.msk [vmem:[#allocation2 + $0x28] sm:$0xf] %vm638_vm6, %v526_v41  ;;  %v534_v46 = vor.u32 %v532_v29, %v531_v35  ;;  %v535_v47 = vrot.slane %v531_v35, 4  ;;  %v539_v48 = vrot.slane %v537_v36, 7 }
  0x37   : > { %661 = vst [vmem:[#allocation2 + $0x2c] sm:$0x1] %v660_v42  ;;  %v548_v49 = vrot.slane %v546_v38, 7  ;;  %v669_v51 = vld [vmem:[#allocation2 + $0x3c] sm:$0xf]  ;;  %v554_v52 = vshrl.u32 %v468_v34, 16 }
  0x38   : > { %v557_v54 = vshll.u32 %v468_v34, 16  ;;  %v563_v55 = vshrl.u32 %v469_v39, 16  ;;  %v566_v56 = vshll.u32 %v469_v39, 16  ;;  %v663_v58 = vsel %vm4570_vm7, %v534_v46, %v662_v43  ;;  %v471_v62 = vld [vmem:[%s4553_s10 + $0x30] sm:$0xf] }
  0x39   : > { %v542_v59 = vor.u32 %v540_v37, %v539_v48  ;;  %v544_v60 = vrot.slane %v539_v48, 4  ;;  %v551_v61 = vor.u32 %v549_v45, %v548_v49  ;;  %664 = vst [vmem:[#allocation2 + $0x30] sm:$0xf] %v663_v58  ;;  %v552_v63 = vrot.slane %v548_v49, 4  ;;  %v472_v4 = vld [vmem:[%s4553_s10 + $0x34] sm:$0xf] }
  0x3a   : > { %v556_v0 = vrot.slane %v554_v52, 7  ;;  %v565_v2 = vrot.slane %v563_v55, 7  ;;  %v571_v3 = vshrl.u32 %v470_v50, 16  ;;  %v673_v8 = vld [vmem:[#allocation2 + $0x44] sm:$0x1]  ;;  %v574_v10 = vshll.u32 %v470_v50, 16 }
  0x3b   : > { %v543_v5 = vsel %vm4577_vm8, %v535_v47, %v542_v59  ;;  %v667_v6 = vsel %vm4481_vm2, %v544_v60, %v666_v44  ;;  %v670_v7 = vsel %vm4570_vm7, %v551_v61, %v669_v51  ;;  %v676_v9 = vld [vmem:[#allocation2 + $0x48] sm:$0xf]  ;;  %v473_v15 = vld [vmem:[%s4553_s10 + $0x38] sm:$0xf]  ;;  %v580_v17 = vshrl.u32 %v471_v62, 16 }
  0x3c   : > { %665 = vst.msk [vmem:[#allocation2 + $0x34] sm:$0xf] %vm638_vm6, %v543_v5  ;;  %668 = vst [vmem:[#allocation2 + $0x38] sm:$0x1] %v667_v6  ;;  %v559_v11 = vor.u32 %v557_v54, %v556_v0  ;;  %v561_v12 = vrot.slane %v556_v0, 4  ;;  %v568_v13 = vor.u32 %v566_v56, %v565_v2  ;;  %v569_v14 = vrot.slane %v565_v2, 4 }
  0x3d   : > { %671 = vst [vmem:[#allocation2 + $0x3c] sm:$0xf] %v670_v7  ;;  %v573_v16 = vrot.slane %v571_v3, 7  ;;  %v583_v18 = vshll.u32 %v471_v62, 16  ;;  %v588_v19 = vshrl.u32 %v472_v4, 16  ;;  %v591_v25 = vshll.u32 %v472_v4, 16 }
  0x3e   : > { %v474_v20 = vld [vmem:[%s4553_s10 + $0x3c] sm:$0xf]  ;;  %v560_v21 = vsel %vm4577_vm8, %v552_v63, %v559_v11  ;;  %v674_v22 = vsel %vm4481_vm2, %v561_v12, %v673_v8  ;;  %v677_v23 = vsel %vm4570_vm7, %v568_v13, %v676_v9  ;;  %v680_v24 = vld [vmem:[#allocation2 + $0x50] sm:$0x1]  ;;  %v582_v28 = vrot.slane %v580_v17, 7 }
  0x3f   : > { %672 = vst.msk [vmem:[#allocation2 + $0x40] sm:$0xf] %vm638_vm6, %v560_v21  ;;  %675 = vst [vmem:[#allocation2 + $0x44] sm:$0x1] %v674_v22  ;;  %v576_v26 = vor.u32 %v574_v10, %v573_v16  ;;  %v578_v27 = vrot.slane %v573_v16, 4  ;;  %v590_v29 = vrot.slane %v588_v19, 7 }
  0x40   : > { %678 = vst [vmem:[#allocation2 + $0x48] sm:$0xf] %v677_v23  ;;  %v683_v30 = vld [vmem:[#allocation2 + $0x54] sm:$0xf]  ;;  %v597_v31 = vshrl.u32 %v473_v15, 16  ;;  %v600_v32 = vshll.u32 %v473_v15, 16  ;;  %v585_v37 = vor.u32 %v583_v18, %v582_v28 }
  0x41   : > { %v605_v33 = vshrl.u32 %v474_v20, 16  ;;  %v608_v34 = vshll.u32 %v474_v20, 16  ;;  %v577_v35 = vsel %vm4577_vm8, %v569_v14, %v576_v26  ;;  %v681_v36 = vsel %vm4481_vm2, %v578_v27, %v680_v24  ;;  %v687_v39 = vld [vmem:[#allocation2 + $0x5c] sm:$0x1]  ;;  %v690_v45 = vld [vmem:[#allocation2 + $0x60] sm:$0xf] }
  0x42   : > { %v586_v38 = vrot.slane %v582_v28, 4  ;;  %679 = vst.msk [vmem:[#allocation2 + $0x4c] sm:$0xf] %vm638_vm6, %v577_v35  ;;  %682 = vst [vmem:[#allocation2 + $0x50] sm:$0x1] %v681_v36  ;;  %v593_v40 = vor.u32 %v591_v25, %v590_v29  ;;  %v595_v41 = vrot.slane %v590_v29, 4  ;;  %v684_v44 = vsel %vm4570_vm7, %v585_v37, %v683_v30 }
  0x43   : > { %v599_v42 = vrot.slane %v597_v31, 7  ;;  %v607_v43 = vrot.slane %v605_v33, 7  ;;  %685 = vst [vmem:[#allocation2 + $0x54] sm:$0xf] %v684_v44  ;;  %v694_v50 = vld [vmem:[#allocation2 + $0x68] sm:$0x1] }
  0x44   : > { %v594_v46 = vsel %vm4577_vm8, %v586_v38, %v593_v40  ;;  %v688_v47 = vsel %vm4481_vm2, %v595_v41, %v687_v39  ;;  %700 = sbr.rel (%p3683_p10) target bundleno = 79 (0x4f), region = 44  ;;  %v701_v58 = vld [vmem:[%s4588_s30] sm:$0xf] (!%p3683_p10)  ;;  %v702_v59 = vld [vmem:[%s4588_s30 + $0x4] sm:$0xf] (!%p3683_p10) }
  0x45   : > { %v602_v48 = vor.u32 %v600_v32, %v599_v42  ;;  %v603_v49 = vrot.slane %v599_v42, 4  ;;  %686 = vst.msk [vmem:[#allocation2 + $0x58] sm:$0xf] %vm638_vm6, %v594_v46  ;;  %689 = vst [vmem:[#allocation2 + $0x5c] sm:$0x1] %v688_v47  ;;  %v610_v51 = vor.u32 %v608_v34, %v607_v43  ;;  %v612_v52 = vrot.slane %v607_v43, 4 }
  0x46   : > { %v704_v60 = vshrl.u32 (!%p3683_p10), %v701_v58, 16  ;;  %v707_v61 = vshll.u32 (!%p3683_p10), %v701_v58, 16  ;;  %v712_v62 = vshrl.u32 (!%p3683_p10), %v702_v59, 16  ;;  %v715_v63 = vshll.u32 (!%p3683_p10), %v702_v59, 16  ;;  %v723_v3 = vld [vmem:[#allocation2] sm:$0xf] (!%p3683_p10) }
  0x47   : > { %v691_v54 = vsel %vm4570_vm7, %v602_v48, %v690_v45  ;;  %v611_v55 = vsel %vm4577_vm8, %v603_v49, %v610_v51  ;;  %v695_v56 = vsel %vm4481_vm2, %v612_v52, %v694_v50  ;;  %v727_v4 = vld [vmem:[#allocation2 + $0x8] sm:$0x1] (!%p3683_p10) }
  0x48   : > { %692 = vst [vmem:[#allocation2 + $0x60] sm:$0xf] %v691_v54  ;;  %693 = vst.msk [vmem:[#allocation2 + $0x64] sm:$0xf] %vm638_vm6, %v611_v55  ;;  %v706_v0 = vrot.slane (!%p3683_p10), %v704_v60, 7  ;;  %v714_v2 = vrot.slane (!%p3683_p10), %v712_v62, 7 }
  0x49   : > { %696 = vst [vmem:[#allocation2 + $0x68] sm:$0x1] %v695_v56 }
  0x4a   : > { %v709_v5 = vor.u32 (!%p3683_p10), %v707_v61, %v706_v0  ;;  %v710_v6 = vrot.slane (!%p3683_p10), %v706_v0, 4  ;;  %v717_v7 = vor.u32 (!%p3683_p10), %v715_v63, %v714_v2  ;;  %v719_v8 = vrot.slane (!%p3683_p10), %v714_v2, 4 }
  0x4c   : > { %v724_v9 = vsel %vm4570_vm7, %v709_v5, %v723_v3  ;;  %v718_v10 = vsel %vm4577_vm8, %v710_v6, %v717_v7  ;;  %v728_v11 = vsel %vm4481_vm2, %v719_v8, %v727_v4 }
  0x4d   : > { %725 = vst [vmem:[#allocation2] sm:$0xf] %v724_v9  ;;  %726 = vst.msk [vmem:[#allocation2 + $0x4] sm:$0xf] %vm638_vm6, %v718_v10 }
  0x4e   : > { %729 = vst [vmem:[#allocation2 + $0x8] sm:$0x1] %v728_v11 }
  0x4f PF: > { %p3684_p11 = scmp.ne.s32.totalorder %s4390_s18, 0 }
  0x50   : > { %v4408_v15 = vmov (!%p3684_p11), 0  }
  0x51   : > { %733 = sbr.rel (%p3684_p11) target bundleno = 88 (0x58), region = 48  ;;  %737 = vst.msk [vmem:[#allocation2 + $0x4] sm:$0xf] (!%p3684_p11), %vm638_vm6, %v4408_v15 }
  0x54   : > { %v734_v12 = vld [vmem:[#allocation2] sm:$0xf] (!%p3684_p11) }
  0x55   : > { %v738_v13 = vld [vmem:[#allocation2 + $0x8] sm:$0x1] (!%p3684_p11)  ;;  %v735_v14 = vsel (!%p3684_p11), %vm4570_vm7, 0, %v734_v12 }
  0x56   : > { %v739_v16 = vsel (!%p3684_p11), %vm4481_vm2, 0, %v738_v13  ;;  %736 = vst [vmem:[#allocation2] sm:$0xf] (!%p3684_p11), %v735_v14 }
  0x57   : > { %740 = vst [vmem:[#allocation2 + $0x8] sm:$0x1] (!%p3684_p11), %v739_v16 }
  0x58 PF: > { %p3685_p12 = scmp.ge.s32.totalorder %s4390_s18, 1 }
  0x59   : > { %v745_v17 = vld [vmem:[%s4600_s8] sm:$0xf] (!%p3685_p12)  ;;  %v746_v18 = vld [vmem:[%s4600_s8 + $0x4] sm:$0xf] (!%p3685_p12)  ;;  %v768_v25 = vld [vmem:[#allocation2 + $0x6c] sm:$0xf] (!%p3685_p12) }
  0x5a   : > { %744 = sbr.rel (%p3685_p12) target bundleno = 99 (0x63), region = 52  ;;  %v748_v19 = vshrl.u32 (!%p3685_p12), %v745_v17, 16  ;;  %v751_v20 = vshll.u32 (!%p3685_p12), %v745_v17, 16  ;;  %v756_v21 = vshrl.u32 (!%p3685_p12), %v746_v18, 16  ;;  %v759_v22 = vshll.u32 (!%p3685_p12), %v746_v18, 16 }
  0x5b   : > { %v772_v26 = vld [vmem:[#allocation2 + $0x74] sm:$0x1] (!%p3685_p12) }
  0x5c   : > { %v750_v23 = vrot.slane (!%p3685_p12), %v748_v19, 7  ;;  %v758_v24 = vrot.slane (!%p3685_p12), %v756_v21, 7 }
  0x5e   : > { %v753_v27 = vor.u32 (!%p3685_p12), %v751_v20, %v750_v23  ;;  %v754_v28 = vrot.slane (!%p3685_p12), %v750_v23, 4  ;;  %v761_v29 = vor.u32 (!%p3685_p12), %v759_v22, %v758_v24  ;;  %v763_v30 = vrot.slane (!%p3685_p12), %v758_v24, 4 }
  0x60   : > { %v769_v31 = vsel (!%p3685_p12), %vm4570_vm7, %v753_v27, %v768_v25  ;;  %v762_v32 = vsel (!%p3685_p12), %vm4577_vm8, %v754_v28, %v761_v29  ;;  %v773_v33 = vsel (!%p3685_p12), %vm4481_vm2, %v763_v30, %v772_v26 }
  0x61   : > { %770 = vst [vmem:[#allocation2 + $0x6c] sm:$0xf] %v769_v31  ;;  %771 = vst.msk [vmem:[#allocation2 + $0x70] sm:$0xf] %vm638_vm6, %v762_v32 }
  0x62   : > { %774 = vst [vmem:[#allocation2 + $0x74] sm:$0x1] %v773_v33 }
  0x63 PF: > { %p3686_p13 = scmp.ne.s32.totalorder %s4390_s18, 1 }
  0x64   : > { %v4409_v37 = vmov (!%p3686_p13), 0  }
  0x65   : > { %778 = sbr.rel (%p3686_p13) target bundleno = 109 (0x6d), region = 56  ;;  %783 = vst.msk [vmem:[#allocation2 + $0x70] sm:$0xf] (!%p3686_p13), %vm638_vm6, %v4409_v37 }
  0x69   : > { %v784_v35 = vld [vmem:[#allocation2 + $0x74] sm:$0x1] (!%p3686_p13) }
  0x6a   : > { %v780_v34 = vld [vmem:[#allocation2 + $0x6c] sm:$0xf] (!%p3686_p13)  ;;  %v785_v57 = vsel (!%p3686_p13), %vm4481_vm2, 0, %v784_v35 }
  0x6b   : > { %v781_v36 = vsel (!%p3686_p13), %vm4570_vm7, 0, %v780_v34  ;;  %786 = vst [vmem:[#allocation2 + $0x74] sm:$0x1] (!%p3686_p13), %v785_v57 }
  0x6c   : > { %782 = vst [vmem:[#allocation2 + $0x6c] sm:$0xf] %v781_v36 }
  0x6d PF: > { %vm1058_vm9 = vcmask 1041408   ;;  %v3762_v38 = vld [vmem:[%s5639_s3 + $0x8] sm:$0x3]  ;;  %v3687_v39 = vld [vmem:[%s5639_s3 + $0x2] sm:$0x3]  ;;  %vm1033_vm13 = vcmask 31744  }
  0x6e   : > { %4261 = vmatprep.subr.msk.bf16.mxu0 %vm1058_vm9, %v3762_v38  ;;  %4257 = vmatprep.subr.msk.bf16.mxu1 %vm1058_vm9, %v3687_v39  ;;  %v4710_v53 = vsel %vm1058_vm9, %v3762_v38, 0  ;;  %v1060_v1 = vsel %vm1058_vm9, %v3687_v39, 0  ;;  %v4713_v40 = vld [vmem:[#allocation2] sm:$0xf]  ;;  %v4715_v41 = vld [vmem:[#allocation2 + $0x4] sm:$0xf] }
  0x6f   : > { %4038 = vmatpush3.bf16.msra.mxu0 %v4710_v53  ;;  %3966 = vmatpush3.bf16.msra.mxu1 %v1060_v1  ;;  %v4718_v42 = vld [vmem:[#allocation2 + $0x8] sm:$0x1]  ;;  %vm812_vm10 = vsmask.f32 3328  ;;  %vm813_vm11 = vsmask.f32 7440 }
  0x70   : > { %v816_v43 = vshrl.u32 %v4713_v40, 16  ;;  %v819_v44 = vshll.u32 %v4713_v40, 16  ;;  %v825_v45 = vshll.u32 %v4715_v41, 16  ;;  %v829_v46 = vshrl.u32 %v4715_v41, 16  ;;  %v1770_v47 = vld [vmem:[#allocation2 + $0xc] sm:$0xf]  ;;  %vm4745_vm12 = vmor %vm812_vm10, %vm813_vm11 }
  0x71   : > { %v835_v48 = vshll.u32 %v4718_v42, 16  ;;  %v4725_v49 = vld [vmem:[#allocation2 + $0x10] sm:$0xf]  ;;  %v4727_v50 = vld [vmem:[#allocation2 + $0x14] sm:$0x1]  ;;  %v1795_v59 = vshrl.u32 %v1770_v47, 16 }
  0x72   : > { %v818_v51 = vrot.slane %v816_v43, 4  ;;  %v821_v52 = vrot.slane %v819_v44, 5  ;;  %v827_v54 = vrot.slane %v825_v45, 5  ;;  %v831_v55 = vrot.slane %v829_v46, 4  ;;  %v4732_v56 = vld [vmem:[%s5639_s3 + $0xa] sm:$0x3] }
  0x73   : > { %v837_v58 = vrot.slane %v835_v48, 5  ;;  %v1798_v60 = vshll.u32 %v1770_v47, 16  ;;  %v1804_v61 = vshll.u32 %v4725_v49, 16  ;;  %4263 = vmatprep.subr.msk.bf16.mxu0 %vm1058_vm9, %v4732_v56  ;;  %v1808_v0 = vshrl.u32 %v4725_v49, 16  ;;  %v4739_v3 = vld [vmem:[#allocation2 + $0xc] sm:$0xf] }
  0x74   : > { %v822_v62 = vor.u32 %v821_v52, %v818_v51  ;;  %v832_v63 = vor.u32 %v831_v55, %v827_v54  ;;  %v1814_v2 = vshll.u32 %v4727_v50, 16  ;;  %v4741_v4 = vld [vmem:[#allocation2 + $0x10] sm:$0xf]  ;;  %v1797_v6 = vrot.slane %v1795_v59, 4  ;;  %v803_v9 = vld [vmem:[%s5639_s3] sm:$0x3] }
  0x75   : > { %v1800_v7 = vrot.slane %v1798_v60, 5  ;;  %v1806_v8 = vrot.slane %v1804_v61, 5  ;;  %v1810_v12 = vrot.slane %v1808_v0, 4  ;;  %4258 = vmatprep.subr.msk.bf16.mxu1 %vm1058_vm9, %v803_v9  ;;  %v4753_v15 = vld [vmem:[#allocation2 + $0x14] sm:$0x1]  ;;  %v840_v16 = vshrl.u32 %v4739_v3, 16 }
  0x76   : > { %v823_v10 = vrot.slane %v822_v62, 4  ;;  %v833_v11 = vrot.slane %v832_v63, 4  ;;  %v1816_v14 = vrot.slane %v1814_v2, 5  ;;  %v843_v17 = vshll.u32 %v4739_v3, 16  ;;  %v1773_v26 = vld [vmem:[#allocation2 + $0x18] sm:$0xf] }
  0x77   : > { %v1801_v13 = vor.u32 %v1800_v7, %v1797_v6  ;;  %v1811_v20 = vor.u32 %v1810_v12, %v1806_v8  ;;  %v849_v21 = vshll.u32 %v4741_v4, 16  ;;  %v842_v24 = vrot.slane %v840_v16, 4  ;;  %v4764_v31 = vld [vmem:[#allocation2 + $0x1c] sm:$0xf]  ;;  %v4771_v36 = vld [vmem:[#allocation2 + $0x20] sm:$0x1] }
  0x78   : > { %v828_v18 = vsel %vm4745_vm12, %v823_v10, %v827_v54  ;;  %v838_v19 = vsel %vm4745_vm12, %v833_v11, %v837_v58  ;;  %v845_v25 = vrot.slane %v843_v17, 5  ;;  %v853_v29 = vshrl.u32 %v4741_v4, 16  ;;  %v4782_v59 = vld [vmem:[#allocation2 + $0x18] sm:$0xf]  ;;  %v4785_v0 = vld [vmem:[#allocation2 + $0x1c] sm:$0xf] }
  0x79   : > { %v3688_v22 = vcombine.low %v828_v18, %v838_v19  ;;  %v1802_v23 = vrot.slane %v1801_v13, 4  ;;  %v1812_v27 = vrot.slane %v1811_v20, 4  ;;  %v851_v28 = vrot.slane %v849_v21, 5  ;;  %v4794_v10 = vld [vmem:[#allocation2 + $0x20] sm:$0x1]  ;;  %s4410_s15 = smov 112  }
  0x7a   : > { %v859_v30 = vshll.u32 %v4753_v15, 16  ;;  %v2186_v33 = vrot.slane %v4725_v49, 5  ;;  %v2189_v34 = vrot.slane %v4727_v50, 5  ;;  %v846_v35 = vor.u32 %v845_v25, %v842_v24  ;;  %v1776_v16 = vld [vmem:[#allocation2 + $0x24] sm:$0xf]  ;;  %s4411_s16 = smov 120  }
  0x7b   : > { %3967 = vmatprep.mubr.msk.bf16.mxu1 %vm1033_vm13, %v3688_v22  ;;  %v1807_v32 = vsel %vm4745_vm12, %v1802_v23, %v1806_v8  ;;  %v1817_v37 = vsel %vm4745_vm12, %v1812_v27, %v1816_v14  ;;  %v855_v57 = vrot.slane %v853_v29, 4  ;;  %v1819_v39 = vshrl.u32 %v1773_v26, 16  ;;  %v4803_v23 = vld [vmem:[#allocation2 + $0x28] sm:$0xf]  ;;  %v4808_v27 = vld [vmem:[#allocation2 + $0x2c] sm:$0x1] }
  0x7c   : > { %v861_v38 = vrot.slane %v859_v30, 5  ;;  %v3763_v1 = vcombine.low %v1807_v32, %v1817_v37  ;;  %v847_v43 = vrot.slane %v846_v35, 4  ;;  %v1822_v44 = vshll.u32 %v1773_v26, 16  ;;  %v4812_v37 = vld [vmem:[#allocation2 + $0x24] sm:$0xf] }
  0x7d   : > { %v1828_v45 = vshll.u32 %v4764_v31, 16  ;;  %v856_v46 = vor.u32 %v855_v57, %v851_v28  ;;  %v1821_v47 = vrot.slane %v1819_v39, 4  ;;  %v1832_v48 = vshrl.u32 %v4764_v31, 16  ;;  %v5443_v5 = vld [vmem:[%s5640_s4] ss:$0 sm:$0xff] }
  0x7e   : > { %v1838_v51 = vshll.u32 %v4771_v36, 16  ;;  %4039 = vmatprep.mubr.msk.bf16.mxu0 %vm1033_vm13, %v3763_v1  ;;  %v852_v52 = vsel %vm4745_vm12, %v847_v43, %v851_v28  ;;  %v1824_v54 = vrot.slane %v1822_v44, 5  ;;  %v2193_v58 = vrot.slane %v4764_v31, 5  ;;  %v4815_v43 = vld [vmem:[#allocation2 + $0x28] sm:$0xf] }
  0x7f   : > { %v1830_v55 = vrot.slane %v1828_v45, 5  ;;  %v857_v60 = vrot.slane %v856_v46, 4  ;;  %v1834_v61 = vrot.slane %v1832_v48, 4  ;;  %v2196_v63 = vrot.slane %v4771_v36, 5  ;;  %v4822_v48 = vld [vmem:[%s5639_s3 + $0xc] sm:$0x3] }
  0x80   : > { %v1840_v62 = vrot.slane %v1838_v51, 5  ;;  %v1825_v2 = vor.u32 %v1824_v54, %v1821_v47  ;;  %v4789_v6 = vrot.slane %v2193_v58, 4  ;;  %v2291_v7 = vsel %vm1058_vm9, %v4732_v56, 0  ;;  %v4934_v31 = vld [vmem:[#allocation2 + $0x58] sm:$0xf] }
  0x81   : > { %v1224_v8 = vsel %vm1058_vm9, %v803_v9, 0  ;;  %v862_v11 = vsel %vm4745_vm12, %v857_v60, %v861_v38  ;;  %v1835_v12 = vor.u32 %v1834_v61, %v1830_v55  ;;  %v864_v13 = vshrl.u32 %v4782_v59, 16 }
  0x82   : > { %v867_v14 = vshll.u32 %v4782_v59, 16  ;;  %v3689_v17 = vcombine.low %v852_v52, %v862_v11  ;;  %v1826_v18 = vrot.slane %v1825_v2, 4  ;;  %v873_v19 = vshll.u32 %v4785_v0, 16  ;;  %v1779_v11 = vld [vmem:[#allocation2 + $0x30] sm:$0xf] }
  0x83   : > { %v877_v20 = vshrl.u32 %v4785_v0, 16  ;;  %v1836_v56 = vrot.slane %v1835_v12, 4  ;;  %v866_v21 = vrot.slane %v864_v13, 4  ;;  %v883_v22 = vshll.u32 %v4794_v10, 16 }
  0x84   : > { %v869_v9 = vrot.slane %v867_v14, 5  ;;  %3968 = vmatmul.mubr.msk.bf16.vlgmr.msra.gmra.mrb[0].mxu1 %vm1033_vm13, %v3689_v17  ;;  %v1831_v24 = vsel %vm4745_vm12, %v1826_v18, %v1830_v55  ;;  %v875_v25 = vrot.slane %v873_v19, 5  ;;  %v1843_v28 = vshrl.u32 %v1776_v16, 16 }
  0x85   : > { %v879_v26 = vrot.slane %v877_v20, 4  ;;  %v1841_v29 = vsel %vm4745_vm12, %v1836_v56, %v1840_v62  ;;  %3984 = vmatpush3.bf16.msra.mxu1 %v1224_v8  ;;  %v885_v32 = vrot.slane %v883_v22, 5  ;;  %v1846_v35 = vshll.u32 %v1776_v16, 16  ;;  %v4829_v8 = vld [vmem:[#allocation2 + $0x2c] sm:$0x1] }
  0x86   : > { %v870_v30 = vor.u32 %v869_v9, %v866_v21  ;;  %v3764_v57 = vcombine.low %v1831_v24, %v1841_v29  ;;  %v1845_v39 = vrot.slane %v1843_v28, 4  ;;  %v1852_v1 = vshll.u32 %v4803_v23, 16  ;;  %v4837_v20 = vld [vmem:[#allocation2 + $0x34] sm:$0xf]  ;;  %v4843_v28 = vld [vmem:[#allocation2 + $0x38] sm:$0x1] }
  0x87   : > { %v880_v38 = vor.u32 %v879_v26, %v875_v25  ;;  %v1848_v45 = vrot.slane %v1846_v35, 5  ;;  %v1856_v46 = vshrl.u32 %v4803_v23, 16  ;;  %v1862_v47 = vshll.u32 %v4808_v27, 16 }
  0x88   : > { %v871_v44 = vrot.slane %v870_v30, 4  ;;  %4040 = vmatmul.mubr.msk.bf16.vlgmr.msra.gmra.mrb[0].mxu0 %vm1033_vm13, %v3764_v57  ;;  %v1854_v52 = vrot.slane %v1852_v1, 5  ;;  %v888_v54 = vshrl.u32 %v4812_v37, 16  ;;  %v891_v55 = vshll.u32 %v4812_v37, 16 }
  0x89   : > { %v881_v51 = vrot.slane %v880_v38, 4  ;;  %4056 = vmatpush3.bf16.msra.mxu0 %v2291_v7  ;;  %v1849_v61 = vor.u32 %v1848_v45, %v1845_v39  ;;  %v1858_v62 = vrot.slane %v1856_v46, 4  ;;  %v1864_v2 = vrot.slane %v1862_v47, 5  ;;  %v4846_v38 = vld [vmem:[#allocation2 + $0x30] sm:$0xf] }
  0x8a   : > { %v876_v60 = vsel %vm4745_vm12, %v871_v44, %v875_v25  ;;  %v890_v13 = vrot.slane %v888_v54, 4  ;;  %v893_v14 = vrot.slane %v891_v55, 5  ;;  %v897_v16 = vshll.u32 %v4815_v43, 16  ;;  %4264 = vmatprep.subr.msk.bf16.mxu0 %vm1058_vm9, %v4822_v48  ;;  %v4851_v46 = vld [vmem:[#allocation2 + $0x34] sm:$0xf] }
  0x8b   : > { %v886_v12 = vsel %vm4745_vm12, %v881_v51, %v885_v32  ;;  %v1850_v17 = vrot.slane %v1849_v61, 4  ;;  %v1859_v18 = vor.u32 %v1858_v62, %v1854_v52  ;;  %v901_v19 = vshrl.u32 %v4815_v43, 16  ;;  %v4859_v55 = vld [vmem:[%s5639_s3 + $0x4] sm:$0x3] }
  0x8c   : > { %v3690_v7 = vcombine.low %v876_v60, %v886_v12  ;;  %v894_v56 = vor.u32 %v893_v14, %v890_v13  ;;  %v899_v21 = vrot.slane %v897_v16, 5  ;;  %v907_v9 = vshll.u32 %v4829_v8, 16  ;;  %4259 = vmatprep.subr.msk.bf16.mxu1 %vm1058_vm9, %v4859_v55  ;;  %v4865_v12 = vld [vmem:[#allocation2 + $0x38] sm:$0x1] }
  0x8d   : > { %v1867_v22 = vshrl.u32 %v1779_v11, 16  ;;  %v1855_v24 = vsel %vm4745_vm12, %v1850_v17, %v1854_v52  ;;  %v1860_v25 = vrot.slane %v1859_v18, 4  ;;  %v903_v26 = vrot.slane %v901_v19, 4 }
  0x8e   : > { %3971 = vmatprep.mubr.msk.bf16.mxu1 %vm1033_vm13, %v3690_v7  ;;  %v1870_v29 = vshll.u32 %v1779_v11, 16  ;;  %v895_v30 = vrot.slane %v894_v56, 4  ;;  %v909_v32 = vrot.slane %v907_v9, 5  ;;  %v1876_v57 = vshll.u32 %v4837_v20, 16  ;;  %v2152_v56 = vld [vmem:[#allocation2 + $0xc] sm:$0xe] }
  0x8f   : > { %v1869_v35 = vrot.slane %v1867_v22, 4  ;;  %v1865_v39 = vsel %vm4745_vm12, %v1860_v25, %v1864_v2  ;;  %v904_v1 = vor.u32 %v903_v26, %v899_v21  ;;  %v1880_v45 = vshrl.u32 %v4837_v20, 16  ;;  %v4872_v25 = vld [vmem:[#allocation2 + $0x3c] sm:$0xf] }
  0x90   : > { %v1872_v44 = vrot.slane %v1870_v29, 5  ;;  %v3765_v47 = vcombine.low %v1855_v24, %v1865_v39  ;;  %v900_v51 = vsel %vm4745_vm12, %v895_v30, %v899_v21  ;;  %v1878_v52 = vrot.slane %v1876_v57, 5  ;;  %v4878_v39 = vld [vmem:[#allocation2 + $0x40] sm:$0xf] }
  0x91   : > { %v1886_v54 = vshll.u32 %v4843_v28, 16  ;;  %v905_v60 = vrot.slane %v904_v1, 4  ;;  %v1882_v62 = vrot.slane %v1880_v45, 4  ;;  %v912_v2 = vshrl.u32 %v4846_v38, 16  ;;  %v4880_v1 = vld [vmem:[#allocation2 + $0x44] sm:$0x1] }
  0x92   : > { %v1873_v61 = vor.u32 %v1872_v44, %v1869_v35  ;;  %4043 = vmatprep.mubr.msk.bf16.mxu0 %vm1033_vm13, %v3765_v47  ;;  %v915_v13 = vshll.u32 %v4846_v38, 16  ;;  %v921_v14 = vshll.u32 %v4851_v46, 16  ;;  %v925_v16 = vshrl.u32 %v4851_v46, 16 }
  0x93   : > { %v1888_v11 = vrot.slane %v1886_v54, 5  ;;  %v910_v7 = vsel %vm4745_vm12, %v905_v60, %v909_v32  ;;  %v1883_v18 = vor.u32 %v1882_v62, %v1878_v52  ;;  %v914_v19 = vrot.slane %v912_v2, 4  ;;  %v2153_v54 = vld [vmem:[#allocation2 + $0x18] sm:$0xe] }
  0x94   : > { %v1874_v17 = vrot.slane %v1873_v61, 4  ;;  %v3691_v21 = vcombine.low %v900_v51, %v910_v7  ;;  %v917_v9 = vrot.slane %v915_v13, 5  ;;  %v923_v22 = vrot.slane %v921_v14, 5 }
  0x95   : > { %v927_v24 = vrot.slane %v925_v16, 4  ;;  %v1884_v29 = vrot.slane %v1883_v18, 4  ;;  %v931_v30 = vshll.u32 %v4865_v12, 16  ;;  %vm1347_vm14 = vcmask 1042432  }
  0x96   : > { %v1879_v26 = vsel %vm4745_vm12, %v1874_v17, %v1878_v52  ;;  %3972 = vmatmul.mubr.msk.bf16.gmra.mrb[4].mxu1 %vm1033_vm13, %v3691_v21  ;;  %v918_v32 = vor.u32 %v917_v9, %v914_v19  ;;  %vm1348_vm15 = vcmask 1046532   ;;  %v3779_v57 = vrot.slane %v2152_v56, 9  ;;  %v4903_v17 = vld [vmem:[#allocation2 + $0x4c] sm:$0xf]  ;;  %v4912_v9 = vld [vmem:[#allocation2 + $0x50] sm:$0x1] }
  0x97   : > { %v928_v35 = vor.u32 %v927_v24, %v923_v22  ;;  %v1889_v44 = vsel %vm4745_vm12, %v1884_v29, %v1888_v11  ;;  %v933_v45 = vrot.slane %v931_v30, 5  ;;  %vm4884_vm0 = vmor %vm1347_vm14, %vm1348_vm15  ;;  %v2188_v51 = vrot.slane %v2186_v33, 4  ;;  %v4895_v11 = vld [vmem:[#allocation2 + $0x48] sm:$0xf] }
  0x98   : > { %v936_v52 = vshrl.u32 %v4872_v25, 16  ;;  %v3766_v60 = vcombine.low %v1879_v26, %v1889_v44  ;;  %v919_v61 = vrot.slane %v918_v32, 4  ;;  %v2187_v2 = vsel %vm4884_vm0, %v3779_v57, %v2186_v33 }
  0x99   : > { %v929_v62 = vrot.slane %v928_v35, 4  ;;  %v2190_v13 = vsel %vm4884_vm0, %v2188_v51, %v2189_v34  ;;  %v939_v16 = vshll.u32 %v4872_v25, 16  ;;  %v945_v7 = vshll.u32 %v4878_v39, 16 }
  0x9a   : > { %v938_v14 = vrot.slane %v936_v52, 4  ;;  %4044 = vmatmul.mubr.msk.bf16.gmra.mrb[4].mxu0 %vm1033_vm13, %v3766_v60  ;;  %v924_v49 = vsel %vm4745_vm12, %v919_v61, %v923_v22  ;;  %v3788_v18 = vcombine.low %v2187_v2, %v2190_v13  ;;  %v949_v50 = vshrl.u32 %v4878_v39, 16  ;;  %v4931_v60 = vld [vmem:[#allocation2 + $0x54] sm:$0xf] }
  0x9b   : > { %v934_v33 = vsel %vm4745_vm12, %v929_v62, %v933_v45  ;;  %v941_v34 = vrot.slane %v939_v16, 5  ;;  %v947_v56 = vrot.slane %v945_v7, 5  ;;  %v955_v21 = vshll.u32 %v4880_v1, 16 }
  0x9c   : > { %v3692_v19 = vcombine.low %v924_v49, %v934_v33  ;;  %4057 = vmatprep.mubr.msk.bf16.mxu0 %vm1033_vm13, %v3788_v18  ;;  %v951_v24 = vrot.slane %v949_v50, 4  ;;  %v3780_v26 = vrot.slane %v2153_v54, 9  ;;  %v2197_v22 = vsel %vm4884_vm0, %v4789_v6, %v2196_v63  ;;  %v2154_v6 = vld [vmem:[#allocation2 + $0x24] sm:$0xe]  ;;  %v4942_v49 = vld [vmem:[%s5639_s3 + $0xe] sm:$0x3] }
  0x9d   : > { %v2490_v29 = vsel %vm1058_vm9, %v4822_v48, 0  ;;  %v942_v30 = vor.u32 %v941_v34, %v938_v14  ;;  %v957_v32 = vrot.slane %v955_v21, 5  ;;  %v960_v35 = vshrl.u32 %v4895_v11, 16  ;;  %v4948_v34 = vld [vmem:[#allocation2 + $0x5c] sm:$0x1] }
  0x9e   : > { %3975 = vmatprep.mubr.msk.bf16.mxu1 %vm1033_vm13, %v3692_v19  ;;  %v963_v57 = vshll.u32 %v4895_v11, 16  ;;  %v952_v44 = vor.u32 %v951_v24, %v947_v56  ;;  %v2194_v36 = vsel %vm4884_vm0, %v3780_v26, %v2193_v58  ;;  %v969_v45 = vshll.u32 %v4903_v17, 16  ;;  %v2155_v26 = vld [vmem:[#allocation2 + $0x30] sm:$0xe] }
  0x9f   : > { %v973_v63 = vshrl.u32 %v4903_v17, 16  ;;  %v943_v48 = vrot.slane %v942_v30, 4  ;;  %v3789_v51 = vcombine.low %v2194_v36, %v2197_v22  ;;  %v962_v52 = vrot.slane %v960_v35, 4 }
  0xa0   : > { %v965_v54 = vrot.slane %v963_v57, 5  ;;  %v953_v61 = vrot.slane %v952_v44, 4  ;;  %v971_v62 = vrot.slane %v969_v45, 5  ;;  %v979_v13 = vshll.u32 %v4912_v9, 16  ;;  %v4955_v57 = vld [vmem:[#allocation2 + $0x40] sm:$0xf] }
  0xa1   : > { %v975_v2 = vrot.slane %v973_v63, 4  ;;  %v948_v58 = vsel %vm4745_vm12, %v943_v48, %v947_v56  ;;  %v3781_v16 = vrot.slane %v2154_v6, 9  ;;  %v2200_v7 = vrot.slane %v4803_v23, 5 }
  0xa2   : > { %v966_v14 = vor.u32 %v965_v54, %v962_v52  ;;  %v958_v33 = vsel %vm4745_vm12, %v953_v61, %v957_v32  ;;  %4058 = vmatmul.mubr.msk.bf16.vlgmr.msra.gmra.mrb[0].mxu0 %vm1033_vm13, %v3789_v51  ;;  %v981_v50 = vrot.slane %v979_v13, 5  ;;  %v2203_v19 = vrot.slane %v4808_v27, 5  ;;  %v4968_v51 = vld [vmem:[#allocation2 + $0x44] sm:$0x1]  ;;  %v2156_v52 = vld [vmem:[#allocation2 + $0x3c] sm:$0xe] }
  0xa3   : > { %v976_v18 = vor.u32 %v975_v2, %v971_v62  ;;  %v3693_v56 = vcombine.low %v948_v58, %v958_v33  ;;  %4074 = vmatpush3.bf16.msra.mxu0 %v2490_v29  ;;  %v2201_v23 = vsel %vm4884_vm0, %v3781_v16, %v2200_v7  ;;  %v2202_v24 = vrot.slane %v2200_v7, 4 }
  0xa4   : > { %v967_v21 = vrot.slane %v966_v14, 4  ;;  %v984_v30 = vshrl.u32 %v4931_v60, 16  ;;  %v987_v32 = vshll.u32 %v4931_v60, 16  ;;  %v993_v35 = vshll.u32 %v4934_v31, 16  ;;  %4265 = vmatprep.subr.msk.bf16.mxu0 %vm1058_vm9, %v4942_v49 }
  0xa5   : > { %v977_v22 = vrot.slane %v976_v18, 4  ;;  %3976 = vmatmul.mubr.msk.bf16.gmra.mrb[8].mxu1 %vm1033_vm13, %v3693_v56  ;;  %v2204_v29 = vsel %vm4884_vm0, %v2202_v24, %v2203_v19  ;;  %v997_v44 = vshrl.u32 %v4934_v31, 16  ;;  %v1003_v36 = vshll.u32 %v4948_v34, 16 }
  0xa6   : > { %v972_v27 = vsel %vm4745_vm12, %v967_v21, %v971_v62  ;;  %v3790_v63 = vcombine.low %v2201_v23, %v2204_v29  ;;  %v986_v6 = vrot.slane %v984_v30, 4  ;;  %v989_v48 = vrot.slane %v987_v32, 5  ;;  %v4986_v30 = vld [vmem:[#allocation2 + $0x50] sm:$0x1]  ;;  %v2157_v32 = vld [vmem:[#allocation2 + $0x48] sm:$0xe] }
  0xa7   : > { %v982_v45 = vsel %vm4745_vm12, %v977_v22, %v981_v50  ;;  %v995_v61 = vrot.slane %v993_v35, 5  ;;  %v999_v2 = vrot.slane %v997_v44, 4  ;;  %v1005_v62 = vrot.slane %v1003_v36, 5  ;;  %v4984_v22 = vld [vmem:[#allocation2 + $0x4c] sm:$0xf] }
  0xa8   : > { %v3694_v54 = vcombine.low %v972_v27, %v982_v45  ;;  %4061 = vmatprep.mubr.msk.bf16.mxu0 %vm1033_vm13, %v3790_v63  ;;  %v990_v13 = vor.u32 %v989_v48, %v986_v6  ;;  %v3782_v58 = vrot.slane %v2155_v26, 9  ;;  %v2207_v14 = vrot.slane %v4837_v20, 5  ;;  %v4994_v36 = vld [vmem:[#allocation2 + $0x58] sm:$0xf]  ;;  %v2158_v45 = vld [vmem:[#allocation2 + $0x54] sm:$0xe] }
  0xa9   : > { %v2210_v16 = vrot.slane %v4843_v28, 5  ;;  %v1000_v7 = vor.u32 %v999_v2, %v995_v61  ;;  %v3783_v33 = vrot.slane %v2156_v52, 9  ;;  %v2214_v18 = vrot.slane %v4955_v57, 5  ;;  %v4996_v48 = vld [vmem:[#allocation2 + $0x5c] sm:$0x1] }
  0xaa   : > { %3979 = vmatprep.mubr.msk.bf16.mxu1 %vm1033_vm13, %v3694_v54  ;;  %v2217_v50 = vrot.slane %v4968_v51, 5  ;;  %v991_v19 = vrot.slane %v990_v13, 4  ;;  %v2208_v56 = vsel %vm4884_vm0, %v3782_v58, %v2207_v14  ;;  %v2209_v21 = vrot.slane %v2207_v14, 4  ;;  %5659 = vst [vmem:[#allocation3_spill] sm:$0xff] %v4996_v48  ;;  %v5001_v2 = vld [vmem:[#allocation2 + $0x64] sm:$0xf] }
  0xab   : > { %v1001_v23 = vrot.slane %v1000_v7, 4  ;;  %v2215_v24 = vsel %vm4884_vm0, %v3783_v33, %v2214_v18  ;;  %v2216_v20 = vrot.slane %v2214_v18, 4  ;;  %v3704_v29 = vcombine.low %v4713_v40, %v4715_v41  ;;  %5660 = vst [vmem:[#allocation4_spill] sm:$0xff] %v5001_v2  ;;  %v5006_v13 = vld [vmem:[#allocation2 + $0x68] sm:$0x1] }
  0xac   : > { %v996_v28 = vsel %vm4745_vm12, %v991_v19, %v995_v61  ;;  %v2211_v26 = vsel %vm4884_vm0, %v2209_v21, %v2210_v16  ;;  %v3784_v52 = vrot.slane %v2157_v32, 9  ;;  %v2221_v54 = vrot.slane %v4984_v22, 5  ;;  %5661 = vst [vmem:[#allocation5_spill] sm:$0xff] %v5006_v13  ;;  %v2159_v58 = vld [vmem:[#allocation2 + $0x60] sm:$0xe] }
  0xad   : > { %v1006_v35 = vsel %vm4745_vm12, %v1001_v23, %v1005_v62  ;;  %v3791_v27 = vcombine.low %v2208_v56, %v2211_v26  ;;  %v2218_v44 = vsel %vm4884_vm0, %v2216_v20, %v2217_v50  ;;  %v2224_v61 = vrot.slane %v4986_v30, 5  ;;  %v1324_v23 = vld [vmem:[#allocation2 + $0xc] sm:$0xe] }
  0xae   : > { %v3695_v63 = vcombine.low %v996_v28, %v1006_v35  ;;  %v3792_v6 = vcombine.low %v2215_v24, %v2218_v44  ;;  %v3785_v40 = vrot.slane %v2158_v45, 9  ;;  %v2228_v62 = vrot.slane %v4994_v36, 5  ;;  %v1325_v24 = vld [vmem:[#allocation2 + $0x18] sm:$0xe]  ;;  %v1326_v45 = vld [vmem:[#allocation2 + $0x24] sm:$0xe] }
  0xaf   : > { %4062 = vmatmul.mubr.msk.bf16.gmra.mrb[4].mxu0 %vm1033_vm13, %v3791_v27  ;;  %v2222_v14 = vsel %vm4884_vm0, %v3784_v52, %v2221_v54  ;;  %v2223_v16 = vrot.slane %v2221_v54, 4  ;;  %v2231_v7 = vrot.slane %v4996_v48, 5  ;;  %v1359_v50 = vrot.slane %v4741_v4, 5  ;;  %v1327_v54 = vld [vmem:[#allocation2 + $0x30] sm:$0xe] }
  0xb0   : > { %3980 = vmatmul.mubr.msk.bf16.gmra.mrb[12].mxu1 %vm1033_vm13, %v3695_v63  ;;  %4065 = vmatprep.mubr.msk.bf16.mxu0 %vm1033_vm13, %v3792_v6  ;;  %v2229_v33 = vsel %vm4884_vm0, %v3785_v40, %v2228_v62  ;;  %v2230_v18 = vrot.slane %v2228_v62, 4  ;;  %v3705_v19 = vcombine.low %v4739_v3, %v4741_v4  ;;  %v2235_v21 = vrot.slane %v5001_v2, 5  ;;  %v5032_v6 = vld [vmem:[%s5639_s3 + $0x6] sm:$0x3]  ;;  %v5274_v48 = vld [vmem:[#allocation2 + $0x70] sm:$0xf] }
  0xb1   : > { %3985 = vmatprep.mubr.msk.bf16.mxu1 %vm1033_vm13, %v3704_v29  ;;  %v2225_v56 = vsel %vm4884_vm0, %v2223_v16, %v2224_v61  ;;  %v3786_v26 = vrot.slane %v2159_v58, 9  ;;  %v2238_v32 = vrot.slane %v5006_v13, 5  ;;  %v1362_v35 = vrot.slane %v4753_v15, 5 }
  0xb2   : > { %v3793_v20 = vcombine.low %v2222_v14, %v2225_v56  ;;  %v2232_v28 = vsel %vm4884_vm0, %v2230_v18, %v2231_v7  ;;  %v3706_v27 = vcombine.low %v4782_v59, %v4785_v0  ;;  %v2237_v4 = vrot.slane %v2235_v21, 4 }
  0xb3   : > { %v3794_v3 = vcombine.low %v2229_v33, %v2232_v28  ;;  %v1457_v29 = vsel %vm1058_vm9, %v4859_v55, 0  ;;  %v3721_v44 = vrot.slane %v1324_v23, 9  ;;  %v1361_v63 = vrot.slane %v1359_v50, 4  ;;  %v1328_v28 = vld [vmem:[#allocation2 + $0x3c] sm:$0xe] }
  0xb4   : > { %v3722_v52 = vrot.slane %v1325_v24, 9  ;;  %v2236_v15 = vsel %vm4884_vm0, %v3786_v26, %v2235_v21  ;;  %v2239_v59 = vsel %vm4884_vm0, %v2237_v4, %v2238_v32  ;;  %v1366_v40 = vrot.slane %v4785_v0, 5 }
  0xb5   : > { %v5042_v55 = vsel %vm4884_vm0, %v3721_v44, %v1359_v50  ;;  %v5047_v61 = vsel %vm4884_vm0, %v1361_v63, %v1362_v35  ;;  %v1369_v62 = vrot.slane %v4794_v10, 5  ;;  %v3723_v58 = vrot.slane %v1326_v45, 9  ;;  %v4318_v63 = vld [vmem:[#allocation2 + $0x24] sm:$0xff]  }
  0xb6   : > { %v3707_v14 = vcombine.low %v4812_v37, %v4815_v43  ;;  %v1373_v7 = vrot.slane %v4815_v43, 5  ;;  %v1376_v33 = vrot.slane %v4829_v8, 5  ;;  %v3795_v18 = vcombine.low %v2236_v15, %v2239_v59  ;;  %v1323_v8 = vld [vmem:[#allocation2] sm:$0xe] }
  0xb7   : > { %4066 = vmatmul.mubr.msk.bf16.gmra.mrb[8].mxu0 %vm1033_vm13, %v3793_v20  ;;  %v5061_v0 = vsel %vm4884_vm0, %v3722_v52, %v1366_v40  ;;  %v1368_v10 = vrot.slane %v1366_v40, 4  ;;  %v3724_v50 = vrot.slane %v1327_v54, 9  ;;  %v1380_v21 = vrot.slane %v4851_v46, 5  ;;  %v2605_v52 = vld [vmem:[#allocation2 + $0x18] sm:$0xf] }
  0xb8   : > { %3986 = vmatmul.mubr.msk.bf16.vlgmr.msra.gmra.mrb[0].mxu1 %vm1033_vm13, %v3705_v19  ;;  %4069 = vmatprep.mubr.msk.bf16.mxu0 %vm1033_vm13, %v3794_v3  ;;  %v4316_v19 = vld [vmem:[#allocation2 + $0x18] sm:$0xff]   ;;  %v5065_v37 = vsel %vm4884_vm0, %v3723_v58, %v1373_v7  ;;  %v1375_v56 = vrot.slane %v1373_v7, 4  ;;  %v1383_v23 = vrot.slane %v4865_v12, 5  ;;  %v3708_v43 = vcombine.low %v4846_v38, %v4851_v46 }
  0xb9   : > { %4002 = vmatpush3.bf16.msra.mxu1 %v1457_v29  ;;  %3989 = vmatprep.mubr.msk.bf16.mxu1 %vm1033_vm13, %v3706_v27  ;;  %v1352_v24 = vrot.slane %v4715_v41, 5  ;;  %v5074_v20 = vsel %vm4884_vm0, %v1368_v10, %v1369_v62  ;;  %v5084_v12 = vsel %vm4884_vm0, %v3724_v50, %v1380_v21  ;;  %v1382_v38 = vrot.slane %v1380_v21, 4  ;;  %v5107_v40 = vld [vmem:[#allocation2 + $0x1c] sm:$0xf]  ;;  %v1329_v62 = vld [vmem:[#allocation2 + $0x48] sm:$0xe] }
  0xba   : > { %4260 = vmatprep.subr.msk.bf16.mxu1 %vm1058_vm9, %v5032_v6  ;;  %v5080_v32 = vsel %vm4884_vm0, %v1375_v56, %v1376_v33  ;;  %v3725_v35 = vrot.slane %v1328_v28, 9  ;;  %v3720_v27 = vrot.slane %v1323_v8, 9  ;;  %v1387_v4 = vrot.slane %v4878_v39, 5  ;;  %v5129_v10 = vld [vmem:[%s5639_s3 + $0x10] sm:$0x3] }
  0xbb   : > { %v5093_v46 = vsel %vm4884_vm0, %v1382_v38, %v1383_v23  ;;  %v1390_v29 = vrot.slane %v4880_v1, 5  ;;  %v1355_v44 = vrot.slane %v4718_v42, 5  ;;  %v1354_v45 = vrot.slane %v1352_v24, 4  ;;  %v4320_v1 = vld [vmem:[#allocation2 + $0x30] sm:$0xff]   ;;  %v2608_v21 = vld [vmem:[#allocation2 + $0x24] sm:$0xf] }
  0xbc   : > { %v5103_v15 = vsel %vm4884_vm0, %v3725_v35, %v1387_v4  ;;  %v1389_v59 = vrot.slane %v1387_v4, 4  ;;  %v3709_v54 = vcombine.low %v4872_v25, %v4878_v39  ;;  %v2872_v58 = vsel %vm1058_vm9, %v4942_v49, 0  ;;  %v5136_v23 = vld [vmem:[#allocation2 + $0x28] sm:$0xf]  ;;  %v1330_v35 = vld [vmem:[#allocation2 + $0x54] sm:$0xe] }
  0xbd   : > { %v3710_v42 = vcombine.low %v4895_v11, %v4903_v17  ;;  %v1356_v25 = vsel %vm4884_vm0, %v1354_v45, %v1355_v44  ;;  %v2630_v39 = vshrl.u32 %v2605_v52, 16  ;;  %v2633_v33 = vshll.u32 %v2605_v52, 16  ;;  %v4323_v52 = vld [vmem:[#allocation2 + $0x48] sm:$0xff]  }
  0xbe   : > { %v5117_v7 = vsel %vm4884_vm0, %v1389_v59, %v1390_v29  ;;  %v2639_v11 = vshll.u32 %v5107_v40, 16  ;;  %v2643_v49 = vshrl.u32 %v5107_v40, 16  ;;  %v3726_v50 = vrot.slane %v1329_v62, 9 }
  0xbf   : > { %4070 = vmatmul.mubr.msk.bf16.gmra.mrb[12].mxu0 %vm1033_vm13, %v3795_v18  ;;  %v1397_v56 = vrot.slane %v4912_v9, 5  ;;  %v2632_v38 = vrot.slane %v2630_v39, 4  ;;  %v2611_v9 = vld [vmem:[#allocation2 + $0x30] sm:$0xf]  ;;  %v2635_v4 = vrot.slane %v2633_v33, 5  ;;  %v2654_v59 = vshrl.u32 %v2608_v21, 16 }
  0xc0   : > { %3990 = vmatmul.mubr.msk.bf16.gmra.mrb[4].mxu1 %vm1033_vm13, %v3707_v14  ;;  %4075 = vmatprep.mubr.msk.bf16.mxu0 %vm1033_vm13, %v4316_v19  ;;  %v1353_v14 = vsel %vm4884_vm0, %v3720_v27, %v1352_v24  ;;  %v1394_v19 = vrot.slane %v4903_v17, 5  ;;  %v1924_v24 = vshll.u32 %v4984_v22, 16  ;;  %v3711_v17 = vcombine.low %v4931_v60, %v4934_v31  ;;  %v4322_v27 = vld [vmem:[#allocation2 + $0x3c] sm:$0xff]   ;;  %v2617_v18 = vld [vmem:[#allocation2 + $0x48] sm:$0xf] }
  0xc1   : > { %3993 = vmatprep.mubr.msk.bf16.mxu1 %vm1033_vm13, %v3708_v43  ;;  %v3729_v28 = vcombine.low %v1353_v14, %v1356_v25  ;;  %v5147_v29 = vrot.slane %v2639_v11, 5  ;;  %v2645_v44 = vrot.slane %v2643_v49, 4  ;;  %v5155_v60 = vld [vmem:[#allocation2 + $0x20] sm:$0x1]  ;;  %v2663_v62 = vshll.u32 %v5136_v23, 16 }
  0xc2   : > { %v5140_v43 = vsel %vm4884_vm0, %v3726_v50, %v1394_v19  ;;  %v1396_v8 = vrot.slane %v1394_v19, 4  ;;  %v2681_v14 = vshll.u32 %v2611_v9, 16  ;;  %v3727_v25 = vrot.slane %v1330_v35, 9  ;;  %v5176_v35 = vld [vmem:[#allocation2 + $0x2c] sm:$0x1] }
  0xc3   : > { %v1401_v11 = vrot.slane %v4934_v31, 5  ;;  %v1404_v49 = vrot.slane %v4948_v34, 5  ;;  %v1928_v50 = vshrl.u32 %v4984_v22, 16  ;;  %v2636_v19 = vor.u32 %v2635_v4, %v2632_v38  ;;  %v4324_v22 = vld [vmem:[#allocation2 + $0x54] sm:$0xff]  }
  0xc4   : > { %v5151_v45 = vsel %vm4884_vm0, %v1396_v8, %v1397_v56  ;;  %v2646_v56 = vor.u32 %v2645_v44, %v5147_v29  ;;  %v2656_v8 = vrot.slane %v2654_v59, 4  ;;  %v5178_v38 = vrot.slane %v2663_v62, 5  ;;  %v5182_v59 = vld [vmem:[#allocation2 + $0x38] sm:$0x1] }
  0xc5   : > { %v5173_v31 = vsel %vm4884_vm0, %v3727_v25, %v1401_v11  ;;  %v1403_v34 = vrot.slane %v1401_v11, 4  ;;  %v2683_v44 = vrot.slane %v2681_v14, 5  ;;  %vm3408_vm1 = vcmask 64512  }
  0xc6   : > { %v2647_v14 = vrot.slane %v2646_v56, 4 }
  0xc7   : > { %4076 = vmatmul.mubr.msk.bf16.vlgmr.msra.gmra.mrb[0].mxu0 %vm1033_vm13, %v4318_v63  ;;  %v5153_v63 = vld [vmem:[#allocation2 + $0x34] sm:$0xf]  ;;  %v5188_v11 = vsel %vm4884_vm0, %v1403_v34, %v1404_v49  ;;  %v5201_v34 = vld [vmem:[#allocation2 + $0x4c] sm:$0xf] }
  0xc8   : > { %3994 = vmatmul.mubr.msk.bf16.gmra.mrb[8].mxu1 %vm1033_vm13, %v3709_v54  ;;  %4092 = vmatpush3.bf16.msra.mxu0 %v2872_v58  ;;  %v2657_v54 = vshll.u32 %v2608_v21, 16  ;;  %v2687_v39 = vshll.u32 %v5153_v63, 16  ;;  %v2691_v33 = vshrl.u32 %v5153_v63, 16  ;;  %v2649_v21 = vshll.u32 %v5155_v60, 16 }
  0xc9   : > { %3997 = vmatprep.mubr.msk.bf16.mxu1 %vm1033_vm13, %v3710_v42  ;;  %4079 = vmatprep.mubr.msk.bf16.mxu0 %vm1033_vm13, %v4320_v1  ;;  %v2667_v42 = vshrl.u32 %v5136_v23, 16  ;;  %v2678_v1 = vshrl.u32 %v2611_v9, 16  ;;  %v2637_v58 = vrot.slane %v2636_v19, 4  ;;  %v2697_v19 = vshll.u32 %v5182_v59, 16 }
  0xca   : > { %4266 = vmatprep.subr.msk.bf16.mxu0 %vm1058_vm9, %v5129_v10  ;;  %v2659_v9 = vrot.slane %v2657_v54, 5  ;;  %v5184_v54 = vrot.slane %v2687_v39, 5  ;;  %v2693_v25 = vrot.slane %v2691_v33, 4  ;;  %v2651_v39 = vrot.slane %v2649_v21, 5 }
  0xcb   : > { %v2680_v4 = vrot.slane %v2678_v1, 4  ;;  %v5194_v1 = vld [vmem:[#allocation2 + $0x40] sm:$0xf]  ;;  %v2673_v33 = vshll.u32 %v5176_v35, 16  ;;  %v2726_v21 = vshrl.u32 %v2617_v18, 16 }
  0xcc   : > { %v2660_v3 = vor.u32 %v2659_v9, %v2656_v8  ;;  %v2694_v62 = vor.u32 %v2693_v25, %v5184_v54  ;;  %v2711_v16 = vshll.u32 %v5194_v1, 16  ;;  %v2715_v56 = vshrl.u32 %v5194_v1, 16 }
  0xcd   : > { %v2729_v8 = vshll.u32 %v2617_v18, 16  ;;  %v5662_v9 = vcombine.low %v5042_v55, %v5047_v61  ;;  %v5663_v18 = vcombine.low %v5061_v0, %v5074_v20  ;;  %v4326_v55 = vld [vmem:[#allocation2 + $0x6c] sm:$0xff]   ;;  %v5231_v0 = vld [vmem:[#allocation2 + $0x44] sm:$0x1] }
  0xce   : > { %v2661_v61 = vrot.slane %v2660_v3, 4  ;;  %v2717_v20 = vrot.slane %v2715_v56, 4  ;;  %v2728_v3 = vrot.slane %v2726_v21, 4  ;;  %v2623_v21 = vld [vmem:[#allocation2 + $0x60] sm:$0xf] }
  0xcf   : > { %4080 = vmatmul.mubr.msk.bf16.gmra.mrb[4].mxu0 %vm1033_vm13, %v4322_v27  ;;  %v2669_v27 = vrot.slane %v2667_v42, 4  ;;  %v2614_v42 = vld [vmem:[#allocation2 + $0x3c] sm:$0xf] }
  0xd0   : > { %3998 = vmatmul.mubr.msk.bf16.gmra.mrb[12].mxu1 %vm1033_vm13, %v3711_v17  ;;  %4083 = vmatprep.mubr.msk.bf16.mxu0 %vm1033_vm13, %v4323_v52  ;;  %v5180_v17 = vrot.slane %v1924_v24, 5  ;;  %v4325_v52 = vld [vmem:[#allocation2 + $0x60] sm:$0xff]   ;;  %v1655_v24 = vsel %vm1058_vm9, %v5032_v6, 0  ;;  %v2702_v41 = vshrl.u32 %v2614_v42, 16  ;;  %v2705_v26 = vshll.u32 %v2614_v42, 16 }
  0xd1   : > { %4003 = vmatprep.mubr.msk.bf16.mxu1 %vm1033_vm13, %v3729_v28  ;;  %v5190_v28 = vrot.slane %v1928_v50, 4  ;;  %v2670_v49 = vor.u32 %v2669_v27, %v5178_v38  ;;  %v2684_v50 = vor.u32 %v2683_v44, %v2680_v4  ;;  %v2642_v6 = vsel %vm4745_vm12, %v2637_v58, %v5147_v29  ;;  %v2620_v29 = vld [vmem:[#allocation2 + $0x54] sm:$0xf] }
  0xd2   : > { %v2652_v27 = vsel %vm4745_vm12, %v2647_v14, %v2651_v39  ;;  %v2675_v4 = vrot.slane %v2673_v33, 5  ;;  %v2739_v44 = vshrl.u32 %v5201_v34, 16  ;;  %v2695_v42 = vrot.slane %v2694_v62, 4  ;;  %v4367_v33 = vld [vmem:[%s5639_s3 + $0x8] sm:$0x3] }
  0xd3   : > { %v2671_v58 = vrot.slane %v2670_v49, 4  ;;  %v2685_v25 = vrot.slane %v2684_v50, 4  ;;  %v2707_v14 = vrot.slane %v2705_v26, 5  ;;  %v5223_v39 = vrot.slane %v2711_v16, 5  ;;  %v5233_v62 = vld [vmem:[#allocation2 + $0x50] sm:$0x1] }
  0xd4   : > { %v2731_v49 = vrot.slane %v2729_v8, 5  ;;  %v2750_v50 = vshrl.u32 %v2620_v29, 16  ;;  %v2741_v16 = vrot.slane %v2739_v44, 4  ;;  %v5250_v44 = vld [vmem:[#allocation2 + $0x64] sm:$0xf] }
  0xd7   : > { %4084 = vmatmul.mubr.msk.bf16.gmra.mrb[8].mxu0 %vm1033_vm13, %v4324_v22  ;;  %v2735_v22 = vshll.u32 %v5201_v34, 16 }
  0xd8   : > { %4004 = vmatmul.mubr.msk.bf16.vlgmr.msra.gmra.mrb[0].mxu1 %vm1033_vm13, %v5662_v9  ;;  %4087 = vmatprep.mubr.msk.bf16.mxu0 %vm1033_vm13, %v4325_v52  ;;  %v2699_v52 = vrot.slane %v2697_v19, 5  ;;  %v2704_v9 = vrot.slane %v2702_v41, 4  ;;  %v3822_v19 = vcombine.low %v2642_v6, %v2652_v27  ;;  %v2753_v41 = vshll.u32 %v2620_v29, 16 }
  0xd9   : > { %4020 = vmatpush3.bf16.msra.mxu1 %v1655_v24  ;;  %4007 = vmatprep.mubr.msk.bf16.mxu1 %vm1033_vm13, %v5663_v18  ;;  %v5229_v24 = vld [vmem:[#allocation2 + $0x58] sm:$0xf]  ;;  %v5235_v26 = vrot.slane %v2735_v22, 5  ;;  %v2666_v18 = vsel %vm4745_vm12, %v2661_v61, %v5178_v38  ;;  %v2690_v6 = vsel %vm4745_vm12, %v2685_v25, %v5184_v54  ;;  %v2721_v22 = vshll.u32 %v5231_v0, 16 }
  0xda   : > { %4262 = vmatprep.subr.msk.bf16.mxu1 %vm1058_vm9, %v4367_v33  ;;  %v2676_v33 = vsel %vm4745_vm12, %v2671_v58, %v2675_v4  ;;  %v2759_v13 = vshll.u32 %v5229_v24, 16  ;;  %v2763_v56 = vshrl.u32 %v5229_v24, 16  ;;  %v2700_v8 = vsel %vm4745_vm12, %v2695_v42, %v2699_v52 }
  0xdb   : > { %v2708_v27 = vor.u32 %v2707_v14, %v2704_v9  ;;  %v2718_v38 = vor.u32 %v2717_v20, %v5223_v39  ;;  %v2732_v4 = vor.u32 %v2731_v49, %v2728_v3  ;;  %v2745_v29 = vshll.u32 %v5233_v62, 16  ;;  %v5265_v9 = vld [vmem:[#allocation2 + $0x5c] sm:$0x1] }
  0xdc   : > { %v2752_v61 = vrot.slane %v2750_v50, 4  ;;  %v5664_v58 = vcombine.low %v5065_v37, %v5080_v32  ;;  %v2742_v54 = vor.u32 %v2741_v16, %v5235_v26  ;;  %v2755_v25 = vrot.slane %v2753_v41, 5 }
  0xdd   : > { %v2774_v52 = vshrl.u32 %v2623_v21, 16  ;;  %v2777_v42 = vshll.u32 %v2623_v21, 16  ;;  %v5267_v14 = vrot.slane %v2759_v13, 5  ;;  %v2765_v20 = vrot.slane %v2763_v56, 4  ;;  %v2626_v21 = vld [vmem:[#allocation2 + $0x6c] sm:$0xf] }
  0xde   : > { %v2783_v37 = vshll.u32 %v5250_v44, 16  ;;  %v2787_v32 = vshrl.u32 %v5250_v44, 16  ;;  %v3823_v3 = vcombine.low %v2666_v18, %v2676_v33  ;;  %v3126_v49 = vsel %vm1058_vm9, %v5129_v10, 0 }
  0xdf   : > { %4088 = vmatmul.mubr.msk.bf16.gmra.mrb[12].mxu0 %vm1033_vm13, %v4326_v55  ;;  %v5665_v55 = vcombine.low %v5084_v12, %v5093_v46  ;;  %v3824_v50 = vcombine.low %v2690_v6, %v2700_v8  ;;  %v2709_v16 = vrot.slane %v2708_v27, 4  ;;  %v2719_v41 = vrot.slane %v2718_v38, 4  ;;  %v5282_v27 = vld [vmem:[#allocation2 + $0x68] sm:$0x1] }
  0xe0   : > { %4008 = vmatmul.mubr.msk.bf16.gmra.mrb[4].mxu1 %vm1033_vm13, %v5664_v58  ;;  %4093 = vmatprep.mubr.msk.bf16.mxu0 %vm1033_vm13, %v3822_v19  ;;  %v2723_v19 = vrot.slane %v2721_v22, 5  ;;  %v2733_v12 = vrot.slane %v2732_v4, 4  ;;  %v2747_v46 = vrot.slane %v2745_v29, 5  ;;  %v2743_v58 = vrot.slane %v2742_v54, 4 }
  0xe1   : > { %4011 = vmatprep.mubr.msk.bf16.mxu1 %vm1033_vm13, %v5665_v55  ;;  %v2769_v13 = vshll.u32 %v5265_v9, 16  ;;  %v2776_v55 = vrot.slane %v2774_v52, 4  ;;  %v2779_v56 = vrot.slane %v2777_v42, 5  ;;  %v2756_v2 = vor.u32 %v2755_v25, %v2752_v61 }
  0xe2   : > { %v2766_v18 = vor.u32 %v2765_v20, %v5267_v14  ;;  %v5277_v33 = vrot.slane %v2783_v37, 5  ;;  %v2789_v10 = vrot.slane %v2787_v32, 4  ;;  %v1931_v6 = vor.u32 %v5190_v28, %v5180_v17 }
  0xe3   : > { %v1934_v8 = vshll.u32 %v4986_v30, 16  ;;  %v2798_v22 = vshrl.u32 %v2626_v21, 16  ;;  %v2801_v38 = vshll.u32 %v2626_v21, 16  ;;  %v2714_v4 = vsel %vm4745_vm12, %v2709_v16, %v5223_v39 }
  0xe4   : > { %v2724_v29 = vsel %vm4745_vm12, %v2719_v41, %v2723_v19  ;;  %v2807_v61 = vshll.u32 %v5274_v48, 16  ;;  %v2811_v54 = vshrl.u32 %v5274_v48, 16  ;;  %v5666_v30 = vcombine.low %v5103_v15, %v5117_v7 }
  0xe5   : > { %v2738_v28 = vsel %vm4745_vm12, %v2733_v12, %v5235_v26  ;;  %v2748_v39 = vsel %vm4745_vm12, %v2743_v58, %v2747_v46  ;;  %v2771_v25 = vrot.slane %v2769_v13, 5  ;;  %v2780_v52 = vor.u32 %v2779_v56, %v2776_v55  ;;  %v4327_v46 = vld [vmem:[#allocation2 + $0xc] sm:$0xff]   ;;  %v1785_v56 = vld [vmem:[#allocation2 + $0x48] sm:$0xf] }
  0xe6   : > { %v5667_v42 = vcombine.low %v5140_v43, %v5151_v45  ;;  %v2757_v15 = vrot.slane %v2756_v2, 4  ;;  %v2767_v7 = vrot.slane %v2766_v18, 4  ;;  %v2790_v20 = vor.u32 %v2789_v10, %v5277_v33  ;;  %v2987_v10 = vld [vmem:[#allocation2 + $0x18] sm:$0xe] }
  0xe7   : > { %4094 = vmatmul.mubr.msk.bf16.vlgmr.msra.gmra.mrb[0].mxu0 %vm1033_vm13, %v3823_v3  ;;  %v2793_v37 = vshll.u32 %v5282_v27, 16  ;;  %v2800_v32 = vrot.slane %v2798_v22, 4  ;;  %v2803_v26 = vrot.slane %v2801_v38, 5  ;;  %v3825_v3 = vcombine.low %v2714_v4, %v2724_v29 }
  0xe8   : > { %4012 = vmatmul.mubr.msk.bf16.gmra.mrb[8].mxu1 %vm1033_vm13, %v5666_v30  ;;  %4110 = vmatpush3.bf16.msra.mxu0 %v3126_v49  ;;  %v5308_v49 = vld [vmem:[#allocation2 + $0x74] sm:$0x1]  ;;  %v5310_v19 = vrot.slane %v2807_v61, 5  ;;  %v2813_v16 = vrot.slane %v2811_v54, 4  ;;  %v1932_v41 = vrot.slane %v1931_v6, 4  ;;  %v1936_v43 = vrot.slane %v1934_v8, 5 }
  0xe9   : > { %4015 = vmatprep.mubr.msk.bf16.mxu1 %vm1033_vm13, %v5667_v42  ;;  %4097 = vmatprep.mubr.msk.bf16.mxu0 %vm1033_vm13, %v3824_v50  ;;  %v3826_v45 = vcombine.low %v2738_v28, %v2748_v39  ;;  %v2781_v12 = vrot.slane %v2780_v52, 4  ;;  %v2762_v2 = vsel %vm4745_vm12, %v2757_v15, %v5267_v14  ;;  %v2772_v50 = vsel %vm4745_vm12, %v2767_v7, %v2771_v25  ;;  %v4329_v42 = vld [vmem:[#allocation2 + $0x24] sm:$0xff]   ;;  %v1782_v15 = vld [vmem:[#allocation2 + $0x3c] sm:$0xf] }
  0xea   : > { %v2791_v21 = vrot.slane %v2790_v20, 4  ;;  %v2795_v58 = vrot.slane %v2793_v37, 5  ;;  %v2804_v13 = vor.u32 %v2803_v26, %v2800_v32  ;;  %v2817_v55 = vshll.u32 %v5308_v49, 16  ;;  %v2988_v32 = vld [vmem:[#allocation2 + $0x24] sm:$0xe] }
  0xeb   : > { %v2814_v18 = vor.u32 %v2813_v16, %v5310_v19  ;;  %v3021_v6 = vrot.slane %v5107_v40, 5  ;;  %v5668_v8 = vcombine.low %v5173_v31, %v5188_v11  ;;  %v3827_v14 = vcombine.low %v2762_v2, %v2772_v50  ;;  %v2989_v16 = vld [vmem:[#allocation2 + $0x30] sm:$0xe] }
  0xec   : > { %v2786_v22 = vsel %vm4745_vm12, %v2781_v12, %v5277_v33  ;;  %v2796_v38 = vsel %vm4745_vm12, %v2791_v21, %v2795_v58  ;;  %v1915_v4 = vshrl.u32 %v1785_v56, 16  ;;  %v1918_v29 = vshll.u32 %v1785_v56, 16  ;;  %v4328_v33 = vld [vmem:[#allocation2 + $0x18] sm:$0xff]  }
  0xed   : > { %v1937_v40 = vsel %vm4745_vm12, %v1932_v41, %v1936_v43  ;;  %v2805_v31 = vrot.slane %v2804_v13, 4  ;;  %v2819_v11 = vrot.slane %v2817_v55, 5  ;;  %v3838_v61 = vrot.slane %v2987_v10, 9 }
  0xee   : > { %v3024_v54 = vrot.slane %v5155_v60, 5  ;;  %v2815_v30 = vrot.slane %v2814_v18, 4  ;;  %v3023_v28 = vrot.slane %v3021_v6, 4  ;;  %v1917_v39 = vrot.slane %v1915_v4, 4  ;;  %v4330_v18 = vld [vmem:[#allocation2 + $0x30] sm:$0xff]  }
  0xef   : > { %4098 = vmatmul.mubr.msk.bf16.gmra.mrb[4].mxu0 %vm1033_vm13, %v3825_v3  ;;  %v1920_v25 = vrot.slane %v1918_v29, 5  ;;  %v3828_v52 = vcombine.low %v2786_v22, %v2796_v38  ;;  %v2810_v20 = vsel %vm4745_vm12, %v2805_v31, %v5310_v19  ;;  %v3022_v37 = vsel %vm4884_vm0, %v3838_v61, %v3021_v6  ;;  %v2990_v22 = vld [vmem:[#allocation2 + $0x3c] sm:$0xe]  ;;  %v1788_v29 = vld [vmem:[#allocation2 + $0x54] sm:$0xf] }
  0xf0   : > { %4016 = vmatmul.mubr.msk.bf16.gmra.mrb[12].mxu1 %vm1033_vm13, %v5668_v8  ;;  %4101 = vmatprep.mubr.msk.bf16.mxu0 %vm1033_vm13, %v3826_v45  ;;  %v3028_v26 = vrot.slane %v5136_v23, 5  ;;  %v2820_v60 = vsel %vm4745_vm12, %v2815_v30, %v2819_v11  ;;  %v3025_v3 = vsel %vm4884_vm0, %v3023_v28, %v3024_v54  ;;  %v3035_v41 = vrot.slane %v5153_v63, 5  ;;  %v2991_v61 = vld [vmem:[#allocation2 + $0x48] sm:$0xe] }
  0xf1   : > { %4021 = vmatprep.mubr.msk.bf16.mxu1 %vm1033_vm13, %v4327_v46  ;;  %v1921_v7 = vor.u32 %v1920_v25, %v1917_v39  ;;  %v1891_v19 = vshrl.u32 %v1782_v15, 16  ;;  %v1894_v45 = vshll.u32 %v1782_v15, 16  ;;  %v1900_v23 = vshll.u32 %v4955_v57, 16 }
  0xf2   : > { %v1904_v12 = vshrl.u32 %v4955_v57, 16  ;;  %v3839_v46 = vrot.slane %v2988_v32, 9  ;;  %v3030_v2 = vrot.slane %v3028_v26, 4  ;;  %v3031_v50 = vrot.slane %v5176_v35, 5 }
  0xf3   : > { %v1922_v43 = vrot.slane %v1921_v7, 4  ;;  %v3840_v21 = vrot.slane %v2989_v16, 9  ;;  %v3829_v13 = vcombine.low %v2810_v20, %v2820_v60  ;;  %v3847_v55 = vcombine.low %v3022_v37, %v3025_v3  ;;  %v4332_v20 = vld [vmem:[#allocation2 + $0x48] sm:$0xff]   ;;  %v4333_v60 = vld [vmem:[#allocation2 + $0x54] sm:$0xff]  }
  0xf4   : > { %v3037_v56 = vrot.slane %v3035_v41, 4  ;;  %v3038_v57 = vrot.slane %v5182_v59, 5  ;;  %v1896_v10 = vrot.slane %v1894_v45, 5  ;;  %v5360_v6 = vrot.slane %v1900_v23, 5 }
  0xf5   : > { %v1927_v63 = vsel %vm4745_vm12, %v1922_v43, %v5180_v17  ;;  %v1906_v8 = vrot.slane %v1904_v12, 4  ;;  %v3029_v17 = vsel %vm4884_vm0, %v3839_v46, %v3028_v26  ;;  %v3032_v35 = vsel %vm4884_vm0, %v3030_v2, %v3031_v50  ;;  %v1791_v43 = vld [vmem:[#allocation2 + $0x60] sm:$0xf] }
  0xf6   : > { %v5357_v58 = vcombine.low %v1927_v63, %v1937_v40  ;;  %v3036_v38 = vsel %vm4884_vm0, %v3840_v21, %v3035_v41  ;;  %v3042_v59 = vrot.slane %v5194_v1, 5  ;;  %v1910_v4 = vshll.u32 %v4968_v51, 16  ;;  %v2992_v63 = vld [vmem:[#allocation2 + $0x54] sm:$0xe] }
  0xf7   : > { %4102 = vmatmul.mubr.msk.bf16.gmra.mrb[8].mxu0 %vm1033_vm13, %v3827_v14  ;;  %v4331_v14 = vld [vmem:[#allocation2 + $0x3c] sm:$0xff]   ;;  %v3039_v40 = vsel %vm4884_vm0, %v3037_v56, %v3038_v57  ;;  %v1907_v11 = vor.u32 %v1906_v8, %v5360_v6  ;;  %v3049_v54 = vrot.slane %v5201_v34, 5  ;;  %v3848_v30 = vcombine.low %v3029_v17, %v3032_v35 }
  0xf8   : > { %4022 = vmatmul.mubr.msk.bf16.vlgmr.msra.gmra.mrb[0].mxu1 %vm1033_vm13, %v4328_v33  ;;  %4105 = vmatprep.mubr.msk.bf16.mxu0 %vm1033_vm13, %v3828_v52  ;;  %v3841_v1 = vrot.slane %v2990_v22, 9  ;;  %v3045_v51 = vrot.slane %v5231_v0, 5  ;;  %v1939_v28 = vshrl.u32 %v1788_v29, 16  ;;  %v1942_v39 = vshll.u32 %v1788_v29, 16 }
  0xf9   : > { %4128 = vmatpush3.bf16.msra.mxu1 %v4710_v53  ;;  %4025 = vmatprep.mubr.msk.bf16.mxu1 %vm1033_vm13, %v4329_v42  ;;  %v1893_v53 = vrot.slane %v1891_v19, 4  ;;  %v1948_v25 = vshll.u32 %v4994_v36, 16  ;;  %v1952_v33 = vshrl.u32 %v4994_v36, 16  ;;  %v3849_v52 = vcombine.low %v3036_v38, %v3039_v40 }
  0xfa   : > { %v3044_v42 = vrot.slane %v3042_v59, 4  ;;  %v1912_v15 = vrot.slane %v1910_v4, 5  ;;  %v3842_v7 = vrot.slane %v2991_v61, 9  ;;  %v1908_v32 = vrot.slane %v1907_v11, 4 }
  0xfb   : > { %v1897_v31 = vor.u32 %v1896_v10, %v1893_v53  ;;  %v3051_v34 = vrot.slane %v3049_v54, 4  ;;  %v3052_v26 = vrot.slane %v5233_v62, 5  ;;  %v1941_v3 = vrot.slane %v1939_v28, 4  ;;  %v5670_v10 = vld [vmem:[#allocation3_spill] sm:$0xff] }
  0xfc   : > { %v1944_v16 = vrot.slane %v1942_v39, 5  ;;  %v1950_v0 = vrot.slane %v1948_v25, 5  ;;  %v1954_v41 = vrot.slane %v1952_v33, 4  ;;  %v3043_v36 = vsel %vm4884_vm0, %v3841_v1, %v3042_v59  ;;  %v5671_v33 = vld [vmem:[#allocation5_spill] sm:$0xff] }
  0xfd   : > { %v1898_v37 = vrot.slane %v1897_v31, 4  ;;  %v3046_v19 = vsel %vm4884_vm0, %v3044_v42, %v3045_v51  ;;  %v3050_v45 = vsel %vm4884_vm0, %v3842_v7, %v3049_v54  ;;  %v3056_v23 = vrot.slane %v5229_v24, 5  ;;  %v2993_v24 = vld [vmem:[#allocation2 + $0x60] sm:$0xe]  ;;  %v2994_v42 = vld [vmem:[#allocation2 + $0x6c] sm:$0xe] }
  0xfe   : > { %v1913_v12 = vsel %vm4745_vm12, %v1908_v32, %v1912_v15  ;;  %v3053_v46 = vsel %vm4884_vm0, %v3051_v34, %v3052_v26  ;;  %v3063_v2 = vrot.slane %v5250_v44, 5  ;;  %v1963_v50 = vshrl.u32 %v1791_v43, 16  ;;  %v4334_v44 = vld [vmem:[#allocation2 + $0x60] sm:$0xff]  }
  0xff   : > { %4106 = vmatmul.mubr.msk.bf16.gmra.mrb[12].mxu0 %vm1033_vm13, %v3829_v13  ;;  %v1903_v62 = vsel %vm4745_vm12, %v1898_v37, %v5360_v6  ;;  %v1966_v21 = vshll.u32 %v1791_v43, 16  ;;  %v5669_v13 = vld [vmem:[#allocation4_spill] sm:$0xff]  ;;  %v3850_v57 = vcombine.low %v3043_v36, %v3046_v19  ;;  %v1955_v53 = vor.u32 %v1954_v41, %v1950_v0 }
 0x100   : > { %4026 = vmatmul.mubr.msk.bf16.gmra.mrb[4].mxu1 %vm1033_vm13, %v4330_v18  ;;  %4111 = vmatprep.mubr.msk.bf16.mxu0 %vm1033_vm13, %v3847_v55  ;;  %v1972_v55 = vshll.u32 %v5669_v13, 16  ;;  %v1976_v56 = vshrl.u32 %v5669_v13, 16  ;;  %v1945_v18 = vor.u32 %v1944_v16, %v1941_v3  ;;  %v1958_v6 = vshll.u32 %v5670_v10, 16 }
 0x101   : > { %4029 = vmatprep.mubr.msk.bf16.mxu1 %vm1033_vm13, %v4331_v14  ;;  %v3767_v8 = vcombine.low %v1903_v62, %v1913_v12  ;;  %v3851_v14 = vcombine.low %v3050_v45, %v3053_v46  ;;  %v3843_v17 = vrot.slane %v2992_v63, 9  ;;  %v3059_v35 = vrot.slane %v5265_v9, 5 }
 0x102   : > { %v3058_v22 = vrot.slane %v3056_v23, 4  ;;  %v3844_v38 = vrot.slane %v2993_v24, 9  ;;  %v3065_v59 = vrot.slane %v3063_v2, 4  ;;  %v3066_v4 = vrot.slane %v5282_v27, 5 }
 0x103   : > { %v1965_v29 = vrot.slane %v1963_v50, 4  ;;  %v1968_v40 = vrot.slane %v1966_v21, 5  ;;  %v1974_v31 = vrot.slane %v1972_v55, 5  ;;  %v1978_v11 = vrot.slane %v1976_v56, 4 }
 0x104   : > { %v1946_v61 = vrot.slane %v1945_v18, 4  ;;  %v1956_v54 = vrot.slane %v1955_v53, 4  ;;  %v3057_v9 = vsel %vm4884_vm0, %v3843_v17, %v3056_v23  ;;  %v3060_v1 = vsel %vm4884_vm0, %v3058_v22, %v3059_v35 }
 0x105   : > { %v3064_v27 = vsel %vm4884_vm0, %v3844_v38, %v3063_v2  ;;  %v3070_v51 = vrot.slane %v5274_v48, 5  ;;  %v3067_v28 = vsel %vm4884_vm0, %v3065_v59, %v3066_v4  ;;  %v1969_v39 = vor.u32 %v1968_v40, %v1965_v29 }
 0x106   : > { %v1979_v25 = vor.u32 %v1978_v11, %v1974_v31  ;;  %v1951_v15 = vsel %vm4745_vm12, %v1946_v61, %v1950_v0  ;;  %v3853_v37 = vcombine.low %v3064_v27, %v3067_v28  ;;  %v3845_v32 = vrot.slane %v2994_v42, 9 }
 0x107   : > { %4112 = vmatmul.mubr.msk.bf16.vlgmr.msra.gmra.mrb[0].mxu0 %vm1033_vm13, %v3848_v30  ;;  %v1960_v30 = vrot.slane %v1958_v6, 5  ;;  %v3072_v48 = vrot.slane %v3070_v51, 4  ;;  %v3073_v34 = vrot.slane %v5308_v49, 5 }
 0x108   : > { %4030 = vmatmul.mubr.msk.bf16.gmra.mrb[8].mxu1 %vm1033_vm13, %v4332_v20  ;;  %4115 = vmatprep.mubr.msk.bf16.mxu0 %vm1033_vm13, %v3849_v52  ;;  %v1982_v52 = vshll.u32 %v5671_v33, 16  ;;  %v3852_v20 = vcombine.low %v3057_v9, %v3060_v1  ;;  %v1980_v3 = vrot.slane %v1979_v25, 4  ;;  %v3071_v0 = vsel %vm4884_vm0, %v3845_v32, %v3070_v51 }
 0x109   : > { %4033 = vmatprep.mubr.msk.bf16.mxu1 %vm1033_vm13, %v4333_v60  ;;  %v1961_v7 = vsel %vm4745_vm12, %v1956_v54, %v1960_v30  ;;  %v1970_v60 = vrot.slane %v1969_v39, 4  ;;  %v3074_v41 = vsel %vm4884_vm0, %v3072_v48, %v3073_v34 }
 0x10a   : > { %v3769_v26 = vcombine.low %v1951_v15, %v1961_v7  ;;  %v1984_v16 = vrot.slane %v1982_v52, 5  ;;  %v3854_v36 = vcombine.low %v3071_v0, %v3074_v41 }
 0x10b   : > { %v1975_v49 = vsel %vm4745_vm12, %v1970_v60, %v1974_v31 }
 0x10c   : > { %v1985_v43 = vsel %vm4745_vm12, %v1980_v3, %v1984_v16 }
 0x10d   : > { %v3770_v19 = vcombine.low %v1975_v49, %v1985_v43 }
 0x10f   : > { %4116 = vmatmul.mubr.msk.bf16.gmra.mrb[4].mxu0 %vm1033_vm13, %v3850_v57 }
 0x110   : > { %4034 = vmatmul.mubr.msk.bf16.gmra.mrb[12].mxu1 %vm1033_vm13, %v4334_v44  ;;  %4119 = vmatprep.mubr.msk.bf16.mxu0 %vm1033_vm13, %v3851_v14 }
 0x111   : > { %4047 = vmatprep.mubr.msk.bf16.mxu1 %vm1033_vm13, %v3767_v8 }
 0x117   : > { %4120 = vmatmul.mubr.msk.bf16.gmra.mrb[8].mxu0 %vm1033_vm13, %v3852_v20 }
 0x118   : > { %4048 = vmatmul.mubr.msk.bf16.vlgmr.msra.gmra.mrb[8].mxu1 %vm1033_vm13, %v5357_v58  ;;  %4123 = vmatprep.mubr.msk.bf16.mxu0 %vm1033_vm13, %v3853_v37 }
 0x119   : > { %4051 = vmatprep.mubr.msk.bf16.mxu1 %vm1033_vm13, %v3769_v26 }
 0x11f   : > { %4124 = vmatmul.mubr.msk.bf16.gmra.mrb[12].mxu0 %vm1033_vm13, %v3854_v36 }
 0x120   : > { %4052 = vmatmul.mubr.msk.bf16.gmra.mrb[12].mxu1 %vm1033_vm13, %v3770_v19 }
 0x1cb   : > { %v4023_v58 = vpop.f32.mrb[0].mxu1 }
 0x1cc   : > { %v1691_v45 = vpop.f32.mrb[1].mxu1 }
 0x1cd   : > { %v4024_v23 = vpop.f32.mrb[2].mxu1 }
 0x1ce   : > { %v1694_v62 = vpop.f32.mrb[3].mxu1 }
 0x1d3   : > { %v4027_v47 = vpop.f32.mrb[4].mxu1 }
 0x1d4   : > { %v1707_v12 = vpop.f32.mrb[5].mxu1 }
 0x1d5   : > { %v4028_v46 = vpop.f32.mrb[6].mxu1 }
 0x1d6   : > { %v1710_v63 = vpop.f32.mrb[7].mxu1 }
 0x1da   : > { %v4113_v2 = vpop.f32.mrb[0].mxu0 }
 0x1db   : > { %v4129_v24 = vadd.f32 %v4113_v2, %v4023_v58  ;;  %v3162_v50 = vpop.f32.mrb[1].mxu0 }
 0x1dc   : > { %v4130_v21 = vadd.f32 %v3162_v50, %v1691_v45  ;;  %v4114_v13 = vpop.f32.mrb[2].mxu0 }
 0x1dd   : > { %v5446_v55 = vadd.f32 %v4129_v24, %v5443_v5  ;;  %v4131_v56 = vadd.f32 %v4114_v13, %v4024_v23  ;;  %v3165_v57 = vpop.f32.mrb[3].mxu0 }
 0x1de   : > { %v5449_v18 = vadd.f32 %v4130_v21, %v5443_v5  ;;  %v4132_v53 = vadd.f32 %v3165_v57, %v1694_v62 }
 0x1df   : > { %v3266_v10 = vmul.f32 0.5, %v5446_v55  ;;  %v5453_v6 = vadd.f32 %v4131_v56, %v5443_v5 }
 0x1e0   : > { %v3264_v8 = vmul.f32 0.5, %v5449_v18  ;;  %v5457_v14 = vadd.f32 %v4132_v53, %v5443_v5 }
 0x1e1   : > { %v3267_v17 = vmul.f32 0.5, %v5453_v6  ;;  %4335 = vtanh.f32 %v3266_v10 }
 0x1e2   : > { %v3265_v35 = vmul.f32 0.5, %v5457_v14  ;;  %v4117_v44 = vpop.f32.mrb[4].mxu0  ;;  %4337 = vtanh.f32 %v3264_v8 }
 0x1e3   : > { %4339 = vtanh.f32 %v3267_v17  ;;  %v4133_v22 = vadd.f32 %v4117_v44, %v4027_v47  ;;  %v3178_v38 = vpop.f32.mrb[5].mxu0 }
 0x1e4   : > { %4341 = vtanh.f32 %v3265_v35  ;;  %v4134_v59 = vadd.f32 %v3178_v38, %v1707_v12  ;;  %v4118_v4 = vpop.f32.mrb[6].mxu0 }
 0x1e5   : > { %v5462_v29 = vadd.f32 %v4133_v22, %v5443_v5  ;;  %v4135_v40 = vadd.f32 %v4118_v4, %v4028_v46  ;;  %v3181_v31 = vpop.f32.mrb[7].mxu0 }
 0x1e6   : > { %v5465_v11 = vadd.f32 %v4134_v59, %v5443_v5  ;;  %v4136_v61 = vadd.f32 %v3181_v31, %v1710_v63 }
 0x1e7   : > { %v3270_v54 = vmul.f32 0.5, %v5462_v29  ;;  %v5469_v30 = vadd.f32 %v4135_v40, %v5443_v5 }
 0x1e8   : > { %v3268_v9 = vmul.f32 0.5, %v5465_v11  ;;  %v5473_v1 = vadd.f32 %v4136_v61, %v5443_v5 }
 0x1e9   : > { %4343 = vtanh.f32 %v3270_v54  ;;  %v3271_v27 = vmul.f32 0.5, %v5469_v30 }
 0x1ea   : > { %4345 = vtanh.f32 %v3268_v9  ;;  %v3269_v51 = vmul.f32 0.5, %v5473_v1  ;;  %v4121_v28 = vpop.f32.mrb[8].mxu0 }
 0x1eb   : > { %v4336_v39 = vpop.eup %4335  ;;  %4347 = vtanh.f32 %v3271_v27  ;;  %v4049_v25 = vpop.f32.mrb[8].mxu1 }
 0x1ec   : > { %v3194_v33 = vpop.f32.mrb[9].mxu0  ;;  %v4338_v52 = vpop.eup %4337  ;;  %4349 = vtanh.f32 %v3269_v51  ;;  %v4137_v42 = vadd.f32 %v4121_v28, %v4049_v25  ;;  %v3298_v20 = vmul.f32 0.5, %v4336_v39 }
 0x1ed   : > { %v2105_v15 = vpop.f32.mrb[9].mxu1  ;;  %v4122_v7 = vpop.f32.mrb[10].mxu0  ;;  %v3296_v26 = vmul.f32 0.5, %v4338_v52 }
 0x1ee   : > { %v4340_v37 = vpop.eup %4339  ;;  %v4138_v32 = vadd.f32 %v3194_v33, %v2105_v15  ;;  %v4050_v48 = vpop.f32.mrb[10].mxu1  ;;  %v5478_v3 = vadd.f32 %v4137_v42, %v5443_v5  ;;  %v3314_v41 = vadd.f32 0.5, %v3298_v20 }
 0x1ef   : > { %v3197_v34 = vpop.f32.mrb[11].mxu0  ;;  %v4342_v60 = vpop.eup %4341  ;;  %v4139_v16 = vadd.f32 %v4122_v7, %v4050_v48  ;;  %v3299_v49 = vmul.f32 0.5, %v4340_v37  ;;  %v3312_v19 = vadd.f32 0.5, %v3296_v26 }
 0x1f0   : > { %v2108_v0 = vpop.f32.mrb[11].mxu1  ;;  %v5481_v43 = vadd.f32 %v4138_v32, %v5443_v5  ;;  %v3297_v58 = vmul.f32 0.5, %v4342_v60  ;;  %v3274_v45 = vmul.f32 0.5, %v5478_v3  ;;  %3348 = vrot.lane.b32.xlu1 %v3314_v41, %s4410_s15 }
 0x1f1   : > { %v4140_v36 = vadd.f32 %v3197_v34, %v2108_v0  ;;  %v5485_v23 = vadd.f32 %v4139_v16, %v5443_v5  ;;  %3344 = vrot.lane.b32.xlu0 %v3312_v19, %s4410_s15  ;;  %v3315_v63 = vadd.f32 0.5, %v3299_v49 }
 0x1f2   : > { %v3272_v62 = vmul.f32 0.5, %v5481_v43  ;;  %4351 = vtanh.f32 %v3274_v45  ;;  %v4125_v46 = vpop.f32.mrb[12].mxu0  ;;  %v3313_v13 = vadd.f32 0.5, %v3297_v58 }
 0x1f3   : > { %v5490_v47 = vadd.f32 %v4140_v36, %v5443_v5  ;;  %v3275_v12 = vmul.f32 0.5, %v5485_v23  ;;  %v4344_v2 = vpop.eup %4343  ;;  %v4053_v50 = vpop.f32.mrb[12].mxu1 }
 0x1f4   : > { %4353 = vtanh.f32 %v3272_v62  ;;  %v3210_v21 = vpop.f32.mrb[13].mxu0  ;;  %v4346_v56 = vpop.eup %4345  ;;  %v4141_v57 = vadd.f32 %v4125_v46, %v4053_v50  ;;  %3350 = vrot.lane.b32.xlu1 %v3315_v63, %s4410_s15  ;;  %v3302_v8 = vmul.f32 0.5, %v4344_v2 }
 0x1f5   : > { %v3273_v24 = vmul.f32 0.5, %v5490_v47  ;;  %4355 = vtanh.f32 %v3275_v12  ;;  %v2121_v53 = vpop.f32.mrb[13].mxu1  ;;  %v4126_v10 = vpop.f32.mrb[14].mxu0  ;;  %3346 = vrot.lane.b32.xlu0 %v3313_v13, %s4410_s15  ;;  %v3300_v27 = vmul.f32 0.5, %v4346_v56 }
 0x1f6   : > { %v4348_v17 = vpop.eup %4347  ;;  %v4142_v35 = vadd.f32 %v3210_v21, %v2121_v53  ;;  %v4054_v44 = vpop.f32.mrb[14].mxu1  ;;  %v5498_v59 = vadd.f32 %v4141_v57, %v5443_v5  ;;  %v3318_v31 = vadd.f32 0.5, %v3302_v8 }
 0x1f7   : > { %4357 = vtanh.f32 %v3273_v24  ;;  %v3213_v22 = vpop.f32.mrb[15].mxu0  ;;  %v4350_v38 = vpop.eup %4349  ;;  %v4143_v4 = vadd.f32 %v4126_v10, %v4054_v44  ;;  %v3303_v61 = vmul.f32 0.5, %v4348_v17  ;;  %v3316_v7 = vadd.f32 0.5, %v3300_v27 }
 0x1f8   : > { %v2124_v40 = vpop.f32.mrb[15].mxu1  ;;  %v5501_v54 = vadd.f32 %v4142_v35, %v5443_v5  ;;  %v3278_v51 = vmul.f32 0.5, %v5498_v59  ;;  %v3301_v25 = vmul.f32 0.5, %v4350_v38 }
 0x1f9   : > { %v4144_v9 = vadd.f32 %v3213_v22, %v2124_v40  ;;  %v5505_v28 = vadd.f32 %v4143_v4, %v5443_v5  ;;  %v3319_v39 = vadd.f32 0.5, %v3303_v61  ;;  %3356 = vrot.lane.b32.xlu0 %v3318_v31, %s4410_s15 }
 0x1fa   : > { %v3276_v33 = vmul.f32 0.5, %v5501_v54  ;;  %4359 = vtanh.f32 %v3278_v51  ;;  %v3317_v37 = vadd.f32 0.5, %v3301_v25 }
 0x1fb   : > { %v5509_v52 = vadd.f32 %v4144_v9, %v5443_v5  ;;  %v3279_v42 = vmul.f32 0.5, %v5505_v28  ;;  %3358 = vrot.lane.b32.xlu1 %v3319_v39, %s4410_s15 }
 0x1fc   : > { %4361 = vtanh.f32 %v3276_v33  ;;  %v4352_v20 = vpop.eup %4351 }
 0x1fd   : > { %v3277_v15 = vmul.f32 0.5, %v5509_v52  ;;  %4363 = vtanh.f32 %v3279_v42  ;;  %3352 = vrot.lane.b32.xlu0 %v3316_v7, %s4410_s15  ;;  %v3306_v5 = vmul.f32 0.5, %v4352_v20 }
 0x1fe   : > { %v4354_v32 = vpop.eup %4353 }
 0x1ff   : > { %4365 = vtanh.f32 %v3277_v15  ;;  %v4356_v48 = vpop.eup %4355  ;;  %3354 = vrot.lane.b32.xlu1 %v3317_v37, %s4410_s15  ;;  %v3322_v26 = vadd.f32 0.5, %v3306_v5  ;;  %v3304_v16 = vmul.f32 0.5, %v4354_v32 }
 0x200   : > { %v3307_v60 = vmul.f32 0.5, %v4356_v48 }
 0x201   : > { %v4358_v34 = vpop.eup %4357  ;;  %3364 = vrot.lane.b32.xlu0 %v3322_v26, %s4410_s15  ;;  %v3320_v49 = vadd.f32 0.5, %v3304_v16 }
 0x202   : > { %v3323_v0 = vadd.f32 0.5, %v3307_v60  ;;  %v3305_v41 = vmul.f32 0.5, %v4358_v34 }
 0x204   : > { %3366 = vrot.lane.b32.xlu1 %v3323_v0, %s4410_s15  ;;  %v4360_v36 = vpop.eup %4359  ;;  %v3321_v58 = vadd.f32 0.5, %v3305_v41 }
 0x205   : > { %3360 = vrot.lane.b32.xlu0 %v3320_v49, %s4410_s15  ;;  %v3310_v2 = vmul.f32 0.5, %v4360_v36 }
 0x206   : > { %v4362_v19 = vpop.eup %4361 }
 0x207   : > { %v4364_v45 = vpop.eup %4363  ;;  %v3308_v62 = vmul.f32 0.5, %v4362_v19  ;;  %v3326_v21 = vadd.f32 0.5, %v3310_v2 }
 0x208   : > { %3362 = vrot.lane.b32.xlu1 %v3321_v58, %s4410_s15  ;;  %v3311_v50 = vmul.f32 0.5, %v4364_v45 }
 0x209   : > { %v4366_v12 = vpop.eup %4365  ;;  %v3324_v46 = vadd.f32 0.5, %v3308_v62 }
 0x20a   : > { %v3309_v63 = vmul.f32 0.5, %v4366_v12  ;;  %v3327_v13 = vadd.f32 0.5, %v3311_v50 }
 0x20b   : > { %3368 = vrot.lane.b32.xlu0 %v3324_v46, %s4410_s15 }
 0x20c   : > { %v3325_v24 = vadd.f32 0.5, %v3309_v63 }
 0x20e   : > { %3370 = vrot.lane.b32.xlu1 %v3325_v24, %s4410_s15 }
 0x20f   : > { %3372 = vrot.lane.b32.xlu0 %v3326_v21, %s4410_s15 }
 0x212   : > { %3374 = vrot.lane.b32.xlu1 %v3327_v13, %s4410_s15 }
 0x262   : > { %v3349_v56 = vpop.permute.xlu1 %3348 }
 0x263   : > { %v3394_v57 = vmul.f32 %v3349_v56, %v5446_v55  ;;  %v3345_v53 = vpop.permute.xlu0 %3344 }
 0x264   : > { %v3392_v10 = vmul.f32 %v3345_v53, %v5449_v18 }
 0x265   : > { %3411 = vst.msk [vmem:[%s4617_s13 + $0x20] sm:$0xff] %vm3408_vm1, %v3394_v57  ;;  %3445 = vrot.lane.b32.xlu0 %v3394_v57, %s4411_s16 }
 0x266   : > { %3409 = vst.msk [vmem:[%s4617_s13] sm:$0xff] %vm3408_vm1, %v3392_v10  ;;  %v3351_v8 = vpop.permute.xlu1 %3350 }
 0x267   : > { %v3395_v17 = vmul.f32 %v3351_v8, %v5453_v6  ;;  %v3347_v35 = vpop.permute.xlu0 %3346 }
 0x268   : > { %v3393_v44 = vmul.f32 %v3347_v35, %v5457_v14 }
 0x269   : > { %3412 = vst.msk [vmem:[%s4617_s13 + $0x28] sm:$0xff] %vm3408_vm1, %v3395_v17  ;;  %3441 = vrot.lane.b32.xlu0 %v3392_v10, %s4411_s16  ;;  %3447 = vrot.lane.b32.xlu1 %v3395_v17, %s4411_s16 }
 0x26a   : > { %3410 = vst.msk [vmem:[%s4617_s13 + $0x8] sm:$0xff] %vm3408_vm1, %v3393_v44 }
 0x26b   : > { %v3357_v55 = vpop.permute.xlu0 %3356 }
 0x26c   : > { %v3398_v18 = vmul.f32 %v3357_v55, %v5462_v29 }
 0x26d   : > { %v3359_v22 = vpop.permute.xlu1 %3358  ;;  %3443 = vrot.lane.b32.xlu1 %v3393_v44, %s4411_s16 }
 0x26e   : > { %v3399_v38 = vmul.f32 %v3359_v22, %v5469_v30  ;;  %3415 = vst.msk [vmem:[%s4617_s13 + $0x60] sm:$0xff] %vm3408_vm1, %v3398_v18  ;;  %3453 = vrot.lane.b32.xlu0 %v3398_v18, %s4411_s16 }
 0x26f   : > { %v3353_v6 = vpop.permute.xlu0 %3352 }
 0x270   : > { %3416 = vst.msk [vmem:[%s4617_s13 + $0x68] sm:$0xff] %vm3408_vm1, %v3399_v38  ;;  %v3396_v14 = vmul.f32 %v3353_v6, %v5465_v11 }
 0x271   : > { %v3355_v4 = vpop.permute.xlu1 %3354  ;;  %3455 = vrot.lane.b32.xlu1 %v3399_v38, %s4411_s16 }
 0x272   : > { %v3397_v40 = vmul.f32 %v3355_v4, %v5473_v1  ;;  %3413 = vst.msk [vmem:[%s4617_s13 + $0x40] sm:$0xff] %vm3408_vm1, %v3396_v14  ;;  %3449 = vrot.lane.b32.xlu0 %v3396_v14, %s4411_s16 }
 0x273   : > { %v3365_v29 = vpop.permute.xlu0 %3364 }
 0x274   : > { %3414 = vst.msk [vmem:[%s4617_s13 + $0x48] sm:$0xff] %vm3408_vm1, %v3397_v40  ;;  %v3402_v30 = vmul.f32 %v3365_v29, %v5478_v3 }
 0x275   : > { %3451 = vrot.lane.b32.xlu1 %v3397_v40, %s4411_s16 }
 0x276   : > { %v3367_v31 = vpop.permute.xlu1 %3366  ;;  %3419 = vst.msk [vmem:[%s4617_s13 + $0xa0] sm:$0xff] %vm3408_vm1, %v3402_v30  ;;  %3461 = vrot.lane.b32.xlu0 %v3402_v30, %s4411_s16 }
 0x277   : > { %v3403_v11 = vmul.f32 %v3367_v31, %v5485_v23  ;;  %v3361_v1 = vpop.permute.xlu0 %3360 }
 0x278   : > { %v3400_v61 = vmul.f32 %v3361_v1, %v5481_v43 }
 0x279   : > { %3420 = vst.msk [vmem:[%s4617_s13 + $0xa8] sm:$0xff] %vm3408_vm1, %v3403_v11  ;;  %3463 = vrot.lane.b32.xlu1 %v3403_v11, %s4411_s16 }
 0x27a   : > { %v3363_v9 = vpop.permute.xlu1 %3362  ;;  %3417 = vst.msk [vmem:[%s4617_s13 + $0x80] sm:$0xff] %vm3408_vm1, %v3400_v61  ;;  %3457 = vrot.lane.b32.xlu0 %v3400_v61, %s4411_s16 }
 0x27b   : > { %v3401_v3 = vmul.f32 %v3363_v9, %v5490_v47 }
 0x27d   : > { %3418 = vst.msk [vmem:[%s4617_s13 + $0x88] sm:$0xff] %vm3408_vm1, %v3401_v3  ;;  %v3369_v23 = vpop.permute.xlu0 %3368  ;;  %3459 = vrot.lane.b32.xlu1 %v3401_v3, %s4411_s16 }
 0x27e   : > { %v3404_v27 = vmul.f32 %v3369_v23, %v5501_v54 }
 0x280   : > { %v3371_v43 = vpop.permute.xlu1 %3370  ;;  %3421 = vst.msk [vmem:[%s4617_s13 + $0xc0] sm:$0xff] %vm3408_vm1, %v3404_v27  ;;  %3465 = vrot.lane.b32.xlu0 %v3404_v27, %s4411_s16 }
 0x281   : > { %v3405_v51 = vmul.f32 %v3371_v43, %v5509_v52  ;;  %v3373_v47 = vpop.permute.xlu0 %3372 }
 0x282   : > { %v3406_v39 = vmul.f32 %v3373_v47, %v5498_v59 }
 0x283   : > { %3422 = vst.msk [vmem:[%s4617_s13 + $0xc8] sm:$0xff] %vm3408_vm1, %v3405_v51  ;;  %3467 = vrot.lane.b32.xlu1 %v3405_v51, %s4411_s16 }
 0x284   : > { %v3375_v54 = vpop.permute.xlu1 %3374  ;;  %3423 = vst.msk [vmem:[%s4617_s13 + $0xe0] sm:$0xff] %vm3408_vm1, %v3406_v39  ;;  %3469 = vrot.lane.b32.xlu0 %v3406_v39, %s4411_s16 }
 0x285   : > { %v3407_v25 = vmul.f32 %v3375_v54, %v5505_v28 }
 0x287   : > { %3424 = vst.msk [vmem:[%s4617_s13 + $0xe8] sm:$0xff] %vm3408_vm1, %v3407_v25  ;;  %3471 = vrot.lane.b32.xlu1 %v3407_v25, %s4411_s16 }
 0x2d7   : > { %v3446_v33 = vpop.permute.xlu0 %3445 }
 0x2d8   : > { %3866 = vst.msk [vmem:[%s4617_s13 + $0x30] sm:$0xff] %vm3408_vm1, %v3446_v33 }
 0x2db   : > { %v3442_v59 = vpop.permute.xlu0 %3441  ;;  %v3448_v52 = vpop.permute.xlu1 %3447 }
 0x2dc   : > { %3864 = vst.msk [vmem:[%s4617_s13 + $0x10] sm:$0xff] %vm3408_vm1, %v3442_v59  ;;  %3867 = vst.msk [vmem:[%s4617_s13 + $0x38] sm:$0xff] %vm3408_vm1, %v3448_v52 }
 0x2df   : > { %v3444_v28 = vpop.permute.xlu1 %3443 }
 0x2e0   : > { %3865 = vst.msk [vmem:[%s4617_s13 + $0x18] sm:$0xff] %vm3408_vm1, %v3444_v28  ;;  %v3454_v42 = vpop.permute.xlu0 %3453 }
 0x2e1   : > { %3870 = vst.msk [vmem:[%s4617_s13 + $0x70] sm:$0xff] %vm3408_vm1, %v3454_v42 }
 0x2e3   : > { %v3456_v15 = vpop.permute.xlu1 %3455 }
 0x2e4   : > { %3871 = vst.msk [vmem:[%s4617_s13 + $0x78] sm:$0xff] %vm3408_vm1, %v3456_v15  ;;  %v3450_v7 = vpop.permute.xlu0 %3449 }
 0x2e5   : > { %3868 = vst.msk [vmem:[%s4617_s13 + $0x50] sm:$0xff] %vm3408_vm1, %v3450_v7 }
 0x2e7   : > { %v3452_v20 = vpop.permute.xlu1 %3451 }
 0x2e8   : > { %3869 = vst.msk [vmem:[%s4617_s13 + $0x58] sm:$0xff] %vm3408_vm1, %v3452_v20  ;;  %v3462_v37 = vpop.permute.xlu0 %3461 }
 0x2e9   : > { %3874 = vst.msk [vmem:[%s4617_s13 + $0xb0] sm:$0xff] %vm3408_vm1, %v3462_v37 }
 0x2eb   : > { %v3464_v32 = vpop.permute.xlu1 %3463 }
 0x2ec   : > { %3875 = vst.msk [vmem:[%s4617_s13 + $0xb8] sm:$0xff] %vm3408_vm1, %v3464_v32  ;;  %v3458_v5 = vpop.permute.xlu0 %3457 }
 0x2ed   : > { %3872 = vst.msk [vmem:[%s4617_s13 + $0x90] sm:$0xff] %vm3408_vm1, %v3458_v5 }
 0x2ef   : > { %v3460_v48 = vpop.permute.xlu1 %3459 }
 0x2f0   : > { %3873 = vst.msk [vmem:[%s4617_s13 + $0x98] sm:$0xff] %vm3408_vm1, %v3460_v48 }
 0x2f2   : > { %v3466_v34 = vpop.permute.xlu0 %3465 }
 0x2f3   : > { %3876 = vst.msk [vmem:[%s4617_s13 + $0xd0] sm:$0xff] %vm3408_vm1, %v3466_v34 }
 0x2f5   : > { %v3468_v26 = vpop.permute.xlu1 %3467 }
 0x2f6   : > { %3877 = vst.msk [vmem:[%s4617_s13 + $0xd8] sm:$0xff] %vm3408_vm1, %v3468_v26  ;;  %v3470_v60 = vpop.permute.xlu0 %3469 }
 0x2f7   : > { %3878 = vst.msk [vmem:[%s4617_s13 + $0xf0] sm:$0xff] %vm3408_vm1, %v3470_v60 }
 0x2f9   : > { %v3472_v16 = vpop.permute.xlu1 %3471 }
 0x2fa   : > { %3879 = vst.msk [vmem:[%s4617_s13 + $0xf8] sm:$0xff] %vm3408_vm1, %v3472_v16 }
 0x2fb PF: > { %s15_s22 = sadd.s32 1, %s4406_s22   ;;  %s5672_s18 = smov %s4398_s20 }
 0x2fc   : > { %p12_p0 = scmp.ge.s32.totalorder %s15_s22, 6   ;;  %s5673_s19 = smov %s4402_s21 }
 0x2fd   : > { %s5674_s20 = smov %s5677_s23  ;;  %s5675_s21 = smov %s5681_s24 }
 0x2fe   :  { %14 = sbr.rel (!%p12_p0) target bundleno = 3 (0x3), region = 105 }

// kernel: tpu_custom_call.1
= control target key start
LH: loop header
LB: loop body
LE: loop exit
PB: predicated region body
PF: predicated region fallthrough
CT: control target
= control target key end

     0   :  { %s4442_s18 = smov 0   ;;  %s4444_s19 = smov 0   ;;  %s5636_s0 = inlined_call_operand.vmem [shape: bf16[2,16,16,4], index: 0, kind: input, shape index: {}]   ;;  %s5637_s1 = inlined_call_operand.vmem [shape: bf16[2,16,16,4], index: 1, kind: input, shape index: {}]   ;;  %s5638_s2 = inlined_call_operand.vmem [shape: bf16[2,16,16,4], index: 2, kind: input, shape index: {}]   ;;  %s5639_s3 = inlined_call_operand.vmem [shape: bf16[9,4,32], index: 3, kind: input, shape index: {}]   ;;  %s5640_s4 = inlined_call_operand.vmem [shape: f32[1,32], index: 4, kind: input, shape index: {}]   ;;  %s5641_s5 = inlined_call_operand.vmem [shape: f32[2,16,2,16,8], index: 5, kind: output, shape index: {}]  }
   0x1   :  { %s4446_s20 = smov 0   ;;  %s4448_s21 = smov 0  }
   0x2   :  { %s4450_s22 = smov 0  }
   0x3 LB: > { %s24_s23 = sadd.s32 1, %s4398_s20  ;;  %s27_s24 = sadd.s32 1, %s4402_s21  ;;  %s4406_s22 = sphi %s4450_s22, %s15_s22   ;;  %s4402_s21 = sphi %s4448_s21, %s5675_s21   ;;  %s4398_s20 = sphi %s4446_s20, %s5674_s20   ;;  %s4394_s19 = sphi %s4444_s19, %s5673_s19   ;;  %s4390_s18 = sphi %s4442_s18, %s5672_s18  }
   0x4   : > { %p25_p0 = scmp.ge.s32.totalorder %s24_s23, 2  ;;  %p3657_p1 = scmp.ge.s32.totalorder %s4406_s22, 1 }
   0x5   : > { %p273_p2 = scmp.lt.s32.totalorder %s4406_s22, 5 }
   0x6   : > { %s5677_s23 = smov (%p25_p0, %s24_s23), 0  ;;  %s5679_s24 = smov (!%p25_p0, %s27_s24), %s4402_s21 }
   0x7   : > { %p274_p3 = pnand %p3657_p1, %p273_p2  ;;  %p29_p4 = scmp.ge.s32.totalorder %s5679_s24, 2 }
   0x9   : > { %s5681_s24 = smov (%p29_p4, %s5679_s24), 0  ;;  %277 = sbr.rel (%p274_p3) target bundleno = 763 (0x2fb), region = 40 }
  0x10   : > { %vm394_vm0 = vcmask 24576   ;;  %vm395_vm1 = vsmask.f32 256  ;;  %v400_v0 = vld [vmem:[#allocation2 + $0xc] sm:$0x1]  ;;  %s4477_s25 = sshll.u32 %s4390_s18, 3 }
  0x11   : > { %vm4481_vm2 = vmand %vm394_vm0, %vm395_vm1  ;;  %v403_v2 = vld [vmem:[#allocation2 + $0x18] sm:$0x1]  ;;  %v406_v3 = vld [vmem:[#allocation2 + $0x24] sm:$0x1]  ;;  %vm427_vm3 = vsmask.f32 7938 }
  0x12   : > { %v401_v4 = vsel %vm4481_vm2, 0, %v400_v0  ;;  %v404_v5 = vsel %vm4481_vm2, 0, %v403_v2  ;;  %v407_v6 = vsel %vm4481_vm2, 0, %v406_v3  ;;  %v409_v7 = vld [vmem:[#allocation2 + $0x30] sm:$0x1]  ;;  %p338_p5 = scmp.lt.s32.totalorder %s4394_s19, 1  ;;  %vm4496_vm4 = vmand %vm394_vm0, %vm427_vm3 }
  0x13   : > { %402 = vst [vmem:[#allocation2 + $0xc] sm:$0x1] %v401_v4  ;;  %405 = vst [vmem:[#allocation2 + $0x18] sm:$0x1] %v404_v5  ;;  %v410_v8 = vsel %vm4481_vm2, 0, %v409_v7  ;;  %p340_p6 = scmp.lt.s32.totalorder %s4477_s25, 15 }
  0x14   : > { %408 = vst [vmem:[#allocation2 + $0x24] sm:$0x1] %v407_v6  ;;  %v412_v9 = vld [vmem:[#allocation2 + $0x3c] sm:$0x1]  ;;  %v415_v10 = vld [vmem:[#allocation2 + $0x48] sm:$0x1] }
  0x15   : > { %411 = vst [vmem:[#allocation2 + $0x30] sm:$0x1] %v410_v8  ;;  %v413_v12 = vsel %vm4481_vm2, 0, %v412_v9  ;;  %v416_v13 = vsel %vm4481_vm2, 0, %v415_v10  ;;  %v418_v14 = vld [vmem:[#allocation2 + $0x54] sm:$0x1] }
  0x16   : > { %v421_v15 = vld [vmem:[#allocation2 + $0x60] sm:$0x1]  ;;  %414 = vst [vmem:[#allocation2 + $0x3c] sm:$0x1] %v413_v12  ;;  %417 = vst [vmem:[#allocation2 + $0x48] sm:$0x1] %v416_v13 }
  0x17   : > { %v419_v16 = vsel %vm4481_vm2, 0, %v418_v14  ;;  %v422_v17 = vsel %vm4481_vm2, 0, %v421_v15  ;;  %v432_v18 = vld [vmem:[#allocation2 + $0x14] sm:$0x1]  ;;  %v435_v19 = vld [vmem:[#allocation2 + $0x20] sm:$0x1] }
  0x18   : > { %420 = vst [vmem:[#allocation2 + $0x54] sm:$0x1] %v419_v16  ;;  %423 = vst [vmem:[#allocation2 + $0x60] sm:$0x1] %v422_v17  ;;  %v433_v20 = vsel %vm4496_vm4, 0, %v432_v18  ;;  %v436_v21 = vsel %vm4496_vm4, 0, %v435_v19 }
  0x19   : > { %v438_v22 = vld [vmem:[#allocation2 + $0x2c] sm:$0x1]  ;;  %v441_v23 = vld [vmem:[#allocation2 + $0x38] sm:$0x1]  ;;  %434 = vst [vmem:[#allocation2 + $0x14] sm:$0x1] %v433_v20 }
  0x1a   : > { %437 = vst [vmem:[#allocation2 + $0x20] sm:$0x1] %v436_v21  ;;  %v439_v24 = vsel %vm4496_vm4, 0, %v438_v22  ;;  %v442_v25 = vsel %vm4496_vm4, 0, %v441_v23  ;;  %v444_v26 = vld [vmem:[#allocation2 + $0x44] sm:$0x1] }
  0x1b   : > { %v447_v27 = vld [vmem:[#allocation2 + $0x50] sm:$0x1]  ;;  %440 = vst [vmem:[#allocation2 + $0x2c] sm:$0x1] %v439_v24  ;;  %443 = vst [vmem:[#allocation2 + $0x38] sm:$0x1] %v442_v25 }
  0x1c   : > { %v445_v28 = vsel %vm4496_vm4, 0, %v444_v26  ;;  %v448_v29 = vsel %vm4496_vm4, 0, %v447_v27  ;;  %v450_v30 = vld [vmem:[#allocation2 + $0x5c] sm:$0x1]  ;;  %v453_v31 = vld [vmem:[#allocation2 + $0x68] sm:$0x1] }
  0x1d   : > { %446 = vst [vmem:[#allocation2 + $0x44] sm:$0x1] %v445_v28  ;;  %449 = vst [vmem:[#allocation2 + $0x50] sm:$0x1] %v448_v29  ;;  %v451_v32 = vsel %vm4496_vm4, 0, %v450_v30  ;;  %v454_v33 = vsel %vm4496_vm4, 0, %v453_v31 }
  0x1e   : > { %v397_v34 = vld [vmem:[#allocation2] sm:$0x1]  ;;  %v424_v35 = vld [vmem:[#allocation2 + $0x6c] sm:$0x1]  ;;  %452 = vst [vmem:[#allocation2 + $0x5c] sm:$0x1] %v451_v32 }
  0x1f   : > { %455 = vst [vmem:[#allocation2 + $0x68] sm:$0x1] %v454_v33  ;;  %v398_v36 = vsel %vm4481_vm2, 0, %v397_v34  ;;  %v425_v37 = vsel %vm4481_vm2, 0, %v424_v35  ;;  %v429_v38 = vld [vmem:[#allocation2 + $0x8] sm:$0x1] }
  0x20   : > { %v456_v39 = vld [vmem:[#allocation2 + $0x74] sm:$0x1]  ;;  %399 = vst [vmem:[#allocation2] sm:$0x1] %v398_v36  ;;  %426 = vst [vmem:[#allocation2 + $0x6c] sm:$0x1] %v425_v37 }
  0x21   : > { %v430_v40 = vsel %vm4496_vm4, 0, %v429_v38  ;;  %v457_v41 = vsel %vm4496_vm4, 0, %v456_v39  ;;  %s5683_s19 = smov (!%p338_p5, %s4394_s19), 1  ;;  %s3663_s28 = sadd.s32 4294967295, %s4477_s25  ;;  %vm475_vm5 = vsmask.f32 4368 }
  0x22   : > { %431 = vst [vmem:[#allocation2 + $0x8] sm:$0x1] %v430_v40  ;;  %458 = vst [vmem:[#allocation2 + $0x74] sm:$0x1] %v457_v41  ;;  %s4541_s26 = scalar_select %p340_p6, %s4477_s25, 15  ;;  %vm638_vm6 = vcmask 27648  }
  0x23   : > { %s4544_s27 = sshll.u32 %s5683_s19, 5  ;;  %p350_p7 = scmp.gt.s32.totalorder %s3663_s28, 0  ;;  %v640_v48 = vld [vmem:[#allocation2 + $0xc] sm:$0xf]  ;;  %v645_v49 = vld [vmem:[#allocation2 + $0x14] sm:$0x1]  ;;  %vm4570_vm7 = vmand %vm638_vm6, %vm427_vm3 }
  0x24   : > { %s3659_s29 = sshll.u32 %s4541_s26, 1  ;;  %p3664_p8 = scmp.lt.s32.totalorder %s3663_s28, 15  ;;  %vm4577_vm8 = vmor %vm395_vm1, %vm475_vm5  ;;  %v648_v2 = vld [vmem:[#allocation2 + $0x18] sm:$0xf]  ;;  %v652_v11 = vld [vmem:[#allocation2 + $0x20] sm:$0x1] }
  0x25   : > { %s344_s30 = sadd.s32 %s4544_s27, %s3659_s29  ;;  %s366_s7 = sadd.s32 8, %s4477_s25  ;;  %v655_v27 = vld [vmem:[#allocation2 + $0x24] sm:$0xf]  ;;  %v659_v28 = vld [vmem:[#allocation2 + $0x2c] sm:$0x1] }
  0x26   : > { %s3661_s6 = sshll.u32 %s344_s30, 2  ;;  %p4555_p9 = scmp.lt.s32.totalorder %s366_s7, 15 }
  0x27   : > { %s4553_s10 = scalar_lea.vmem %s5636_s0, %s3661_s6  ;;  %s3680_s14 = sshll.u32 %s4541_s26, 2 }
  0x28   : > { %s351_s12 = scalar_select %p350_p7, %s3663_s28, 0  ;;  %v459_v42 = vld [vmem:[%s4553_s10] sm:$0xf]  ;;  %v460_v43 = vld [vmem:[%s4553_s10 + $0x4] sm:$0xf] }
  0x29   : > { %s5685_s7 = smov (!%p4555_p9, %s366_s7), 15  ;;  %v478_v44 = vshrl.u32 %v459_v42, 16  ;;  %v481_v45 = vshll.u32 %v459_v42, 16  ;;  %v486_v46 = vshrl.u32 %v460_v43, 16  ;;  %v489_v47 = vshll.u32 %v460_v43, 16  ;;  %s3681_s9 = sshll.u32 %s5683_s19, 6 }
  0x2a   : > { %s5687_s12 = smov (!%p3664_p8, %s351_s12), 15  ;;  %v461_v50 = vld [vmem:[%s4553_s10 + $0x8] sm:$0xf]  ;;  %v462_v51 = vld [vmem:[%s4553_s10 + $0xc] sm:$0xf]  ;;  %s5689_s7 = smov (!%p4555_p9, %s5685_s7), 15 }
  0x2b   : > { %v480_v52 = vrot.slane %v478_v44, 7  ;;  %v488_v54 = vrot.slane %v486_v46, 7  ;;  %v495_v55 = vshrl.u32 %v461_v50, 16  ;;  %v498_v56 = vshll.u32 %v461_v50, 16  ;;  %s3669_s13 = sshll.u32 %s5687_s12, 1  ;;  %s3676_s16 = sshll.u32 %s5689_s7, 1 }
  0x2c   : > { %v503_v58 = vshrl.u32 %v462_v51, 16  ;;  %v506_v59 = vshll.u32 %v462_v51, 16  ;;  %v463_v60 = vld [vmem:[%s4553_s10 + $0x10] sm:$0xf]  ;;  %s358_s15 = sadd.s32 %s3669_s13, %s4544_s27  ;;  %v464_v3 = vld [vmem:[%s4553_s10 + $0x14] sm:$0xf]  ;;  %s375_s25 = sadd.s32 %s3676_s16, %s4544_s27 }
  0x2d   : > { %v483_v61 = vor.u32 %v481_v45, %v480_v52  ;;  %v484_v62 = vrot.slane %v480_v52, 4  ;;  %v491_v63 = vor.u32 %v489_v47, %v488_v54  ;;  %v493_v0 = vrot.slane %v488_v54, 4  ;;  %s3671_s17 = sshll.u32 %s358_s15, 2  ;;  %s3678_s6 = sshll.u32 %s375_s25, 2  ;;  %v465_v13 = vld [vmem:[%s4553_s10 + $0x18] sm:$0xf] }
  0x2e   : > { %v497_v4 = vrot.slane %v495_v55, 7  ;;  %v505_v5 = vrot.slane %v503_v58, 7  ;;  %v512_v6 = vshrl.u32 %v463_v60, 16  ;;  %v515_v7 = vshll.u32 %v463_v60, 16  ;;  %s4588_s30 = scalar_lea.vmem %s5637_s1, %s3671_s17  ;;  %s4600_s8 = scalar_lea.vmem %s5638_s2, %s3678_s6  ;;  %v466_v18 = vld [vmem:[%s4553_s10 + $0x1c] sm:$0xf] }
  0x2f   : > { %v641_v8 = vsel %vm4570_vm7, %v483_v61, %v640_v48  ;;  %v492_v9 = vsel %vm4577_vm8, %v484_v62, %v491_v63  ;;  %v646_v10 = vsel %vm4481_vm2, %v493_v0, %v645_v49  ;;  %v520_v12 = vshrl.u32 %v464_v3, 16  ;;  %s389_s11 = sadd.s32 %s3681_s9, %s3680_s14  ;;  %v467_v23 = vld [vmem:[%s4553_s10 + $0x20] sm:$0xf]  ;;  %v468_v34 = vld [vmem:[%s4553_s10 + $0x24] sm:$0xf]  ;;  %p3683_p10 = scmp.le.s32.totalorder %s4390_s18, 0 }
  0x30   : > { %642 = vst [vmem:[#allocation2 + $0xc] sm:$0xf] %v641_v8  ;;  %644 = vst.msk [vmem:[#allocation2 + $0x10] sm:$0xf] %vm638_vm6, %v492_v9  ;;  %v500_v14 = vor.u32 %v498_v56, %v497_v4  ;;  %v501_v15 = vrot.slane %v497_v4, 4  ;;  %v508_v16 = vor.u32 %v506_v59, %v505_v5  ;;  %v510_v17 = vrot.slane %v505_v5, 4 }
  0x31   : > { %647 = vst [vmem:[#allocation2 + $0x14] sm:$0x1] %v646_v10  ;;  %v514_v19 = vrot.slane %v512_v6, 7  ;;  %v522_v20 = vrot.slane %v520_v12, 7  ;;  %v523_v21 = vshll.u32 %v464_v3, 16  ;;  %v529_v22 = vshrl.u32 %v465_v13, 16 }
  0x32   : > { %s3682_s12 = sshll.u32 %s389_s11, 3  ;;  %v649_v24 = vsel %vm4570_vm7, %v500_v14, %v648_v2  ;;  %v509_v25 = vsel %vm4577_vm8, %v501_v15, %v508_v16  ;;  %v653_v26 = vsel %vm4481_vm2, %v510_v17, %v652_v11  ;;  %v532_v29 = vshll.u32 %v465_v13, 16  ;;  %v469_v39 = vld [vmem:[%s4553_s10 + $0x28] sm:$0xf]  ;;  %v662_v43 = vld [vmem:[#allocation2 + $0x30] sm:$0xf] }
  0x33   : > { %s4617_s13 = scalar_lea.vmem %s5641_s5, %s3682_s12  ;;  %650 = vst [vmem:[#allocation2 + $0x18] sm:$0xf] %v649_v24  ;;  %651 = vst.msk [vmem:[#allocation2 + $0x1c] sm:$0xf] %vm638_vm6, %v509_v25  ;;  %v517_v30 = vor.u32 %v515_v7, %v514_v19  ;;  %v518_v31 = vrot.slane %v514_v19, 4  ;;  %v525_v32 = vor.u32 %v523_v21, %v522_v20  ;;  %v527_v33 = vrot.slane %v522_v20, 4 }
  0x34   : > { %654 = vst [vmem:[#allocation2 + $0x20] sm:$0x1] %v653_v26  ;;  %v531_v35 = vrot.slane %v529_v22, 7  ;;  %v537_v36 = vshrl.u32 %v466_v18, 16  ;;  %v540_v37 = vshll.u32 %v466_v18, 16  ;;  %v546_v38 = vshrl.u32 %v467_v23, 16 }
  0x35   : > { %v656_v40 = vsel %vm4570_vm7, %v517_v30, %v655_v27  ;;  %v526_v41 = vsel %vm4577_vm8, %v518_v31, %v525_v32  ;;  %v660_v42 = vsel %vm4481_vm2, %v527_v33, %v659_v28  ;;  %v666_v44 = vld [vmem:[#allocation2 + $0x38] sm:$0x1]  ;;  %v549_v45 = vshll.u32 %v467_v23, 16  ;;  %v470_v50 = vld [vmem:[%s4553_s10 + $0x2c] sm:$0xf] }
  0x36   : > { %657 = vst [vmem:[#allocation2 + $0x24] sm:$0xf] %v656_v40  ;;  %658 = vst.msk [vmem:[#allocation2 + $0x28] sm:$0xf] %vm638_vm6, %v526_v41  ;;  %v534_v46 = vor.u32 %v532_v29, %v531_v35  ;;  %v535_v47 = vrot.slane %v531_v35, 4  ;;  %v539_v48 = vrot.slane %v537_v36, 7 }
  0x37   : > { %661 = vst [vmem:[#allocation2 + $0x2c] sm:$0x1] %v660_v42  ;;  %v548_v49 = vrot.slane %v546_v38, 7  ;;  %v669_v51 = vld [vmem:[#allocation2 + $0x3c] sm:$0xf]  ;;  %v554_v52 = vshrl.u32 %v468_v34, 16 }
  0x38   : > { %v557_v54 = vshll.u32 %v468_v34, 16  ;;  %v563_v55 = vshrl.u32 %v469_v39, 16  ;;  %v566_v56 = vshll.u32 %v469_v39, 16  ;;  %v663_v58 = vsel %vm4570_vm7, %v534_v46, %v662_v43  ;;  %v471_v62 = vld [vmem:[%s4553_s10 + $0x30] sm:$0xf] }
  0x39   : > { %v542_v59 = vor.u32 %v540_v37, %v539_v48  ;;  %v544_v60 = vrot.slane %v539_v48, 4  ;;  %v551_v61 = vor.u32 %v549_v45, %v548_v49  ;;  %664 = vst [vmem:[#allocation2 + $0x30] sm:$0xf] %v663_v58  ;;  %v552_v63 = vrot.slane %v548_v49, 4  ;;  %v472_v4 = vld [vmem:[%s4553_s10 + $0x34] sm:$0xf] }
  0x3a   : > { %v556_v0 = vrot.slane %v554_v52, 7  ;;  %v565_v2 = vrot.slane %v563_v55, 7  ;;  %v571_v3 = vshrl.u32 %v470_v50, 16  ;;  %v673_v8 = vld [vmem:[#allocation2 + $0x44] sm:$0x1]  ;;  %v574_v10 = vshll.u32 %v470_v50, 16 }
  0x3b   : > { %v543_v5 = vsel %vm4577_vm8, %v535_v47, %v542_v59  ;;  %v667_v6 = vsel %vm4481_vm2, %v544_v60, %v666_v44  ;;  %v670_v7 = vsel %vm4570_vm7, %v551_v61, %v669_v51  ;;  %v676_v9 = vld [vmem:[#allocation2 + $0x48] sm:$0xf]  ;;  %v473_v15 = vld [vmem:[%s4553_s10 + $0x38] sm:$0xf]  ;;  %v580_v17 = vshrl.u32 %v471_v62, 16 }
  0x3c   : > { %665 = vst.msk [vmem:[#allocation2 + $0x34] sm:$0xf] %vm638_vm6, %v543_v5  ;;  %668 = vst [vmem:[#allocation2 + $0x38] sm:$0x1] %v667_v6  ;;  %v559_v11 = vor.u32 %v557_v54, %v556_v0  ;;  %v561_v12 = vrot.slane %v556_v0, 4  ;;  %v568_v13 = vor.u32 %v566_v56, %v565_v2  ;;  %v569_v14 = vrot.slane %v565_v2, 4 }
  0x3d   : > { %671 = vst [vmem:[#allocation2 + $0x3c] sm:$0xf] %v670_v7  ;;  %v573_v16 = vrot.slane %v571_v3, 7  ;;  %v583_v18 = vshll.u32 %v471_v62, 16  ;;  %v588_v19 = vshrl.u32 %v472_v4, 16  ;;  %v591_v25 = vshll.u32 %v472_v4, 16 }
  0x3e   : > { %v474_v20 = vld [vmem:[%s4553_s10 + $0x3c] sm:$0xf]  ;;  %v560_v21 = vsel %vm4577_vm8, %v552_v63, %v559_v11  ;;  %v674_v22 = vsel %vm4481_vm2, %v561_v12, %v673_v8  ;;  %v677_v23 = vsel %vm4570_vm7, %v568_v13, %v676_v9  ;;  %v680_v24 = vld [vmem:[#allocation2 + $0x50] sm:$0x1]  ;;  %v582_v28 = vrot.slane %v580_v17, 7 }
  0x3f   : > { %672 = vst.msk [vmem:[#allocation2 + $0x40] sm:$0xf] %vm638_vm6, %v560_v21  ;;  %675 = vst [vmem:[#allocation2 + $0x44] sm:$0x1] %v674_v22  ;;  %v576_v26 = vor.u32 %v574_v10, %v573_v16  ;;  %v578_v27 = vrot.slane %v573_v16, 4  ;;  %v590_v29 = vrot.slane %v588_v19, 7 }
  0x40   : > { %678 = vst [vmem:[#allocation2 + $0x48] sm:$0xf] %v677_v23  ;;  %v683_v30 = vld [vmem:[#allocation2 + $0x54] sm:$0xf]  ;;  %v597_v31 = vshrl.u32 %v473_v15, 16  ;;  %v600_v32 = vshll.u32 %v473_v15, 16  ;;  %v585_v37 = vor.u32 %v583_v18, %v582_v28 }
  0x41   : > { %v605_v33 = vshrl.u32 %v474_v20, 16  ;;  %v608_v34 = vshll.u32 %v474_v20, 16  ;;  %v577_v35 = vsel %vm4577_vm8, %v569_v14, %v576_v26  ;;  %v681_v36 = vsel %vm4481_vm2, %v578_v27, %v680_v24  ;;  %v687_v39 = vld [vmem:[#allocation2 + $0x5c] sm:$0x1]  ;;  %v690_v45 = vld [vmem:[#allocation2 + $0x60] sm:$0xf] }
  0x42   : > { %v586_v38 = vrot.slane %v582_v28, 4  ;;  %679 = vst.msk [vmem:[#allocation2 + $0x4c] sm:$0xf] %vm638_vm6, %v577_v35  ;;  %682 = vst [vmem:[#allocation2 + $0x50] sm:$0x1] %v681_v36  ;;  %v593_v40 = vor.u32 %v591_v25, %v590_v29  ;;  %v595_v41 = vrot.slane %v590_v29, 4  ;;  %v684_v44 = vsel %vm4570_vm7, %v585_v37, %v683_v30 }
  0x43   : > { %v599_v42 = vrot.slane %v597_v31, 7  ;;  %v607_v43 = vrot.slane %v605_v33, 7  ;;  %685 = vst [vmem:[#allocation2 + $0x54] sm:$0xf] %v684_v44  ;;  %v694_v50 = vld [vmem:[#allocation2 + $0x68] sm:$0x1] }
  0x44   : > { %v594_v46 = vsel %vm4577_vm8, %v586_v38, %v593_v40  ;;  %v688_v47 = vsel %vm4481_vm2, %v595_v41, %v687_v39  ;;  %700 = sbr.rel (%p3683_p10) target bundleno = 79 (0x4f), region = 44  ;;  %v701_v58 = vld [vmem:[%s4588_s30] sm:$0xf] (!%p3683_p10)  ;;  %v702_v59 = vld [vmem:[%s4588_s30 + $0x4] sm:$0xf] (!%p3683_p10) }
  0x45   : > { %v602_v48 = vor.u32 %v600_v32, %v599_v42  ;;  %v603_v49 = vrot.slane %v599_v42, 4  ;;  %686 = vst.msk [vmem:[#allocation2 + $0x58] sm:$0xf] %vm638_vm6, %v594_v46  ;;  %689 = vst [vmem:[#allocation2 + $0x5c] sm:$0x1] %v688_v47  ;;  %v610_v51 = vor.u32 %v608_v34, %v607_v43  ;;  %v612_v52 = vrot.slane %v607_v43, 4 }
  0x46   : > { %v704_v60 = vshrl.u32 (!%p3683_p10), %v701_v58, 16  ;;  %v707_v61 = vshll.u32 (!%p3683_p10), %v701_v58, 16  ;;  %v712_v62 = vshrl.u32 (!%p3683_p10), %v702_v59, 16  ;;  %v715_v63 = vshll.u32 (!%p3683_p10), %v702_v59, 16  ;;  %v723_v3 = vld [vmem:[#allocation2] sm:$0xf] (!%p3683_p10) }
  0x47   : > { %v691_v54 = vsel %vm4570_vm7, %v602_v48, %v690_v45  ;;  %v611_v55 = vsel %vm4577_vm8, %v603_v49, %v610_v51  ;;  %v695_v56 = vsel %vm4481_vm2, %v612_v52, %v694_v50  ;;  %v727_v4 = vld [vmem:[#allocation2 + $0x8] sm:$0x1] (!%p3683_p10) }
  0x48   : > { %692 = vst [vmem:[#allocation2 + $0x60] sm:$0xf] %v691_v54  ;;  %693 = vst.msk [vmem:[#allocation2 + $0x64] sm:$0xf] %vm638_vm6, %v611_v55  ;;  %v706_v0 = vrot.slane (!%p3683_p10), %v704_v60, 7  ;;  %v714_v2 = vrot.slane (!%p3683_p10), %v712_v62, 7 }
  0x49   : > { %696 = vst [vmem:[#allocation2 + $0x68] sm:$0x1] %v695_v56 }
  0x4a   : > { %v709_v5 = vor.u32 (!%p3683_p10), %v707_v61, %v706_v0  ;;  %v710_v6 = vrot.slane (!%p3683_p10), %v706_v0, 4  ;;  %v717_v7 = vor.u32 (!%p3683_p10), %v715_v63, %v714_v2  ;;  %v719_v8 = vrot.slane (!%p3683_p10), %v714_v2, 4 }
  0x4c   : > { %v724_v9 = vsel %vm4570_vm7, %v709_v5, %v723_v3  ;;  %v718_v10 = vsel %vm4577_vm8, %v710_v6, %v717_v7  ;;  %v728_v11 = vsel %vm4481_vm2, %v719_v8, %v727_v4 }
  0x4d   : > { %725 = vst [vmem:[#allocation2] sm:$0xf] %v724_v9  ;;  %726 = vst.msk [vmem:[#allocation2 + $0x4] sm:$0xf] %vm638_vm6, %v718_v10 }
  0x4e   : > { %729 = vst [vmem:[#allocation2 + $0x8] sm:$0x1] %v728_v11 }
  0x4f PF: > { %p3684_p11 = scmp.ne.s32.totalorder %s4390_s18, 0 }
  0x50   : > { %v4408_v15 = vmov (!%p3684_p11), 0  }
  0x51   : > { %733 = sbr.rel (%p3684_p11) target bundleno = 88 (0x58), region = 48  ;;  %737 = vst.msk [vmem:[#allocation2 + $0x4] sm:$0xf] (!%p3684_p11), %vm638_vm6, %v4408_v15 }
  0x54   : > { %v734_v12 = vld [vmem:[#allocation2] sm:$0xf] (!%p3684_p11) }
  0x55   : > { %v738_v13 = vld [vmem:[#allocation2 + $0x8] sm:$0x1] (!%p3684_p11)  ;;  %v735_v14 = vsel (!%p3684_p11), %vm4570_vm7, 0, %v734_v12 }
  0x56   : > { %v739_v16 = vsel (!%p3684_p11), %vm4481_vm2, 0, %v738_v13  ;;  %736 = vst [vmem:[#allocation2] sm:$0xf] (!%p3684_p11), %v735_v14 }
  0x57   : > { %740 = vst [vmem:[#allocation2 + $0x8] sm:$0x1] (!%p3684_p11), %v739_v16 }
  0x58 PF: > { %p3685_p12 = scmp.ge.s32.totalorder %s4390_s18, 1 }
  0x59   : > { %v745_v17 = vld [vmem:[%s4600_s8] sm:$0xf] (!%p3685_p12)  ;;  %v746_v18 = vld [vmem:[%s4600_s8 + $0x4] sm:$0xf] (!%p3685_p12)  ;;  %v768_v25 = vld [vmem:[#allocation2 + $0x6c] sm:$0xf] (!%p3685_p12) }
  0x5a   : > { %744 = sbr.rel (%p3685_p12) target bundleno = 99 (0x63), region = 52  ;;  %v748_v19 = vshrl.u32 (!%p3685_p12), %v745_v17, 16  ;;  %v751_v20 = vshll.u32 (!%p3685_p12), %v745_v17, 16  ;;  %v756_v21 = vshrl.u32 (!%p3685_p12), %v746_v18, 16  ;;  %v759_v22 = vshll.u32 (!%p3685_p12), %v746_v18, 16 }
  0x5b   : > { %v772_v26 = vld [vmem:[#allocation2 + $0x74] sm:$0x1] (!%p3685_p12) }
  0x5c   : > { %v750_v23 = vrot.slane (!%p3685_p12), %v748_v19, 7  ;;  %v758_v24 = vrot.slane (!%p3685_p12), %v756_v21, 7 }
  0x5e   : > { %v753_v27 = vor.u32 (!%p3685_p12), %v751_v20, %v750_v23  ;;  %v754_v28 = vrot.slane (!%p3685_p12), %v750_v23, 4  ;;  %v761_v29 = vor.u32 (!%p3685_p12), %v759_v22, %v758_v24  ;;  %v763_v30 = vrot.slane (!%p3685_p12), %v758_v24, 4 }
  0x60   : > { %v769_v31 = vsel (!%p3685_p12), %vm4570_vm7, %v753_v27, %v768_v25  ;;  %v762_v32 = vsel (!%p3685_p12), %vm4577_vm8, %v754_v28, %v761_v29  ;;  %v773_v33 = vsel (!%p3685_p12), %vm4481_vm2, %v763_v30, %v772_v26 }
  0x61   : > { %770 = vst [vmem:[#allocation2 + $0x6c] sm:$0xf] %v769_v31  ;;  %771 = vst.msk [vmem:[#allocation2 + $0x70] sm:$0xf] %vm638_vm6, %v762_v32 }
  0x62   : > { %774 = vst [vmem:[#allocation2 + $0x74] sm:$0x1] %v773_v33 }
  0x63 PF: > { %p3686_p13 = scmp.ne.s32.totalorder %s4390_s18, 1 }
  0x64   : > { %v4409_v37 = vmov (!%p3686_p13), 0  }
  0x65   : > { %778 = sbr.rel (%p3686_p13) target bundleno = 109 (0x6d), region = 56  ;;  %783 = vst.msk [vmem:[#allocation2 + $0x70] sm:$0xf] (!%p3686_p13), %vm638_vm6, %v4409_v37 }
  0x69   : > { %v784_v35 = vld [vmem:[#allocation2 + $0x74] sm:$0x1] (!%p3686_p13) }
  0x6a   : > { %v780_v34 = vld [vmem:[#allocation2 + $0x6c] sm:$0xf] (!%p3686_p13)  ;;  %v785_v57 = vsel (!%p3686_p13), %vm4481_vm2, 0, %v784_v35 }
  0x6b   : > { %v781_v36 = vsel (!%p3686_p13), %vm4570_vm7, 0, %v780_v34  ;;  %786 = vst [vmem:[#allocation2 + $0x74] sm:$0x1] (!%p3686_p13), %v785_v57 }
  0x6c   : > { %782 = vst [vmem:[#allocation2 + $0x6c] sm:$0xf] %v781_v36 }
  0x6d PF: > { %vm1058_vm9 = vcmask 1041408   ;;  %v3762_v38 = vld [vmem:[%s5639_s3 + $0x8] sm:$0x3]  ;;  %v3687_v39 = vld [vmem:[%s5639_s3 + $0x2] sm:$0x3]  ;;  %vm1033_vm13 = vcmask 31744  }
  0x6e   : > { %4261 = vmatprep.subr.msk.bf16.mxu0 %vm1058_vm9, %v3762_v38  ;;  %4257 = vmatprep.subr.msk.bf16.mxu1 %vm1058_vm9, %v3687_v39  ;;  %v4710_v53 = vsel %vm1058_vm9, %v3762_v38, 0  ;;  %v1060_v1 = vsel %vm1058_vm9, %v3687_v39, 0  ;;  %v4713_v40 = vld [vmem:[#allocation2] sm:$0xf]  ;;  %v4715_v41 = vld [vmem:[#allocation2 + $0x4] sm:$0xf] }
  0x6f   : > { %4038 = vmatpush3.bf16.msra.mxu0 %v4710_v53  ;;  %3966 = vmatpush3.bf16.msra.mxu1 %v1060_v1  ;;  %v4718_v42 = vld [vmem:[#allocation2 + $0x8] sm:$0x1]  ;;  %vm812_vm10 = vsmask.f32 3328  ;;  %vm813_vm11 = vsmask.f32 7440 }
  0x70   : > { %v816_v43 = vshrl.u32 %v4713_v40, 16  ;;  %v819_v44 = vshll.u32 %v4713_v40, 16  ;;  %v825_v45 = vshll.u32 %v4715_v41, 16  ;;  %v829_v46 = vshrl.u32 %v4715_v41, 16  ;;  %v1770_v47 = vld [vmem:[#allocation2 + $0xc] sm:$0xf]  ;;  %vm4745_vm12 = vmor %vm812_vm10, %vm813_vm11 }
  0x71   : > { %v835_v48 = vshll.u32 %v4718_v42, 16  ;;  %v4725_v49 = vld [vmem:[#allocation2 + $0x10] sm:$0xf]  ;;  %v4727_v50 = vld [vmem:[#allocation2 + $0x14] sm:$0x1]  ;;  %v1795_v59 = vshrl.u32 %v1770_v47, 16 }
  0x72   : > { %v818_v51 = vrot.slane %v816_v43, 4  ;;  %v821_v52 = vrot.slane %v819_v44, 5  ;;  %v827_v54 = vrot.slane %v825_v45, 5  ;;  %v831_v55 = vrot.slane %v829_v46, 4  ;;  %v4732_v56 = vld [vmem:[%s5639_s3 + $0xa] sm:$0x3] }
  0x73   : > { %v837_v58 = vrot.slane %v835_v48, 5  ;;  %v1798_v60 = vshll.u32 %v1770_v47, 16  ;;  %v1804_v61 = vshll.u32 %v4725_v49, 16  ;;  %4263 = vmatprep.subr.msk.bf16.mxu0 %vm1058_vm9, %v4732_v56  ;;  %v1808_v0 = vshrl.u32 %v4725_v49, 16  ;;  %v4739_v3 = vld [vmem:[#allocation2 + $0xc] sm:$0xf] }
  0x74   : > { %v822_v62 = vor.u32 %v821_v52, %v818_v51  ;;  %v832_v63 = vor.u32 %v831_v55, %v827_v54  ;;  %v1814_v2 = vshll.u32 %v4727_v50, 16  ;;  %v4741_v4 = vld [vmem:[#allocation2 + $0x10] sm:$0xf]  ;;  %v1797_v6 = vrot.slane %v1795_v59, 4  ;;  %v803_v9 = vld [vmem:[%s5639_s3] sm:$0x3] }
  0x75   : > { %v1800_v7 = vrot.slane %v1798_v60, 5  ;;  %v1806_v8 = vrot.slane %v1804_v61, 5  ;;  %v1810_v12 = vrot.slane %v1808_v0, 4  ;;  %4258 = vmatprep.subr.msk.bf16.mxu1 %vm1058_vm9, %v803_v9  ;;  %v4753_v15 = vld [vmem:[#allocation2 + $0x14] sm:$0x1]  ;;  %v840_v16 = vshrl.u32 %v4739_v3, 16 }
  0x76   : > { %v823_v10 = vrot.slane %v822_v62, 4  ;;  %v833_v11 = vrot.slane %v832_v63, 4  ;;  %v1816_v14 = vrot.slane %v1814_v2, 5  ;;  %v843_v17 = vshll.u32 %v4739_v3, 16  ;;  %v1773_v26 = vld [vmem:[#allocation2 + $0x18] sm:$0xf] }
  0x77   : > { %v1801_v13 = vor.u32 %v1800_v7, %v1797_v6  ;;  %v1811_v20 = vor.u32 %v1810_v12, %v1806_v8  ;;  %v849_v21 = vshll.u32 %v4741_v4, 16  ;;  %v842_v24 = vrot.slane %v840_v16, 4  ;;  %v4764_v31 = vld [vmem:[#allocation2 + $0x1c] sm:$0xf]  ;;  %v4771_v36 = vld [vmem:[#allocation2 + $0x20] sm:$0x1] }
  0x78   : > { %v828_v18 = vsel %vm4745_vm12, %v823_v10, %v827_v54  ;;  %v838_v19 = vsel %vm4745_vm12, %v833_v11, %v837_v58  ;;  %v845_v25 = vrot.slane %v843_v17, 5  ;;  %v853_v29 = vshrl.u32 %v4741_v4, 16  ;;  %v4782_v59 = vld [vmem:[#allocation2 + $0x18] sm:$0xf]  ;;  %v4785_v0 = vld [vmem:[#allocation2 + $0x1c] sm:$0xf] }
  0x79   : > { %v3688_v22 = vcombine.low %v828_v18, %v838_v19  ;;  %v1802_v23 = vrot.slane %v1801_v13, 4  ;;  %v1812_v27 = vrot.slane %v1811_v20, 4  ;;  %v851_v28 = vrot.slane %v849_v21, 5  ;;  %v4794_v10 = vld [vmem:[#allocation2 + $0x20] sm:$0x1]  ;;  %s4410_s15 = smov 112  }
  0x7a   : > { %v859_v30 = vshll.u32 %v4753_v15, 16  ;;  %v2186_v33 = vrot.slane %v4725_v49, 5  ;;  %v2189_v34 = vrot.slane %v4727_v50, 5  ;;  %v846_v35 = vor.u32 %v845_v25, %v842_v24  ;;  %v1776_v16 = vld [vmem:[#allocation2 + $0x24] sm:$0xf]  ;;  %s4411_s16 = smov 120  }
  0x7b   : > { %3967 = vmatprep.mubr.msk.bf16.mxu1 %vm1033_vm13, %v3688_v22  ;;  %v1807_v32 = vsel %vm4745_vm12, %v1802_v23, %v1806_v8  ;;  %v1817_v37 = vsel %vm4745_vm12, %v1812_v27, %v1816_v14  ;;  %v855_v57 = vrot.slane %v853_v29, 4  ;;  %v1819_v39 = vshrl.u32 %v1773_v26, 16  ;;  %v4803_v23 = vld [vmem:[#allocation2 + $0x28] sm:$0xf]  ;;  %v4808_v27 = vld [vmem:[#allocation2 + $0x2c] sm:$0x1] }
  0x7c   : > { %v861_v38 = vrot.slane %v859_v30, 5  ;;  %v3763_v1 = vcombine.low %v1807_v32, %v1817_v37  ;;  %v847_v43 = vrot.slane %v846_v35, 4  ;;  %v1822_v44 = vshll.u32 %v1773_v26, 16  ;;  %v4812_v37 = vld [vmem:[#allocation2 + $0x24] sm:$0xf] }
  0x7d   : > { %v1828_v45 = vshll.u32 %v4764_v31, 16  ;;  %v856_v46 = vor.u32 %v855_v57, %v851_v28  ;;  %v1821_v47 = vrot.slane %v1819_v39, 4  ;;  %v1832_v48 = vshrl.u32 %v4764_v31, 16  ;;  %v5443_v5 = vld [vmem:[%s5640_s4] ss:$0 sm:$0xff] }
  0x7e   : > { %v1838_v51 = vshll.u32 %v4771_v36, 16  ;;  %4039 = vmatprep.mubr.msk.bf16.mxu0 %vm1033_vm13, %v3763_v1  ;;  %v852_v52 = vsel %vm4745_vm12, %v847_v43, %v851_v28  ;;  %v1824_v54 = vrot.slane %v1822_v44, 5  ;;  %v2193_v58 = vrot.slane %v4764_v31, 5  ;;  %v4815_v43 = vld [vmem:[#allocation2 + $0x28] sm:$0xf] }
  0x7f   : > { %v1830_v55 = vrot.slane %v1828_v45, 5  ;;  %v857_v60 = vrot.slane %v856_v46, 4  ;;  %v1834_v61 = vrot.slane %v1832_v48, 4  ;;  %v2196_v63 = vrot.slane %v4771_v36, 5  ;;  %v4822_v48 = vld [vmem:[%s5639_s3 + $0xc] sm:$0x3] }
  0x80   : > { %v1840_v62 = vrot.slane %v1838_v51, 5  ;;  %v1825_v2 = vor.u32 %v1824_v54, %v1821_v47  ;;  %v4789_v6 = vrot.slane %v2193_v58, 4  ;;  %v2291_v7 = vsel %vm1058_vm9, %v4732_v56, 0  ;;  %v4934_v31 = vld [vmem:[#allocation2 + $0x58] sm:$0xf] }
  0x81   : > { %v1224_v8 = vsel %vm1058_vm9, %v803_v9, 0  ;;  %v862_v11 = vsel %vm4745_vm12, %v857_v60, %v861_v38  ;;  %v1835_v12 = vor.u32 %v1834_v61, %v1830_v55  ;;  %v864_v13 = vshrl.u32 %v4782_v59, 16 }
  0x82   : > { %v867_v14 = vshll.u32 %v4782_v59, 16  ;;  %v3689_v17 = vcombine.low %v852_v52, %v862_v11  ;;  %v1826_v18 = vrot.slane %v1825_v2, 4  ;;  %v873_v19 = vshll.u32 %v4785_v0, 16  ;;  %v1779_v11 = vld [vmem:[#allocation2 + $0x30] sm:$0xf] }
  0x83   : > { %v877_v20 = vshrl.u32 %v4785_v0, 16  ;;  %v1836_v56 = vrot.slane %v1835_v12, 4  ;;  %v866_v21 = vrot.slane %v864_v13, 4  ;;  %v883_v22 = vshll.u32 %v4794_v10, 16 }
  0x84   : > { %v869_v9 = vrot.slane %v867_v14, 5  ;;  %3968 = vmatmul.mubr.msk.bf16.vlgmr.msra.gmra.mrb[0].mxu1 %vm1033_vm13, %v3689_v17  ;;  %v1831_v24 = vsel %vm4745_vm12, %v1826_v18, %v1830_v55  ;;  %v875_v25 = vrot.slane %v873_v19, 5  ;;  %v1843_v28 = vshrl.u32 %v1776_v16, 16 }
  0x85   : > { %v879_v26 = vrot.slane %v877_v20, 4  ;;  %v1841_v29 = vsel %vm4745_vm12, %v1836_v56, %v1840_v62  ;;  %3984 = vmatpush3.bf16.msra.mxu1 %v1224_v8  ;;  %v885_v32 = vrot.slane %v883_v22, 5  ;;  %v1846_v35 = vshll.u32 %v1776_v16, 16  ;;  %v4829_v8 = vld [vmem:[#allocation2 + $0x2c] sm:$0x1] }
  0x86   : > { %v870_v30 = vor.u32 %v869_v9, %v866_v21  ;;  %v3764_v57 = vcombine.low %v1831_v24, %v1841_v29  ;;  %v1845_v39 = vrot.slane %v1843_v28, 4  ;;  %v1852_v1 = vshll.u32 %v4803_v23, 16  ;;  %v4837_v20 = vld [vmem:[#allocation2 + $0x34] sm:$0xf]  ;;  %v4843_v28 = vld [vmem:[#allocation2 + $0x38] sm:$0x1] }
  0x87   : > { %v880_v38 = vor.u32 %v879_v26, %v875_v25  ;;  %v1848_v45 = vrot.slane %v1846_v35, 5  ;;  %v1856_v46 = vshrl.u32 %v4803_v23, 16  ;;  %v1862_v47 = vshll.u32 %v4808_v27, 16 }
  0x88   : > { %v871_v44 = vrot.slane %v870_v30, 4  ;;  %4040 = vmatmul.mubr.msk.bf16.vlgmr.msra.gmra.mrb[0].mxu0 %vm1033_vm13, %v3764_v57  ;;  %v1854_v52 = vrot.slane %v1852_v1, 5  ;;  %v888_v54 = vshrl.u32 %v4812_v37, 16  ;;  %v891_v55 = vshll.u32 %v4812_v37, 16 }
  0x89   : > { %v881_v51 = vrot.slane %v880_v38, 4  ;;  %4056 = vmatpush3.bf16.msra.mxu0 %v2291_v7  ;;  %v1849_v61 = vor.u32 %v1848_v45, %v1845_v39  ;;  %v1858_v62 = vrot.slane %v1856_v46, 4  ;;  %v1864_v2 = vrot.slane %v1862_v47, 5  ;;  %v4846_v38 = vld [vmem:[#allocation2 + $0x30] sm:$0xf] }
  0x8a   : > { %v876_v60 = vsel %vm4745_vm12, %v871_v44, %v875_v25  ;;  %v890_v13 = vrot.slane %v888_v54, 4  ;;  %v893_v14 = vrot.slane %v891_v55, 5  ;;  %v897_v16 = vshll.u32 %v4815_v43, 16  ;;  %4264 = vmatprep.subr.msk.bf16.mxu0 %vm1058_vm9, %v4822_v48  ;;  %v4851_v46 = vld [vmem:[#allocation2 + $0x34] sm:$0xf] }
  0x8b   : > { %v886_v12 = vsel %vm4745_vm12, %v881_v51, %v885_v32  ;;  %v1850_v17 = vrot.slane %v1849_v61, 4  ;;  %v1859_v18 = vor.u32 %v1858_v62, %v1854_v52  ;;  %v901_v19 = vshrl.u32 %v4815_v43, 16  ;;  %v4859_v55 = vld [vmem:[%s5639_s3 + $0x4] sm:$0x3] }
  0x8c   : > { %v3690_v7 = vcombine.low %v876_v60, %v886_v12  ;;  %v894_v56 = vor.u32 %v893_v14, %v890_v13  ;;  %v899_v21 = vrot.slane %v897_v16, 5  ;;  %v907_v9 = vshll.u32 %v4829_v8, 16  ;;  %4259 = vmatprep.subr.msk.bf16.mxu1 %vm1058_vm9, %v4859_v55  ;;  %v4865_v12 = vld [vmem:[#allocation2 + $0x38] sm:$0x1] }
  0x8d   : > { %v1867_v22 = vshrl.u32 %v1779_v11, 16  ;;  %v1855_v24 = vsel %vm4745_vm12, %v1850_v17, %v1854_v52  ;;  %v1860_v25 = vrot.slane %v1859_v18, 4  ;;  %v903_v26 = vrot.slane %v901_v19, 4 }
  0x8e   : > { %3971 = vmatprep.mubr.msk.bf16.mxu1 %vm1033_vm13, %v3690_v7  ;;  %v1870_v29 = vshll.u32 %v1779_v11, 16  ;;  %v895_v30 = vrot.slane %v894_v56, 4  ;;  %v909_v32 = vrot.slane %v907_v9, 5  ;;  %v1876_v57 = vshll.u32 %v4837_v20, 16  ;;  %v2152_v56 = vld [vmem:[#allocation2 + $0xc] sm:$0xe] }
  0x8f   : > { %v1869_v35 = vrot.slane %v1867_v22, 4  ;;  %v1865_v39 = vsel %vm4745_vm12, %v1860_v25, %v1864_v2  ;;  %v904_v1 = vor.u32 %v903_v26, %v899_v21  ;;  %v1880_v45 = vshrl.u32 %v4837_v20, 16  ;;  %v4872_v25 = vld [vmem:[#allocation2 + $0x3c] sm:$0xf] }
  0x90   : > { %v1872_v44 = vrot.slane %v1870_v29, 5  ;;  %v3765_v47 = vcombine.low %v1855_v24, %v1865_v39  ;;  %v900_v51 = vsel %vm4745_vm12, %v895_v30, %v899_v21  ;;  %v1878_v52 = vrot.slane %v1876_v57, 5  ;;  %v4878_v39 = vld [vmem:[#allocation2 + $0x40] sm:$0xf] }
  0x91   : > { %v1886_v54 = vshll.u32 %v4843_v28, 16  ;;  %v905_v60 = vrot.slane %v904_v1, 4  ;;  %v1882_v62 = vrot.slane %v1880_v45, 4  ;;  %v912_v2 = vshrl.u32 %v4846_v38, 16  ;;  %v4880_v1 = vld [vmem:[#allocation2 + $0x44] sm:$0x1] }
  0x92   : > { %v1873_v61 = vor.u32 %v1872_v44, %v1869_v35  ;;  %4043 = vmatprep.mubr.msk.bf16.mxu0 %vm1033_vm13, %v3765_v47  ;;  %v915_v13 = vshll.u32 %v4846_v38, 16  ;;  %v921_v14 = vshll.u32 %v4851_v46, 16  ;;  %v925_v16 = vshrl.u32 %v4851_v46, 16 }
  0x93   : > { %v1888_v11 = vrot.slane %v1886_v54, 5  ;;  %v910_v7 = vsel %vm4745_vm12, %v905_v60, %v909_v32  ;;  %v1883_v18 = vor.u32 %v1882_v62, %v1878_v52  ;;  %v914_v19 = vrot.slane %v912_v2, 4  ;;  %v2153_v54 = vld [vmem:[#allocation2 + $0x18] sm:$0xe] }
  0x94   : > { %v1874_v17 = vrot.slane %v1873_v61, 4  ;;  %v3691_v21 = vcombine.low %v900_v51, %v910_v7  ;;  %v917_v9 = vrot.slane %v915_v13, 5  ;;  %v923_v22 = vrot.slane %v921_v14, 5 }
  0x95   : > { %v927_v24 = vrot.slane %v925_v16, 4  ;;  %v1884_v29 = vrot.slane %v1883_v18, 4  ;;  %v931_v30 = vshll.u32 %v4865_v12, 16  ;;  %vm1347_vm14 = vcmask 1042432  }
  0x96   : > { %v1879_v26 = vsel %vm4745_vm12, %v1874_v17, %v1878_v52  ;;  %3972 = vmatmul.mubr.msk.bf16.gmra.mrb[4].mxu1 %vm1033_vm13, %v3691_v21  ;;  %v918_v32 = vor.u32 %v917_v9, %v914_v19  ;;  %vm1348_vm15 = vcmask 1046532   ;;  %v3779_v57 = vrot.slane %v2152_v56, 9  ;;  %v4903_v17 = vld [vmem:[#allocation2 + $0x4c] sm:$0xf]  ;;  %v4912_v9 = vld [vmem:[#allocation2 + $0x50] sm:$0x1] }
  0x97   : > { %v928_v35 = vor.u32 %v927_v24, %v923_v22  ;;  %v1889_v44 = vsel %vm4745_vm12, %v1884_v29, %v1888_v11  ;;  %v933_v45 = vrot.slane %v931_v30, 5  ;;  %vm4884_vm0 = vmor %vm1347_vm14, %vm1348_vm15  ;;  %v2188_v51 = vrot.slane %v2186_v33, 4  ;;  %v4895_v11 = vld [vmem:[#allocation2 + $0x48] sm:$0xf] }
  0x98   : > { %v936_v52 = vshrl.u32 %v4872_v25, 16  ;;  %v3766_v60 = vcombine.low %v1879_v26, %v1889_v44  ;;  %v919_v61 = vrot.slane %v918_v32, 4  ;;  %v2187_v2 = vsel %vm4884_vm0, %v3779_v57, %v2186_v33 }
  0x99   : > { %v929_v62 = vrot.slane %v928_v35, 4  ;;  %v2190_v13 = vsel %vm4884_vm0, %v2188_v51, %v2189_v34  ;;  %v939_v16 = vshll.u32 %v4872_v25, 16  ;;  %v945_v7 = vshll.u32 %v4878_v39, 16 }
  0x9a   : > { %v938_v14 = vrot.slane %v936_v52, 4  ;;  %4044 = vmatmul.mubr.msk.bf16.gmra.mrb[4].mxu0 %vm1033_vm13, %v3766_v60  ;;  %v924_v49 = vsel %vm4745_vm12, %v919_v61, %v923_v22  ;;  %v3788_v18 = vcombine.low %v2187_v2, %v2190_v13  ;;  %v949_v50 = vshrl.u32 %v4878_v39, 16  ;;  %v4931_v60 = vld [vmem:[#allocation2 + $0x54] sm:$0xf] }
  0x9b   : > { %v934_v33 = vsel %vm4745_vm12, %v929_v62, %v933_v45  ;;  %v941_v34 = vrot.slane %v939_v16, 5  ;;  %v947_v56 = vrot.slane %v945_v7, 5  ;;  %v955_v21 = vshll.u32 %v4880_v1, 16 }
  0x9c   : > { %v3692_v19 = vcombine.low %v924_v49, %v934_v33  ;;  %4057 = vmatprep.mubr.msk.bf16.mxu0 %vm1033_vm13, %v3788_v18  ;;  %v951_v24 = vrot.slane %v949_v50, 4  ;;  %v3780_v26 = vrot.slane %v2153_v54, 9  ;;  %v2197_v22 = vsel %vm4884_vm0, %v4789_v6, %v2196_v63  ;;  %v2154_v6 = vld [vmem:[#allocation2 + $0x24] sm:$0xe]  ;;  %v4942_v49 = vld [vmem:[%s5639_s3 + $0xe] sm:$0x3] }
  0x9d   : > { %v2490_v29 = vsel %vm1058_vm9, %v4822_v48, 0  ;;  %v942_v30 = vor.u32 %v941_v34, %v938_v14  ;;  %v957_v32 = vrot.slane %v955_v21, 5  ;;  %v960_v35 = vshrl.u32 %v4895_v11, 16  ;;  %v4948_v34 = vld [vmem:[#allocation2 + $0x5c] sm:$0x1] }
  0x9e   : > { %3975 = vmatprep.mubr.msk.bf16.mxu1 %vm1033_vm13, %v3692_v19  ;;  %v963_v57 = vshll.u32 %v4895_v11, 16  ;;  %v952_v44 = vor.u32 %v951_v24, %v947_v56  ;;  %v2194_v36 = vsel %vm4884_vm0, %v3780_v26, %v2193_v58  ;;  %v969_v45 = vshll.u32 %v4903_v17, 16  ;;  %v2155_v26 = vld [vmem:[#allocation2 + $0x30] sm:$0xe] }
  0x9f   : > { %v973_v63 = vshrl.u32 %v4903_v17, 16  ;;  %v943_v48 = vrot.slane %v942_v30, 4  ;;  %v3789_v51 = vcombine.low %v2194_v36, %v2197_v22  ;;  %v962_v52 = vrot.slane %v960_v35, 4 }
  0xa0   : > { %v965_v54 = vrot.slane %v963_v57, 5  ;;  %v953_v61 = vrot.slane %v952_v44, 4  ;;  %v971_v62 = vrot.slane %v969_v45, 5  ;;  %v979_v13 = vshll.u32 %v4912_v9, 16  ;;  %v4955_v57 = vld [vmem:[#allocation2 + $0x40] sm:$0xf] }
  0xa1   : > { %v975_v2 = vrot.slane %v973_v63, 4  ;;  %v948_v58 = vsel %vm4745_vm12, %v943_v48, %v947_v56  ;;  %v3781_v16 = vrot.slane %v2154_v6, 9  ;;  %v2200_v7 = vrot.slane %v4803_v23, 5 }
  0xa2   : > { %v966_v14 = vor.u32 %v965_v54, %v962_v52  ;;  %v958_v33 = vsel %vm4745_vm12, %v953_v61, %v957_v32  ;;  %4058 = vmatmul.mubr.msk.bf16.vlgmr.msra.gmra.mrb[0].mxu0 %vm1033_vm13, %v3789_v51  ;;  %v981_v50 = vrot.slane %v979_v13, 5  ;;  %v2203_v19 = vrot.slane %v4808_v27, 5  ;;  %v4968_v51 = vld [vmem:[#allocation2 + $0x44] sm:$0x1]  ;;  %v2156_v52 = vld [vmem:[#allocation2 + $0x3c] sm:$0xe] }
  0xa3   : > { %v976_v18 = vor.u32 %v975_v2, %v971_v62  ;;  %v3693_v56 = vcombine.low %v948_v58, %v958_v33  ;;  %4074 = vmatpush3.bf16.msra.mxu0 %v2490_v29  ;;  %v2201_v23 = vsel %vm4884_vm0, %v3781_v16, %v2200_v7  ;;  %v2202_v24 = vrot.slane %v2200_v7, 4 }
  0xa4   : > { %v967_v21 = vrot.slane %v966_v14, 4  ;;  %v984_v30 = vshrl.u32 %v4931_v60, 16  ;;  %v987_v32 = vshll.u32 %v4931_v60, 16  ;;  %v993_v35 = vshll.u32 %v4934_v31, 16  ;;  %4265 = vmatprep.subr.msk.bf16.mxu0 %vm1058_vm9, %v4942_v49 }
  0xa5   : > { %v977_v22 = vrot.slane %v976_v18, 4  ;;  %3976 = vmatmul.mubr.msk.bf16.gmra.mrb[8].mxu1 %vm1033_vm13, %v3693_v56  ;;  %v2204_v29 = vsel %vm4884_vm0, %v2202_v24, %v2203_v19  ;;  %v997_v44 = vshrl.u32 %v4934_v31, 16  ;;  %v1003_v36 = vshll.u32 %v4948_v34, 16 }
  0xa6   : > { %v972_v27 = vsel %vm4745_vm12, %v967_v21, %v971_v62  ;;  %v3790_v63 = vcombine.low %v2201_v23, %v2204_v29  ;;  %v986_v6 = vrot.slane %v984_v30, 4  ;;  %v989_v48 = vrot.slane %v987_v32, 5  ;;  %v4986_v30 = vld [vmem:[#allocation2 + $0x50] sm:$0x1]  ;;  %v2157_v32 = vld [vmem:[#allocation2 + $0x48] sm:$0xe] }
  0xa7   : > { %v982_v45 = vsel %vm4745_vm12, %v977_v22, %v981_v50  ;;  %v995_v61 = vrot.slane %v993_v35, 5  ;;  %v999_v2 = vrot.slane %v997_v44, 4  ;;  %v1005_v62 = vrot.slane %v1003_v36, 5  ;;  %v4984_v22 = vld [vmem:[#allocation2 + $0x4c] sm:$0xf] }
  0xa8   : > { %v3694_v54 = vcombine.low %v972_v27, %v982_v45  ;;  %4061 = vmatprep.mubr.msk.bf16.mxu0 %vm1033_vm13, %v3790_v63  ;;  %v990_v13 = vor.u32 %v989_v48, %v986_v6  ;;  %v3782_v58 = vrot.slane %v2155_v26, 9  ;;  %v2207_v14 = vrot.slane %v4837_v20, 5  ;;  %v4994_v36 = vld [vmem:[#allocation2 + $0x58] sm:$0xf]  ;;  %v2158_v45 = vld [vmem:[#allocation2 + $0x54] sm:$0xe] }
  0xa9   : > { %v2210_v16 = vrot.slane %v4843_v28, 5  ;;  %v1000_v7 = vor.u32 %v999_v2, %v995_v61  ;;  %v3783_v33 = vrot.slane %v2156_v52, 9  ;;  %v2214_v18 = vrot.slane %v4955_v57, 5  ;;  %v4996_v48 = vld [vmem:[#allocation2 + $0x5c] sm:$0x1] }
  0xaa   : > { %3979 = vmatprep.mubr.msk.bf16.mxu1 %vm1033_vm13, %v3694_v54  ;;  %v2217_v50 = vrot.slane %v4968_v51, 5  ;;  %v991_v19 = vrot.slane %v990_v13, 4  ;;  %v2208_v56 = vsel %vm4884_vm0, %v3782_v58, %v2207_v14  ;;  %v2209_v21 = vrot.slane %v2207_v14, 4  ;;  %5659 = vst [vmem:[#allocation3_spill] sm:$0xff] %v4996_v48  ;;  %v5001_v2 = vld [vmem:[#allocation2 + $0x64] sm:$0xf] }
  0xab   : > { %v1001_v23 = vrot.slane %v1000_v7, 4  ;;  %v2215_v24 = vsel %vm4884_vm0, %v3783_v33, %v2214_v18  ;;  %v2216_v20 = vrot.slane %v2214_v18, 4  ;;  %v3704_v29 = vcombine.low %v4713_v40, %v4715_v41  ;;  %5660 = vst [vmem:[#allocation4_spill] sm:$0xff] %v5001_v2  ;;  %v5006_v13 = vld [vmem:[#allocation2 + $0x68] sm:$0x1] }
  0xac   : > { %v996_v28 = vsel %vm4745_vm12, %v991_v19, %v995_v61  ;;  %v2211_v26 = vsel %vm4884_vm0, %v2209_v21, %v2210_v16  ;;  %v3784_v52 = vrot.slane %v2157_v32, 9  ;;  %v2221_v54 = vrot.slane %v4984_v22, 5  ;;  %5661 = vst [vmem:[#allocation5_spill] sm:$0xff] %v5006_v13  ;;  %v2159_v58 = vld [vmem:[#allocation2 + $0x60] sm:$0xe] }
  0xad   : > { %v1006_v35 = vsel %vm4745_vm12, %v1001_v23, %v1005_v62  ;;  %v3791_v27 = vcombine.low %v2208_v56, %v2211_v26  ;;  %v2218_v44 = vsel %vm4884_vm0, %v2216_v20, %v2217_v50  ;;  %v2224_v61 = vrot.slane %v4986_v30, 5  ;;  %v1324_v23 = vld [vmem:[#allocation2 + $0xc] sm:$0xe] }
  0xae   : > { %v3695_v63 = vcombine.low %v996_v28, %v1006_v35  ;;  %v3792_v6 = vcombine.low %v2215_v24, %v2218_v44  ;;  %v3785_v40 = vrot.slane %v2158_v45, 9  ;;  %v2228_v62 = vrot.slane %v4994_v36, 5  ;;  %v1325_v24 = vld [vmem:[#allocation2 + $0x18] sm:$0xe]  ;;  %v1326_v45 = vld [vmem:[#allocation2 + $0x24] sm:$0xe] }
  0xaf   : > { %4062 = vmatmul.mubr.msk.bf16.gmra.mrb[4].mxu0 %vm1033_vm13, %v3791_v27  ;;  %v2222_v14 = vsel %vm4884_vm0, %v3784_v52, %v2221_v54  ;;  %v2223_v16 = vrot.slane %v2221_v54, 4  ;;  %v2231_v7 = vrot.slane %v4996_v48, 5  ;;  %v1359_v50 = vrot.slane %v4741_v4, 5  ;;  %v1327_v54 = vld [vmem:[#allocation2 + $0x30] sm:$0xe] }
  0xb0   : > { %3980 = vmatmul.mubr.msk.bf16.gmra.mrb[12].mxu1 %vm1033_vm13, %v3695_v63  ;;  %4065 = vmatprep.mubr.msk.bf16.mxu0 %vm1033_vm13, %v3792_v6  ;;  %v2229_v33 = vsel %vm4884_vm0, %v3785_v40, %v2228_v62  ;;  %v2230_v18 = vrot.slane %v2228_v62, 4  ;;  %v3705_v19 = vcombine.low %v4739_v3, %v4741_v4  ;;  %v2235_v21 = vrot.slane %v5001_v2, 5  ;;  %v5032_v6 = vld [vmem:[%s5639_s3 + $0x6] sm:$0x3]  ;;  %v5274_v48 = vld [vmem:[#allocation2 + $0x70] sm:$0xf] }
  0xb1   : > { %3985 = vmatprep.mubr.msk.bf16.mxu1 %vm1033_vm13, %v3704_v29  ;;  %v2225_v56 = vsel %vm4884_vm0, %v2223_v16, %v2224_v61  ;;  %v3786_v26 = vrot.slane %v2159_v58, 9  ;;  %v2238_v32 = vrot.slane %v5006_v13, 5  ;;  %v1362_v35 = vrot.slane %v4753_v15, 5 }
  0xb2   : > { %v3793_v20 = vcombine.low %v2222_v14, %v2225_v56  ;;  %v2232_v28 = vsel %vm4884_vm0, %v2230_v18, %v2231_v7  ;;  %v3706_v27 = vcombine.low %v4782_v59, %v4785_v0  ;;  %v2237_v4 = vrot.slane %v2235_v21, 4 }
  0xb3   : > { %v3794_v3 = vcombine.low %v2229_v33, %v2232_v28  ;;  %v1457_v29 = vsel %vm1058_vm9, %v4859_v55, 0  ;;  %v3721_v44 = vrot.slane %v1324_v23, 9  ;;  %v1361_v63 = vrot.slane %v1359_v50, 4  ;;  %v1328_v28 = vld [vmem:[#allocation2 + $0x3c] sm:$0xe] }
  0xb4   : > { %v3722_v52 = vrot.slane %v1325_v24, 9  ;;  %v2236_v15 = vsel %vm4884_vm0, %v3786_v26, %v2235_v21  ;;  %v2239_v59 = vsel %vm4884_vm0, %v2237_v4, %v2238_v32  ;;  %v1366_v40 = vrot.slane %v4785_v0, 5 }
  0xb5   : > { %v5042_v55 = vsel %vm4884_vm0, %v3721_v44, %v1359_v50  ;;  %v5047_v61 = vsel %vm4884_vm0, %v1361_v63, %v1362_v35  ;;  %v1369_v62 = vrot.slane %v4794_v10, 5  ;;  %v3723_v58 = vrot.slane %v1326_v45, 9  ;;  %v4318_v63 = vld [vmem:[#allocation2 + $0x24] sm:$0xff]  }
  0xb6   : > { %v3707_v14 = vcombine.low %v4812_v37, %v4815_v43  ;;  %v1373_v7 = vrot.slane %v4815_v43, 5  ;;  %v1376_v33 = vrot.slane %v4829_v8, 5  ;;  %v3795_v18 = vcombine.low %v2236_v15, %v2239_v59  ;;  %v1323_v8 = vld [vmem:[#allocation2] sm:$0xe] }
  0xb7   : > { %4066 = vmatmul.mubr.msk.bf16.gmra.mrb[8].mxu0 %vm1033_vm13, %v3793_v20  ;;  %v5061_v0 = vsel %vm4884_vm0, %v3722_v52, %v1366_v40  ;;  %v1368_v10 = vrot.slane %v1366_v40, 4  ;;  %v3724_v50 = vrot.slane %v1327_v54, 9  ;;  %v1380_v21 = vrot.slane %v4851_v46, 5  ;;  %v2605_v52 = vld [vmem:[#allocation2 + $0x18] sm:$0xf] }
  0xb8   : > { %3986 = vmatmul.mubr.msk.bf16.vlgmr.msra.gmra.mrb[0].mxu1 %vm1033_vm13, %v3705_v19  ;;  %4069 = vmatprep.mubr.msk.bf16.mxu0 %vm1033_vm13, %v3794_v3  ;;  %v4316_v19 = vld [vmem:[#allocation2 + $0x18] sm:$0xff]   ;;  %v5065_v37 = vsel %vm4884_vm0, %v3723_v58, %v1373_v7  ;;  %v1375_v56 = vrot.slane %v1373_v7, 4  ;;  %v1383_v23 = vrot.slane %v4865_v12, 5  ;;  %v3708_v43 = vcombine.low %v4846_v38, %v4851_v46 }
  0xb9   : > { %4002 = vmatpush3.bf16.msra.mxu1 %v1457_v29  ;;  %3989 = vmatprep.mubr.msk.bf16.mxu1 %vm1033_vm13, %v3706_v27  ;;  %v1352_v24 = vrot.slane %v4715_v41, 5  ;;  %v5074_v20 = vsel %vm4884_vm0, %v1368_v10, %v1369_v62  ;;  %v5084_v12 = vsel %vm4884_vm0, %v3724_v50, %v1380_v21  ;;  %v1382_v38 = vrot.slane %v1380_v21, 4  ;;  %v5107_v40 = vld [vmem:[#allocation2 + $0x1c] sm:$0xf]  ;;  %v1329_v62 = vld [vmem:[#allocation2 + $0x48] sm:$0xe] }
  0xba   : > { %4260 = vmatprep.subr.msk.bf16.mxu1 %vm1058_vm9, %v5032_v6  ;;  %v5080_v32 = vsel %vm4884_vm0, %v1375_v56, %v1376_v33  ;;  %v3725_v35 = vrot.slane %v1328_v28, 9  ;;  %v3720_v27 = vrot.slane %v1323_v8, 9  ;;  %v1387_v4 = vrot.slane %v4878_v39, 5  ;;  %v5129_v10 = vld [vmem:[%s5639_s3 + $0x10] sm:$0x3] }
  0xbb   : > { %v5093_v46 = vsel %vm4884_vm0, %v1382_v38, %v1383_v23  ;;  %v1390_v29 = vrot.slane %v4880_v1, 5  ;;  %v1355_v44 = vrot.slane %v4718_v42, 5  ;;  %v1354_v45 = vrot.slane %v1352_v24, 4  ;;  %v4320_v1 = vld [vmem:[#allocation2 + $0x30] sm:$0xff]   ;;  %v2608_v21 = vld [vmem:[#allocation2 + $0x24] sm:$0xf] }
  0xbc   : > { %v5103_v15 = vsel %vm4884_vm0, %v3725_v35, %v1387_v4  ;;  %v1389_v59 = vrot.slane %v1387_v4, 4  ;;  %v3709_v54 = vcombine.low %v4872_v25, %v4878_v39  ;;  %v2872_v58 = vsel %vm1058_vm9, %v4942_v49, 0  ;;  %v5136_v23 = vld [vmem:[#allocation2 + $0x28] sm:$0xf]  ;;  %v1330_v35 = vld [vmem:[#allocation2 + $0x54] sm:$0xe] }
  0xbd   : > { %v3710_v42 = vcombine.low %v4895_v11, %v4903_v17  ;;  %v1356_v25 = vsel %vm4884_vm0, %v1354_v45, %v1355_v44  ;;  %v2630_v39 = vshrl.u32 %v2605_v52, 16  ;;  %v2633_v33 = vshll.u32 %v2605_v52, 16  ;;  %v4323_v52 = vld [vmem:[#allocation2 + $0x48] sm:$0xff]  }
  0xbe   : > { %v5117_v7 = vsel %vm4884_vm0, %v1389_v59, %v1390_v29  ;;  %v2639_v11 = vshll.u32 %v5107_v40, 16  ;;  %v2643_v49 = vshrl.u32 %v5107_v40, 16  ;;  %v3726_v50 = vrot.slane %v1329_v62, 9 }
  0xbf   : > { %4070 = vmatmul.mubr.msk.bf16.gmra.mrb[12].mxu0 %vm1033_vm13, %v3795_v18  ;;  %v1397_v56 = vrot.slane %v4912_v9, 5  ;;  %v2632_v38 = vrot.slane %v2630_v39, 4  ;;  %v2611_v9 = vld [vmem:[#allocation2 + $0x30] sm:$0xf]  ;;  %v2635_v4 = vrot.slane %v2633_v33, 5  ;;  %v2654_v59 = vshrl.u32 %v2608_v21, 16 }
  0xc0   : > { %3990 = vmatmul.mubr.msk.bf16.gmra.mrb[4].mxu1 %vm1033_vm13, %v3707_v14  ;;  %4075 = vmatprep.mubr.msk.bf16.mxu0 %vm1033_vm13, %v4316_v19  ;;  %v1353_v14 = vsel %vm4884_vm0, %v3720_v27, %v1352_v24  ;;  %v1394_v19 = vrot.slane %v4903_v17, 5  ;;  %v1924_v24 = vshll.u32 %v4984_v22, 16  ;;  %v3711_v17 = vcombine.low %v4931_v60, %v4934_v31  ;;  %v4322_v27 = vld [vmem:[#allocation2 + $0x3c] sm:$0xff]   ;;  %v2617_v18 = vld [vmem:[#allocation2 + $0x48] sm:$0xf] }
  0xc1   : > { %3993 = vmatprep.mubr.msk.bf16.mxu1 %vm1033_vm13, %v3708_v43  ;;  %v3729_v28 = vcombine.low %v1353_v14, %v1356_v25  ;;  %v5147_v29 = vrot.slane %v2639_v11, 5  ;;  %v2645_v44 = vrot.slane %v2643_v49, 4  ;;  %v5155_v60 = vld [vmem:[#allocation2 + $0x20] sm:$0x1]  ;;  %v2663_v62 = vshll.u32 %v5136_v23, 16 }
  0xc2   : > { %v5140_v43 = vsel %vm4884_vm0, %v3726_v50, %v1394_v19  ;;  %v1396_v8 = vrot.slane %v1394_v19, 4  ;;  %v2681_v14 = vshll.u32 %v2611_v9, 16  ;;  %v3727_v25 = vrot.slane %v1330_v35, 9  ;;  %v5176_v35 = vld [vmem:[#allocation2 + $0x2c] sm:$0x1] }
  0xc3   : > { %v1401_v11 = vrot.slane %v4934_v31, 5  ;;  %v1404_v49 = vrot.slane %v4948_v34, 5  ;;  %v1928_v50 = vshrl.u32 %v4984_v22, 16  ;;  %v2636_v19 = vor.u32 %v2635_v4, %v2632_v38  ;;  %v4324_v22 = vld [vmem:[#allocation2 + $0x54] sm:$0xff]  }
  0xc4   : > { %v5151_v45 = vsel %vm4884_vm0, %v1396_v8, %v1397_v56  ;;  %v2646_v56 = vor.u32 %v2645_v44, %v5147_v29  ;;  %v2656_v8 = vrot.slane %v2654_v59, 4  ;;  %v5178_v38 = vrot.slane %v2663_v62, 5  ;;  %v5182_v59 = vld [vmem:[#allocation2 + $0x38] sm:$0x1] }
  0xc5   : > { %v5173_v31 = vsel %vm4884_vm0, %v3727_v25, %v1401_v11  ;;  %v1403_v34 = vrot.slane %v1401_v11, 4  ;;  %v2683_v44 = vrot.slane %v2681_v14, 5  ;;  %vm3408_vm1 = vcmask 64512  }
  0xc6   : > { %v2647_v14 = vrot.slane %v2646_v56, 4 }
  0xc7   : > { %4076 = vmatmul.mubr.msk.bf16.vlgmr.msra.gmra.mrb[0].mxu0 %vm1033_vm13, %v4318_v63  ;;  %v5153_v63 = vld [vmem:[#allocation2 + $0x34] sm:$0xf]  ;;  %v5188_v11 = vsel %vm4884_vm0, %v1403_v34, %v1404_v49  ;;  %v5201_v34 = vld [vmem:[#allocation2 + $0x4c] sm:$0xf] }
  0xc8   : > { %3994 = vmatmul.mubr.msk.bf16.gmra.mrb[8].mxu1 %vm1033_vm13, %v3709_v54  ;;  %4092 = vmatpush3.bf16.msra.mxu0 %v2872_v58  ;;  %v2657_v54 = vshll.u32 %v2608_v21, 16  ;;  %v2687_v39 = vshll.u32 %v5153_v63, 16  ;;  %v2691_v33 = vshrl.u32 %v5153_v63, 16  ;;  %v2649_v21 = vshll.u32 %v5155_v60, 16 }
  0xc9   : > { %3997 = vmatprep.mubr.msk.bf16.mxu1 %vm1033_vm13, %v3710_v42  ;;  %4079 = vmatprep.mubr.msk.bf16.mxu0 %vm1033_vm13, %v4320_v1  ;;  %v2667_v42 = vshrl.u32 %v5136_v23, 16  ;;  %v2678_v1 = vshrl.u32 %v2611_v9, 16  ;;  %v2637_v58 = vrot.slane %v2636_v19, 4  ;;  %v2697_v19 = vshll.u32 %v5182_v59, 16 }
  0xca   : > { %4266 = vmatprep.subr.msk.bf16.mxu0 %vm1058_vm9, %v5129_v10  ;;  %v2659_v9 = vrot.slane %v2657_v54, 5  ;;  %v5184_v54 = vrot.slane %v2687_v39, 5  ;;  %v2693_v25 = vrot.slane %v2691_v33, 4  ;;  %v2651_v39 = vrot.slane %v2649_v21, 5 }
  0xcb   : > { %v2680_v4 = vrot.slane %v2678_v1, 4  ;;  %v5194_v1 = vld [vmem:[#allocation2 + $0x40] sm:$0xf]  ;;  %v2673_v33 = vshll.u32 %v5176_v35, 16  ;;  %v2726_v21 = vshrl.u32 %v2617_v18, 16 }
  0xcc   : > { %v2660_v3 = vor.u32 %v2659_v9, %v2656_v8  ;;  %v2694_v62 = vor.u32 %v2693_v25, %v5184_v54  ;;  %v2711_v16 = vshll.u32 %v5194_v1, 16  ;;  %v2715_v56 = vshrl.u32 %v5194_v1, 16 }
  0xcd   : > { %v2729_v8 = vshll.u32 %v2617_v18, 16  ;;  %v5662_v9 = vcombine.low %v5042_v55, %v5047_v61  ;;  %v5663_v18 = vcombine.low %v5061_v0, %v5074_v20  ;;  %v4326_v55 = vld [vmem:[#allocation2 + $0x6c] sm:$0xff]   ;;  %v5231_v0 = vld [vmem:[#allocation2 + $0x44] sm:$0x1] }
  0xce   : > { %v2661_v61 = vrot.slane %v2660_v3, 4  ;;  %v2717_v20 = vrot.slane %v2715_v56, 4  ;;  %v2728_v3 = vrot.slane %v2726_v21, 4  ;;  %v2623_v21 = vld [vmem:[#allocation2 + $0x60] sm:$0xf] }
  0xcf   : > { %4080 = vmatmul.mubr.msk.bf16.gmra.mrb[4].mxu0 %vm1033_vm13, %v4322_v27  ;;  %v2669_v27 = vrot.slane %v2667_v42, 4  ;;  %v2614_v42 = vld [vmem:[#allocation2 + $0x3c] sm:$0xf] }
  0xd0   : > { %3998 = vmatmul.mubr.msk.bf16.gmra.mrb[12].mxu1 %vm1033_vm13, %v3711_v17  ;;  %4083 = vmatprep.mubr.msk.bf16.mxu0 %vm1033_vm13, %v4323_v52  ;;  %v5180_v17 = vrot.slane %v1924_v24, 5  ;;  %v4325_v52 = vld [vmem:[#allocation2 + $0x60] sm:$0xff]   ;;  %v1655_v24 = vsel %vm1058_vm9, %v5032_v6, 0  ;;  %v2702_v41 = vshrl.u32 %v2614_v42, 16  ;;  %v2705_v26 = vshll.u32 %v2614_v42, 16 }
  0xd1   : > { %4003 = vmatprep.mubr.msk.bf16.mxu1 %vm1033_vm13, %v3729_v28  ;;  %v5190_v28 = vrot.slane %v1928_v50, 4  ;;  %v2670_v49 = vor.u32 %v2669_v27, %v5178_v38  ;;  %v2684_v50 = vor.u32 %v2683_v44, %v2680_v4  ;;  %v2642_v6 = vsel %vm4745_vm12, %v2637_v58, %v5147_v29  ;;  %v2620_v29 = vld [vmem:[#allocation2 + $0x54] sm:$0xf] }
  0xd2   : > { %v2652_v27 = vsel %vm4745_vm12, %v2647_v14, %v2651_v39  ;;  %v2675_v4 = vrot.slane %v2673_v33, 5  ;;  %v2739_v44 = vshrl.u32 %v5201_v34, 16  ;;  %v2695_v42 = vrot.slane %v2694_v62, 4  ;;  %v4367_v33 = vld [vmem:[%s5639_s3 + $0x8] sm:$0x3] }
  0xd3   : > { %v2671_v58 = vrot.slane %v2670_v49, 4  ;;  %v2685_v25 = vrot.slane %v2684_v50, 4  ;;  %v2707_v14 = vrot.slane %v2705_v26, 5  ;;  %v5223_v39 = vrot.slane %v2711_v16, 5  ;;  %v5233_v62 = vld [vmem:[#allocation2 + $0x50] sm:$0x1] }
  0xd4   : > { %v2731_v49 = vrot.slane %v2729_v8, 5  ;;  %v2750_v50 = vshrl.u32 %v2620_v29, 16  ;;  %v2741_v16 = vrot.slane %v2739_v44, 4  ;;  %v5250_v44 = vld [vmem:[#allocation2 + $0x64] sm:$0xf] }
  0xd7   : > { %4084 = vmatmul.mubr.msk.bf16.gmra.mrb[8].mxu0 %vm1033_vm13, %v4324_v22  ;;  %v2735_v22 = vshll.u32 %v5201_v34, 16 }
  0xd8   : > { %4004 = vmatmul.mubr.msk.bf16.vlgmr.msra.gmra.mrb[0].mxu1 %vm1033_vm13, %v5662_v9  ;;  %4087 = vmatprep.mubr.msk.bf16.mxu0 %vm1033_vm13, %v4325_v52  ;;  %v2699_v52 = vrot.slane %v2697_v19, 5  ;;  %v2704_v9 = vrot.slane %v2702_v41, 4  ;;  %v3822_v19 = vcombine.low %v2642_v6, %v2652_v27  ;;  %v2753_v41 = vshll.u32 %v2620_v29, 16 }
  0xd9   : > { %4020 = vmatpush3.bf16.msra.mxu1 %v1655_v24  ;;  %4007 = vmatprep.mubr.msk.bf16.mxu1 %vm1033_vm13, %v5663_v18  ;;  %v5229_v24 = vld [vmem:[#allocation2 + $0x58] sm:$0xf]  ;;  %v5235_v26 = vrot.slane %v2735_v22, 5  ;;  %v2666_v18 = vsel %vm4745_vm12, %v2661_v61, %v5178_v38  ;;  %v2690_v6 = vsel %vm4745_vm12, %v2685_v25, %v5184_v54  ;;  %v2721_v22 = vshll.u32 %v5231_v0, 16 }
  0xda   : > { %4262 = vmatprep.subr.msk.bf16.mxu1 %vm1058_vm9, %v4367_v33  ;;  %v2676_v33 = vsel %vm4745_vm12, %v2671_v58, %v2675_v4  ;;  %v2759_v13 = vshll.u32 %v5229_v24, 16  ;;  %v2763_v56 = vshrl.u32 %v5229_v24, 16  ;;  %v2700_v8 = vsel %vm4745_vm12, %v2695_v42, %v2699_v52 }
  0xdb   : > { %v2708_v27 = vor.u32 %v2707_v14, %v2704_v9  ;;  %v2718_v38 = vor.u32 %v2717_v20, %v5223_v39  ;;  %v2732_v4 = vor.u32 %v2731_v49, %v2728_v3  ;;  %v2745_v29 = vshll.u32 %v5233_v62, 16  ;;  %v5265_v9 = vld [vmem:[#allocation2 + $0x5c] sm:$0x1] }
  0xdc   : > { %v2752_v61 = vrot.slane %v2750_v50, 4  ;;  %v5664_v58 = vcombine.low %v5065_v37, %v5080_v32  ;;  %v2742_v54 = vor.u32 %v2741_v16, %v5235_v26  ;;  %v2755_v25 = vrot.slane %v2753_v41, 5 }
  0xdd   : > { %v2774_v52 = vshrl.u32 %v2623_v21, 16  ;;  %v2777_v42 = vshll.u32 %v2623_v21, 16  ;;  %v5267_v14 = vrot.slane %v2759_v13, 5  ;;  %v2765_v20 = vrot.slane %v2763_v56, 4  ;;  %v2626_v21 = vld [vmem:[#allocation2 + $0x6c] sm:$0xf] }
  0xde   : > { %v2783_v37 = vshll.u32 %v5250_v44, 16  ;;  %v2787_v32 = vshrl.u32 %v5250_v44, 16  ;;  %v3823_v3 = vcombine.low %v2666_v18, %v2676_v33  ;;  %v3126_v49 = vsel %vm1058_vm9, %v5129_v10, 0 }
  0xdf   : > { %4088 = vmatmul.mubr.msk.bf16.gmra.mrb[12].mxu0 %vm1033_vm13, %v4326_v55  ;;  %v5665_v55 = vcombine.low %v5084_v12, %v5093_v46  ;;  %v3824_v50 = vcombine.low %v2690_v6, %v2700_v8  ;;  %v2709_v16 = vrot.slane %v2708_v27, 4  ;;  %v2719_v41 = vrot.slane %v2718_v38, 4  ;;  %v5282_v27 = vld [vmem:[#allocation2 + $0x68] sm:$0x1] }
  0xe0   : > { %4008 = vmatmul.mubr.msk.bf16.gmra.mrb[4].mxu1 %vm1033_vm13, %v5664_v58  ;;  %4093 = vmatprep.mubr.msk.bf16.mxu0 %vm1033_vm13, %v3822_v19  ;;  %v2723_v19 = vrot.slane %v2721_v22, 5  ;;  %v2733_v12 = vrot.slane %v2732_v4, 4  ;;  %v2747_v46 = vrot.slane %v2745_v29, 5  ;;  %v2743_v58 = vrot.slane %v2742_v54, 4 }
  0xe1   : > { %4011 = vmatprep.mubr.msk.bf16.mxu1 %vm1033_vm13, %v5665_v55  ;;  %v2769_v13 = vshll.u32 %v5265_v9, 16  ;;  %v2776_v55 = vrot.slane %v2774_v52, 4  ;;  %v2779_v56 = vrot.slane %v2777_v42, 5  ;;  %v2756_v2 = vor.u32 %v2755_v25, %v2752_v61 }
  0xe2   : > { %v2766_v18 = vor.u32 %v2765_v20, %v5267_v14  ;;  %v5277_v33 = vrot.slane %v2783_v37, 5  ;;  %v2789_v10 = vrot.slane %v2787_v32, 4  ;;  %v1931_v6 = vor.u32 %v5190_v28, %v5180_v17 }
  0xe3   : > { %v1934_v8 = vshll.u32 %v4986_v30, 16  ;;  %v2798_v22 = vshrl.u32 %v2626_v21, 16  ;;  %v2801_v38 = vshll.u32 %v2626_v21, 16  ;;  %v2714_v4 = vsel %vm4745_vm12, %v2709_v16, %v5223_v39 }
  0xe4   : > { %v2724_v29 = vsel %vm4745_vm12, %v2719_v41, %v2723_v19  ;;  %v2807_v61 = vshll.u32 %v5274_v48, 16  ;;  %v2811_v54 = vshrl.u32 %v5274_v48, 16  ;;  %v5666_v30 = vcombine.low %v5103_v15, %v5117_v7 }
  0xe5   : > { %v2738_v28 = vsel %vm4745_vm12, %v2733_v12, %v5235_v26  ;;  %v2748_v39 = vsel %vm4745_vm12, %v2743_v58, %v2747_v46  ;;  %v2771_v25 = vrot.slane %v2769_v13, 5  ;;  %v2780_v52 = vor.u32 %v2779_v56, %v2776_v55  ;;  %v4327_v46 = vld [vmem:[#allocation2 + $0xc] sm:$0xff]   ;;  %v1785_v56 = vld [vmem:[#allocation2 + $0x48] sm:$0xf] }
  0xe6   : > { %v5667_v42 = vcombine.low %v5140_v43, %v5151_v45  ;;  %v2757_v15 = vrot.slane %v2756_v2, 4  ;;  %v2767_v7 = vrot.slane %v2766_v18, 4  ;;  %v2790_v20 = vor.u32 %v2789_v10, %v5277_v33  ;;  %v2987_v10 = vld [vmem:[#allocation2 + $0x18] sm:$0xe] }
  0xe7   : > { %4094 = vmatmul.mubr.msk.bf16.vlgmr.msra.gmra.mrb[0].mxu0 %vm1033_vm13, %v3823_v3  ;;  %v2793_v37 = vshll.u32 %v5282_v27, 16  ;;  %v2800_v32 = vrot.slane %v2798_v22, 4  ;;  %v2803_v26 = vrot.slane %v2801_v38, 5  ;;  %v3825_v3 = vcombine.low %v2714_v4, %v2724_v29 }
  0xe8   : > { %4012 = vmatmul.mubr.msk.bf16.gmra.mrb[8].mxu1 %vm1033_vm13, %v5666_v30  ;;  %4110 = vmatpush3.bf16.msra.mxu0 %v3126_v49  ;;  %v5308_v49 = vld [vmem:[#allocation2 + $0x74] sm:$0x1]  ;;  %v5310_v19 = vrot.slane %v2807_v61, 5  ;;  %v2813_v16 = vrot.slane %v2811_v54, 4  ;;  %v1932_v41 = vrot.slane %v1931_v6, 4  ;;  %v1936_v43 = vrot.slane %v1934_v8, 5 }
  0xe9   : > { %4015 = vmatprep.mubr.msk.bf16.mxu1 %vm1033_vm13, %v5667_v42  ;;  %4097 = vmatprep.mubr.msk.bf16.mxu0 %vm1033_vm13, %v3824_v50  ;;  %v3826_v45 = vcombine.low %v2738_v28, %v2748_v39  ;;  %v2781_v12 = vrot.slane %v2780_v52, 4  ;;  %v2762_v2 = vsel %vm4745_vm12, %v2757_v15, %v5267_v14  ;;  %v2772_v50 = vsel %vm4745_vm12, %v2767_v7, %v2771_v25  ;;  %v4329_v42 = vld [vmem:[#allocation2 + $0x24] sm:$0xff]   ;;  %v1782_v15 = vld [vmem:[#allocation2 + $0x3c] sm:$0xf] }
  0xea   : > { %v2791_v21 = vrot.slane %v2790_v20, 4  ;;  %v2795_v58 = vrot.slane %v2793_v37, 5  ;;  %v2804_v13 = vor.u32 %v2803_v26, %v2800_v32  ;;  %v2817_v55 = vshll.u32 %v5308_v49, 16  ;;  %v2988_v32 = vld [vmem:[#allocation2 + $0x24] sm:$0xe] }
  0xeb   : > { %v2814_v18 = vor.u32 %v2813_v16, %v5310_v19  ;;  %v3021_v6 = vrot.slane %v5107_v40, 5  ;;  %v5668_v8 = vcombine.low %v5173_v31, %v5188_v11  ;;  %v3827_v14 = vcombine.low %v2762_v2, %v2772_v50  ;;  %v2989_v16 = vld [vmem:[#allocation2 + $0x30] sm:$0xe] }
  0xec   : > { %v2786_v22 = vsel %vm4745_vm12, %v2781_v12, %v5277_v33  ;;  %v2796_v38 = vsel %vm4745_vm12, %v2791_v21, %v2795_v58  ;;  %v1915_v4 = vshrl.u32 %v1785_v56, 16  ;;  %v1918_v29 = vshll.u32 %v1785_v56, 16  ;;  %v4328_v33 = vld [vmem:[#allocation2 + $0x18] sm:$0xff]  }
  0xed   : > { %v1937_v40 = vsel %vm4745_vm12, %v1932_v41, %v1936_v43  ;;  %v2805_v31 = vrot.slane %v2804_v13, 4  ;;  %v2819_v11 = vrot.slane %v2817_v55, 5  ;;  %v3838_v61 = vrot.slane %v2987_v10, 9 }
  0xee   : > { %v3024_v54 = vrot.slane %v5155_v60, 5  ;;  %v2815_v30 = vrot.slane %v2814_v18, 4  ;;  %v3023_v28 = vrot.slane %v3021_v6, 4  ;;  %v1917_v39 = vrot.slane %v1915_v4, 4  ;;  %v4330_v18 = vld [vmem:[#allocation2 + $0x30] sm:$0xff]  }
  0xef   : > { %4098 = vmatmul.mubr.msk.bf16.gmra.mrb[4].mxu0 %vm1033_vm13, %v3825_v3  ;;  %v1920_v25 = vrot.slane %v1918_v29, 5  ;;  %v3828_v52 = vcombine.low %v2786_v22, %v2796_v38  ;;  %v2810_v20 = vsel %vm4745_vm12, %v2805_v31, %v5310_v19  ;;  %v3022_v37 = vsel %vm4884_vm0, %v3838_v61, %v3021_v6  ;;  %v2990_v22 = vld [vmem:[#allocation2 + $0x3c] sm:$0xe]  ;;  %v1788_v29 = vld [vmem:[#allocation2 + $0x54] sm:$0xf] }
  0xf0   : > { %4016 = vmatmul.mubr.msk.bf16.gmra.mrb[12].mxu1 %vm1033_vm13, %v5668_v8  ;;  %4101 = vmatprep.mubr.msk.bf16.mxu0 %vm1033_vm13, %v3826_v45  ;;  %v3028_v26 = vrot.slane %v5136_v23, 5  ;;  %v2820_v60 = vsel %vm4745_vm12, %v2815_v30, %v2819_v11  ;;  %v3025_v3 = vsel %vm4884_vm0, %v3023_v28, %v3024_v54  ;;  %v3035_v41 = vrot.slane %v5153_v63, 5  ;;  %v2991_v61 = vld [vmem:[#allocation2 + $0x48] sm:$0xe] }
  0xf1   : > { %4021 = vmatprep.mubr.msk.bf16.mxu1 %vm1033_vm13, %v4327_v46  ;;  %v1921_v7 = vor.u32 %v1920_v25, %v1917_v39  ;;  %v1891_v19 = vshrl.u32 %v1782_v15, 16  ;;  %v1894_v45 = vshll.u32 %v1782_v15, 16  ;;  %v1900_v23 = vshll.u32 %v4955_v57, 16 }
  0xf2   : > { %v1904_v12 = vshrl.u32 %v4955_v57, 16  ;;  %v3839_v46 = vrot.slane %v2988_v32, 9  ;;  %v3030_v2 = vrot.slane %v3028_v26, 4  ;;  %v3031_v50 = vrot.slane %v5176_v35, 5 }
  0xf3   : > { %v1922_v43 = vrot.slane %v1921_v7, 4  ;;  %v3840_v21 = vrot.slane %v2989_v16, 9  ;;  %v3829_v13 = vcombine.low %v2810_v20, %v2820_v60  ;;  %v3847_v55 = vcombine.low %v3022_v37, %v3025_v3  ;;  %v4332_v20 = vld [vmem:[#allocation2 + $0x48] sm:$0xff]   ;;  %v4333_v60 = vld [vmem:[#allocation2 + $0x54] sm:$0xff]  }
  0xf4   : > { %v3037_v56 = vrot.slane %v3035_v41, 4  ;;  %v3038_v57 = vrot.slane %v5182_v59, 5  ;;  %v1896_v10 = vrot.slane %v1894_v45, 5  ;;  %v5360_v6 = vrot.slane %v1900_v23, 5 }
  0xf5   : > { %v1927_v63 = vsel %vm4745_vm12, %v1922_v43, %v5180_v17  ;;  %v1906_v8 = vrot.slane %v1904_v12, 4  ;;  %v3029_v17 = vsel %vm4884_vm0, %v3839_v46, %v3028_v26  ;;  %v3032_v35 = vsel %vm4884_vm0, %v3030_v2, %v3031_v50  ;;  %v1791_v43 = vld [vmem:[#allocation2 + $0x60] sm:$0xf] }
  0xf6   : > { %v5357_v58 = vcombine.low %v1927_v63, %v1937_v40  ;;  %v3036_v38 = vsel %vm4884_vm0, %v3840_v21, %v3035_v41  ;;  %v3042_v59 = vrot.slane %v5194_v1, 5  ;;  %v1910_v4 = vshll.u32 %v4968_v51, 16  ;;  %v2992_v63 = vld [vmem:[#allocation2 + $0x54] sm:$0xe] }
  0xf7   : > { %4102 = vmatmul.mubr.msk.bf16.gmra.mrb[8].mxu0 %vm1033_vm13, %v3827_v14  ;;  %v4331_v14 = vld [vmem:[#allocation2 + $0x3c] sm:$0xff]   ;;  %v3039_v40 = vsel %vm4884_vm0, %v3037_v56, %v3038_v57  ;;  %v1907_v11 = vor.u32 %v1906_v8, %v5360_v6  ;;  %v3049_v54 = vrot.slane %v5201_v34, 5  ;;  %v3848_v30 = vcombine.low %v3029_v17, %v3032_v35 }
  0xf8   : > { %4022 = vmatmul.mubr.msk.bf16.vlgmr.msra.gmra.mrb[0].mxu1 %vm1033_vm13, %v4328_v33  ;;  %4105 = vmatprep.mubr.msk.bf16.mxu0 %vm1033_vm13, %v3828_v52  ;;  %v3841_v1 = vrot.slane %v2990_v22, 9  ;;  %v3045_v51 = vrot.slane %v5231_v0, 5  ;;  %v1939_v28 = vshrl.u32 %v1788_v29, 16  ;;  %v1942_v39 = vshll.u32 %v1788_v29, 16 }
  0xf9   : > { %4128 = vmatpush3.bf16.msra.mxu1 %v4710_v53  ;;  %4025 = vmatprep.mubr.msk.bf16.mxu1 %vm1033_vm13, %v4329_v42  ;;  %v1893_v53 = vrot.slane %v1891_v19, 4  ;;  %v1948_v25 = vshll.u32 %v4994_v36, 16  ;;  %v1952_v33 = vshrl.u32 %v4994_v36, 16  ;;  %v3849_v52 = vcombine.low %v3036_v38, %v3039_v40 }
  0xfa   : > { %v3044_v42 = vrot.slane %v3042_v59, 4  ;;  %v1912_v15 = vrot.slane %v1910_v4, 5  ;;  %v3842_v7 = vrot.slane %v2991_v61, 9  ;;  %v1908_v32 = vrot.slane %v1907_v11, 4 }
  0xfb   : > { %v1897_v31 = vor.u32 %v1896_v10, %v1893_v53  ;;  %v3051_v34 = vrot.slane %v3049_v54, 4  ;;  %v3052_v26 = vrot.slane %v5233_v62, 5  ;;  %v1941_v3 = vrot.slane %v1939_v28, 4  ;;  %v5670_v10 = vld [vmem:[#allocation3_spill] sm:$0xff] }
  0xfc   : > { %v1944_v16 = vrot.slane %v1942_v39, 5  ;;  %v1950_v0 = vrot.slane %v1948_v25, 5  ;;  %v1954_v41 = vrot.slane %v1952_v33, 4  ;;  %v3043_v36 = vsel %vm4884_vm0, %v3841_v1, %v3042_v59  ;;  %v5671_v33 = vld [vmem:[#allocation5_spill] sm:$0xff] }
  0xfd   : > { %v1898_v37 = vrot.slane %v1897_v31, 4  ;;  %v3046_v19 = vsel %vm4884_vm0, %v3044_v42, %v3045_v51  ;;  %v3050_v45 = vsel %vm4884_vm0, %v3842_v7, %v3049_v54  ;;  %v3056_v23 = vrot.slane %v5229_v24, 5  ;;  %v2993_v24 = vld [vmem:[#allocation2 + $0x60] sm:$0xe]  ;;  %v2994_v42 = vld [vmem:[#allocation2 + $0x6c] sm:$0xe] }
  0xfe   : > { %v1913_v12 = vsel %vm4745_vm12, %v1908_v32, %v1912_v15  ;;  %v3053_v46 = vsel %vm4884_vm0, %v3051_v34, %v3052_v26  ;;  %v3063_v2 = vrot.slane %v5250_v44, 5  ;;  %v1963_v50 = vshrl.u32 %v1791_v43, 16  ;;  %v4334_v44 = vld [vmem:[#allocation2 + $0x60] sm:$0xff]  }
  0xff   : > { %4106 = vmatmul.mubr.msk.bf16.gmra.mrb[12].mxu0 %vm1033_vm13, %v3829_v13  ;;  %v1903_v62 = vsel %vm4745_vm12, %v1898_v37, %v5360_v6  ;;  %v1966_v21 = vshll.u32 %v1791_v43, 16  ;;  %v5669_v13 = vld [vmem:[#allocation4_spill] sm:$0xff]  ;;  %v3850_v57 = vcombine.low %v3043_v36, %v3046_v19  ;;  %v1955_v53 = vor.u32 %v1954_v41, %v1950_v0 }
 0x100   : > { %4026 = vmatmul.mubr.msk.bf16.gmra.mrb[4].mxu1 %vm1033_vm13, %v4330_v18  ;;  %4111 = vmatprep.mubr.msk.bf16.mxu0 %vm1033_vm13, %v3847_v55  ;;  %v1972_v55 = vshll.u32 %v5669_v13, 16  ;;  %v1976_v56 = vshrl.u32 %v5669_v13, 16  ;;  %v1945_v18 = vor.u32 %v1944_v16, %v1941_v3  ;;  %v1958_v6 = vshll.u32 %v5670_v10, 16 }
 0x101   : > { %4029 = vmatprep.mubr.msk.bf16.mxu1 %vm1033_vm13, %v4331_v14  ;;  %v3767_v8 = vcombine.low %v1903_v62, %v1913_v12  ;;  %v3851_v14 = vcombine.low %v3050_v45, %v3053_v46  ;;  %v3843_v17 = vrot.slane %v2992_v63, 9  ;;  %v3059_v35 = vrot.slane %v5265_v9, 5 }
 0x102   : > { %v3058_v22 = vrot.slane %v3056_v23, 4  ;;  %v3844_v38 = vrot.slane %v2993_v24, 9  ;;  %v3065_v59 = vrot.slane %v3063_v2, 4  ;;  %v3066_v4 = vrot.slane %v5282_v27, 5 }
 0x103   : > { %v1965_v29 = vrot.slane %v1963_v50, 4  ;;  %v1968_v40 = vrot.slane %v1966_v21, 5  ;;  %v1974_v31 = vrot.slane %v1972_v55, 5  ;;  %v1978_v11 = vrot.slane %v1976_v56, 4 }
 0x104   : > { %v1946_v61 = vrot.slane %v1945_v18, 4  ;;  %v1956_v54 = vrot.slane %v1955_v53, 4  ;;  %v3057_v9 = vsel %vm4884_vm0, %v3843_v17, %v3056_v23  ;;  %v3060_v1 = vsel %vm4884_vm0, %v3058_v22, %v3059_v35 }
 0x105   : > { %v3064_v27 = vsel %vm4884_vm0, %v3844_v38, %v3063_v2  ;;  %v3070_v51 = vrot.slane %v5274_v48, 5  ;;  %v3067_v28 = vsel %vm4884_vm0, %v3065_v59, %v3066_v4  ;;  %v1969_v39 = vor.u32 %v1968_v40, %v1965_v29 }
 0x106   : > { %v1979_v25 = vor.u32 %v1978_v11, %v1974_v31  ;;  %v1951_v15 = vsel %vm4745_vm12, %v1946_v61, %v1950_v0  ;;  %v3853_v37 = vcombine.low %v3064_v27, %v3067_v28  ;;  %v3845_v32 = vrot.slane %v2994_v42, 9 }
 0x107   : > { %4112 = vmatmul.mubr.msk.bf16.vlgmr.msra.gmra.mrb[0].mxu0 %vm1033_vm13, %v3848_v30  ;;  %v1960_v30 = vrot.slane %v1958_v6, 5  ;;  %v3072_v48 = vrot.slane %v3070_v51, 4  ;;  %v3073_v34 = vrot.slane %v5308_v49, 5 }
 0x108   : > { %4030 = vmatmul.mubr.msk.bf16.gmra.mrb[8].mxu1 %vm1033_vm13, %v4332_v20  ;;  %4115 = vmatprep.mubr.msk.bf16.mxu0 %vm1033_vm13, %v3849_v52  ;;  %v1982_v52 = vshll.u32 %v5671_v33, 16  ;;  %v3852_v20 = vcombine.low %v3057_v9, %v3060_v1  ;;  %v1980_v3 = vrot.slane %v1979_v25, 4  ;;  %v3071_v0 = vsel %vm4884_vm0, %v3845_v32, %v3070_v51 }
 0x109   : > { %4033 = vmatprep.mubr.msk.bf16.mxu1 %vm1033_vm13, %v4333_v60  ;;  %v1961_v7 = vsel %vm4745_vm12, %v1956_v54, %v1960_v30  ;;  %v1970_v60 = vrot.slane %v1969_v39, 4  ;;  %v3074_v41 = vsel %vm4884_vm0, %v3072_v48, %v3073_v34 }
 0x10a   : > { %v3769_v26 = vcombine.low %v1951_v15, %v1961_v7  ;;  %v1984_v16 = vrot.slane %v1982_v52, 5  ;;  %v3854_v36 = vcombine.low %v3071_v0, %v3074_v41 }
 0x10b   : > { %v1975_v49 = vsel %vm4745_vm12, %v1970_v60, %v1974_v31 }
 0x10c   : > { %v1985_v43 = vsel %vm4745_vm12, %v1980_v3, %v1984_v16 }
 0x10d   : > { %v3770_v19 = vcombine.low %v1975_v49, %v1985_v43 }
 0x10f   : > { %4116 = vmatmul.mubr.msk.bf16.gmra.mrb[4].mxu0 %vm1033_vm13, %v3850_v57 }
 0x110   : > { %4034 = vmatmul.mubr.msk.bf16.gmra.mrb[12].mxu1 %vm1033_vm13, %v4334_v44  ;;  %4119 = vmatprep.mubr.msk.bf16.mxu0 %vm1033_vm13, %v3851_v14 }
 0x111   : > { %4047 = vmatprep.mubr.msk.bf16.mxu1 %vm1033_vm13, %v3767_v8 }
 0x117   : > { %4120 = vmatmul.mubr.msk.bf16.gmra.mrb[8].mxu0 %vm1033_vm13, %v3852_v20 }
 0x118   : > { %4048 = vmatmul.mubr.msk.bf16.vlgmr.msra.gmra.mrb[8].mxu1 %vm1033_vm13, %v5357_v58  ;;  %4123 = vmatprep.mubr.msk.bf16.mxu0 %vm1033_vm13, %v3853_v37 }
 0x119   : > { %4051 = vmatprep.mubr.msk.bf16.mxu1 %vm1033_vm13, %v3769_v26 }
 0x11f   : > { %4124 = vmatmul.mubr.msk.bf16.gmra.mrb[12].mxu0 %vm1033_vm13, %v3854_v36 }
 0x120   : > { %4052 = vmatmul.mubr.msk.bf16.gmra.mrb[12].mxu1 %vm1033_vm13, %v3770_v19 }
 0x1cb   : > { %v4023_v58 = vpop.f32.mrb[0].mxu1 }
 0x1cc   : > { %v1691_v45 = vpop.f32.mrb[1].mxu1 }
 0x1cd   : > { %v4024_v23 = vpop.f32.mrb[2].mxu1 }
 0x1ce   : > { %v1694_v62 = vpop.f32.mrb[3].mxu1 }
 0x1d3   : > { %v4027_v47 = vpop.f32.mrb[4].mxu1 }
 0x1d4   : > { %v1707_v12 = vpop.f32.mrb[5].mxu1 }
 0x1d5   : > { %v4028_v46 = vpop.f32.mrb[6].mxu1 }
 0x1d6   : > { %v1710_v63 = vpop.f32.mrb[7].mxu1 }
 0x1da   : > { %v4113_v2 = vpop.f32.mrb[0].mxu0 }
 0x1db   : > { %v4129_v24 = vadd.f32 %v4113_v2, %v4023_v58  ;;  %v3162_v50 = vpop.f32.mrb[1].mxu0 }
 0x1dc   : > { %v4130_v21 = vadd.f32 %v3162_v50, %v1691_v45  ;;  %v4114_v13 = vpop.f32.mrb[2].mxu0 }
 0x1dd   : > { %v5446_v55 = vadd.f32 %v4129_v24, %v5443_v5  ;;  %v4131_v56 = vadd.f32 %v4114_v13, %v4024_v23  ;;  %v3165_v57 = vpop.f32.mrb[3].mxu0 }
 0x1de   : > { %v5449_v18 = vadd.f32 %v4130_v21, %v5443_v5  ;;  %v4132_v53 = vadd.f32 %v3165_v57, %v1694_v62 }
 0x1df   : > { %v3266_v10 = vmul.f32 0.5, %v5446_v55  ;;  %v5453_v6 = vadd.f32 %v4131_v56, %v5443_v5 }
 0x1e0   : > { %v3264_v8 = vmul.f32 0.5, %v5449_v18  ;;  %v5457_v14 = vadd.f32 %v4132_v53, %v5443_v5 }
 0x1e1   : > { %v3267_v17 = vmul.f32 0.5, %v5453_v6  ;;  %4335 = vtanh.f32 %v3266_v10 }
 0x1e2   : > { %v3265_v35 = vmul.f32 0.5, %v5457_v14  ;;  %v4117_v44 = vpop.f32.mrb[4].mxu0  ;;  %4337 = vtanh.f32 %v3264_v8 }
 0x1e3   : > { %4339 = vtanh.f32 %v3267_v17  ;;  %v4133_v22 = vadd.f32 %v4117_v44, %v4027_v47  ;;  %v3178_v38 = vpop.f32.mrb[5].mxu0 }
 0x1e4   : > { %4341 = vtanh.f32 %v3265_v35  ;;  %v4134_v59 = vadd.f32 %v3178_v38, %v1707_v12  ;;  %v4118_v4 = vpop.f32.mrb[6].mxu0 }
 0x1e5   : > { %v5462_v29 = vadd.f32 %v4133_v22, %v5443_v5  ;;  %v4135_v40 = vadd.f32 %v4118_v4, %v4028_v46  ;;  %v3181_v31 = vpop.f32.mrb[7].mxu0 }
 0x1e6   : > { %v5465_v11 = vadd.f32 %v4134_v59, %v5443_v5  ;;  %v4136_v61 = vadd.f32 %v3181_v31, %v1710_v63 }
 0x1e7   : > { %v3270_v54 = vmul.f32 0.5, %v5462_v29  ;;  %v5469_v30 = vadd.f32 %v4135_v40, %v5443_v5 }
 0x1e8   : > { %v3268_v9 = vmul.f32 0.5, %v5465_v11  ;;  %v5473_v1 = vadd.f32 %v4136_v61, %v5443_v5 }
 0x1e9   : > { %4343 = vtanh.f32 %v3270_v54  ;;  %v3271_v27 = vmul.f32 0.5, %v5469_v30 }
 0x1ea   : > { %4345 = vtanh.f32 %v3268_v9  ;;  %v3269_v51 = vmul.f32 0.5, %v5473_v1  ;;  %v4121_v28 = vpop.f32.mrb[8].mxu0 }
 0x1eb   : > { %v4336_v39 = vpop.eup %4335  ;;  %4347 = vtanh.f32 %v3271_v27  ;;  %v4049_v25 = vpop.f32.mrb[8].mxu1 }
 0x1ec   : > { %v3194_v33 = vpop.f32.mrb[9].mxu0  ;;  %v4338_v52 = vpop.eup %4337  ;;  %4349 = vtanh.f32 %v3269_v51  ;;  %v4137_v42 = vadd.f32 %v4121_v28, %v4049_v25  ;;  %v3298_v20 = vmul.f32 0.5, %v4336_v39 }
 0x1ed   : > { %v2105_v15 = vpop.f32.mrb[9].mxu1  ;;  %v4122_v7 = vpop.f32.mrb[10].mxu0  ;;  %v3296_v26 = vmul.f32 0.5, %v4338_v52 }
 0x1ee   : > { %v4340_v37 = vpop.eup %4339  ;;  %v4138_v32 = vadd.f32 %v3194_v33, %v2105_v15  ;;  %v4050_v48 = vpop.f32.mrb[10].mxu1  ;;  %v5478_v3 = vadd.f32 %v4137_v42, %v5443_v5  ;;  %v3314_v41 = vadd.f32 0.5, %v3298_v20 }
 0x1ef   : > { %v3197_v34 = vpop.f32.mrb[11].mxu0  ;;  %v4342_v60 = vpop.eup %4341  ;;  %v4139_v16 = vadd.f32 %v4122_v7, %v4050_v48  ;;  %v3299_v49 = vmul.f32 0.5, %v4340_v37  ;;  %v3312_v19 = vadd.f32 0.5, %v3296_v26 }
 0x1f0   : > { %v2108_v0 = vpop.f32.mrb[11].mxu1  ;;  %v5481_v43 = vadd.f32 %v4138_v32, %v5443_v5  ;;  %v3297_v58 = vmul.f32 0.5, %v4342_v60  ;;  %v3274_v45 = vmul.f32 0.5, %v5478_v3  ;;  %3348 = vrot.lane.b32.xlu1 %v3314_v41, %s4410_s15 }
 0x1f1   : > { %v4140_v36 = vadd.f32 %v3197_v34, %v2108_v0  ;;  %v5485_v23 = vadd.f32 %v4139_v16, %v5443_v5  ;;  %3344 = vrot.lane.b32.xlu0 %v3312_v19, %s4410_s15  ;;  %v3315_v63 = vadd.f32 0.5, %v3299_v49 }
 0x1f2   : > { %v3272_v62 = vmul.f32 0.5, %v5481_v43  ;;  %4351 = vtanh.f32 %v3274_v45  ;;  %v4125_v46 = vpop.f32.mrb[12].mxu0  ;;  %v3313_v13 = vadd.f32 0.5, %v3297_v58 }
 0x1f3   : > { %v5490_v47 = vadd.f32 %v4140_v36, %v5443_v5  ;;  %v3275_v12 = vmul.f32 0.5, %v5485_v23  ;;  %v4344_v2 = vpop.eup %4343  ;;  %v4053_v50 = vpop.f32.mrb[12].mxu1 }
 0x1f4   : > { %4353 = vtanh.f32 %v3272_v62  ;;  %v3210_v21 = vpop.f32.mrb[13].mxu0  ;;  %v4346_v56 = vpop.eup %4345  ;;  %v4141_v57 = vadd.f32 %v4125_v46, %v4053_v50  ;;  %3350 = vrot.lane.b32.xlu1 %v3315_v63, %s4410_s15  ;;  %v3302_v8 = vmul.f32 0.5, %v4344_v2 }
 0x1f5   : > { %v3273_v24 = vmul.f32 0.5, %v5490_v47  ;;  %4355 = vtanh.f32 %v3275_v12  ;;  %v2121_v53 = vpop.f32.mrb[13].mxu1  ;;  %v4126_v10 = vpop.f32.mrb[14].mxu0  ;;  %3346 = vrot.lane.b32.xlu0 %v3313_v13, %s4410_s15  ;;  %v3300_v27 = vmul.f32 0.5, %v4346_v56 }
 0x1f6   : > { %v4348_v17 = vpop.eup %4347  ;;  %v4142_v35 = vadd.f32 %v3210_v21, %v2121_v53  ;;  %v4054_v44 = vpop.f32.mrb[14].mxu1  ;;  %v5498_v59 = vadd.f32 %v4141_v57, %v5443_v5  ;;  %v3318_v31 = vadd.f32 0.5, %v3302_v8 }
 0x1f7   : > { %4357 = vtanh.f32 %v3273_v24  ;;  %v3213_v22 = vpop.f32.mrb[15].mxu0  ;;  %v4350_v38 = vpop.eup %4349  ;;  %v4143_v4 = vadd.f32 %v4126_v10, %v4054_v44  ;;  %v3303_v61 = vmul.f32 0.5, %v4348_v17  ;;  %v3316_v7 = vadd.f32 0.5, %v3300_v27 }
 0x1f8   : > { %v2124_v40 = vpop.f32.mrb[15].mxu1  ;;  %v5501_v54 = vadd.f32 %v4142_v35, %v5443_v5  ;;  %v3278_v51 = vmul.f32 0.5, %v5498_v59  ;;  %v3301_v25 = vmul.f32 0.5, %v4350_v38 }
 0x1f9   : > { %v4144_v9 = vadd.f32 %v3213_v22, %v2124_v40  ;;  %v5505_v28 = vadd.f32 %v4143_v4, %v5443_v5  ;;  %v3319_v39 = vadd.f32 0.5, %v3303_v61  ;;  %3356 = vrot.lane.b32.xlu0 %v3318_v31, %s4410_s15 }
 0x1fa   : > { %v3276_v33 = vmul.f32 0.5, %v5501_v54  ;;  %4359 = vtanh.f32 %v3278_v51  ;;  %v3317_v37 = vadd.f32 0.5, %v3301_v25 }
 0x1fb   : > { %v5509_v52 = vadd.f32 %v4144_v9, %v5443_v5  ;;  %v3279_v42 = vmul.f32 0.5, %v5505_v28  ;;  %3358 = vrot.lane.b32.xlu1 %v3319_v39, %s4410_s15 }
 0x1fc   : > { %4361 = vtanh.f32 %v3276_v33  ;;  %v4352_v20 = vpop.eup %4351 }
 0x1fd   : > { %v3277_v15 = vmul.f32 0.5, %v5509_v52  ;;  %4363 = vtanh.f32 %v3279_v42  ;;  %3352 = vrot.lane.b32.xlu0 %v3316_v7, %s4410_s15  ;;  %v3306_v5 = vmul.f32 0.5, %v4352_v20 }
 0x1fe   : > { %v4354_v32 = vpop.eup %4353 }
 0x1ff   : > { %4365 = vtanh.f32 %v3277_v15  ;;  %v4356_v48 = vpop.eup %4355  ;;  %3354 = vrot.lane.b32.xlu1 %v3317_v37, %s4410_s15  ;;  %v3322_v26 = vadd.f32 0.5, %v3306_v5  ;;  %v3304_v16 = vmul.f32 0.5, %v4354_v32 }
 0x200   : > { %v3307_v60 = vmul.f32 0.5, %v4356_v48 }
 0x201   : > { %v4358_v34 = vpop.eup %4357  ;;  %3364 = vrot.lane.b32.xlu0 %v3322_v26, %s4410_s15  ;;  %v3320_v49 = vadd.f32 0.5, %v3304_v16 }
 0x202   : > { %v3323_v0 = vadd.f32 0.5, %v3307_v60  ;;  %v3305_v41 = vmul.f32 0.5, %v4358_v34 }
 0x204   : > { %3366 = vrot.lane.b32.xlu1 %v3323_v0, %s4410_s15  ;;  %v4360_v36 = vpop.eup %4359  ;;  %v3321_v58 = vadd.f32 0.5, %v3305_v41 }
 0x205   : > { %3360 = vrot.lane.b32.xlu0 %v3320_v49, %s4410_s15  ;;  %v3310_v2 = vmul.f32 0.5, %v4360_v36 }
 0x206   : > { %v4362_v19 = vpop.eup %4361 }
 0x207   : > { %v4364_v45 = vpop.eup %4363  ;;  %v3308_v62 = vmul.f32 0.5, %v4362_v19  ;;  %v3326_v21 = vadd.f32 0.5, %v3310_v2 }
 0x208   : > { %3362 = vrot.lane.b32.xlu1 %v3321_v58, %s4410_s15  ;;  %v3311_v50 = vmul.f32 0.5, %v4364_v45 }
 0x209   : > { %v4366_v12 = vpop.eup %4365  ;;  %v3324_v46 = vadd.f32 0.5, %v3308_v62 }
 0x20a   : > { %v3309_v63 = vmul.f32 0.5, %v4366_v12  ;;  %v3327_v13 = vadd.f32 0.5, %v3311_v50 }
 0x20b   : > { %3368 = vrot.lane.b32.xlu0 %v3324_v46, %s4410_s15 }
 0x20c   : > { %v3325_v24 = vadd.f32 0.5, %v3309_v63 }
 0x20e   : > { %3370 = vrot.lane.b32.xlu1 %v3325_v24, %s4410_s15 }
 0x20f   : > { %3372 = vrot.lane.b32.xlu0 %v3326_v21, %s4410_s15 }
 0x212   : > { %3374 = vrot.lane.b32.xlu1 %v3327_v13, %s4410_s15 }
 0x262   : > { %v3349_v56 = vpop.permute.xlu1 %3348 }
 0x263   : > { %v3394_v57 = vmul.f32 %v3349_v56, %v5446_v55  ;;  %v3345_v53 = vpop.permute.xlu0 %3344 }
 0x264   : > { %v3392_v10 = vmul.f32 %v3345_v53, %v5449_v18 }
 0x265   : > { %3411 = vst.msk [vmem:[%s4617_s13 + $0x20] sm:$0xff] %vm3408_vm1, %v3394_v57  ;;  %3445 = vrot.lane.b32.xlu0 %v3394_v57, %s4411_s16 }
 0x266   : > { %3409 = vst.msk [vmem:[%s4617_s13] sm:$0xff] %vm3408_vm1, %v3392_v10  ;;  %v3351_v8 = vpop.permute.xlu1 %3350 }
 0x267   : > { %v3395_v17 = vmul.f32 %v3351_v8, %v5453_v6  ;;  %v3347_v35 = vpop.permute.xlu0 %3346 }
 0x268   : > { %v3393_v44 = vmul.f32 %v3347_v35, %v5457_v14 }
 0x269   : > { %3412 = vst.msk [vmem:[%s4617_s13 + $0x28] sm:$0xff] %vm3408_vm1, %v3395_v17  ;;  %3441 = vrot.lane.b32.xlu0 %v3392_v10, %s4411_s16  ;;  %3447 = vrot.lane.b32.xlu1 %v3395_v17, %s4411_s16 }
 0x26a   : > { %3410 = vst.msk [vmem:[%s4617_s13 + $0x8] sm:$0xff] %vm3408_vm1, %v3393_v44 }
 0x26b   : > { %v3357_v55 = vpop.permute.xlu0 %3356 }
 0x26c   : > { %v3398_v18 = vmul.f32 %v3357_v55, %v5462_v29 }
 0x26d   : > { %v3359_v22 = vpop.permute.xlu1 %3358  ;;  %3443 = vrot.lane.b32.xlu1 %v3393_v44, %s4411_s16 }
 0x26e   : > { %v3399_v38 = vmul.f32 %v3359_v22, %v5469_v30  ;;  %3415 = vst.msk [vmem:[%s4617_s13 + $0x60] sm:$0xff] %vm3408_vm1, %v3398_v18  ;;  %3453 = vrot.lane.b32.xlu0 %v3398_v18, %s4411_s16 }
 0x26f   : > { %v3353_v6 = vpop.permute.xlu0 %3352 }
 0x270   : > { %3416 = vst.msk [vmem:[%s4617_s13 + $0x68] sm:$0xff] %vm3408_vm1, %v3399_v38  ;;  %v3396_v14 = vmul.f32 %v3353_v6, %v5465_v11 }
 0x271   : > { %v3355_v4 = vpop.permute.xlu1 %3354  ;;  %3455 = vrot.lane.b32.xlu1 %v3399_v38, %s4411_s16 }
 0x272   : > { %v3397_v40 = vmul.f32 %v3355_v4, %v5473_v1  ;;  %3413 = vst.msk [vmem:[%s4617_s13 + $0x40] sm:$0xff] %vm3408_vm1, %v3396_v14  ;;  %3449 = vrot.lane.b32.xlu0 %v3396_v14, %s4411_s16 }
 0x273   : > { %v3365_v29 = vpop.permute.xlu0 %3364 }
 0x274   : > { %3414 = vst.msk [vmem:[%s4617_s13 + $0x48] sm:$0xff] %vm3408_vm1, %v3397_v40  ;;  %v3402_v30 = vmul.f32 %v3365_v29, %v5478_v3 }
 0x275   : > { %3451 = vrot.lane.b32.xlu1 %v3397_v40, %s4411_s16 }
 0x276   : > { %v3367_v31 = vpop.permute.xlu1 %3366  ;;  %3419 = vst.msk [vmem:[%s4617_s13 + $0xa0] sm:$0xff] %vm3408_vm1, %v3402_v30  ;;  %3461 = vrot.lane.b32.xlu0 %v3402_v30, %s4411_s16 }
 0x277   : > { %v3403_v11 = vmul.f32 %v3367_v31, %v5485_v23  ;;  %v3361_v1 = vpop.permute.xlu0 %3360 }
 0x278   : > { %v3400_v61 = vmul.f32 %v3361_v1, %v5481_v43 }
 0x279   : > { %3420 = vst.msk [vmem:[%s4617_s13 + $0xa8] sm:$0xff] %vm3408_vm1, %v3403_v11  ;;  %3463 = vrot.lane.b32.xlu1 %v3403_v11, %s4411_s16 }
 0x27a   : > { %v3363_v9 = vpop.permute.xlu1 %3362  ;;  %3417 = vst.msk [vmem:[%s4617_s13 + $0x80] sm:$0xff] %vm3408_vm1, %v3400_v61  ;;  %3457 = vrot.lane.b32.xlu0 %v3400_v61, %s4411_s16 }
 0x27b   : > { %v3401_v3 = vmul.f32 %v3363_v9, %v5490_v47 }
 0x27d   : > { %3418 = vst.msk [vmem:[%s4617_s13 + $0x88] sm:$0xff] %vm3408_vm1, %v3401_v3  ;;  %v3369_v23 = vpop.permute.xlu0 %3368  ;;  %3459 = vrot.lane.b32.xlu1 %v3401_v3, %s4411_s16 }
 0x27e   : > { %v3404_v27 = vmul.f32 %v3369_v23, %v5501_v54 }
 0x280   : > { %v3371_v43 = vpop.permute.xlu1 %3370  ;;  %3421 = vst.msk [vmem:[%s4617_s13 + $0xc0] sm:$0xff] %vm3408_vm1, %v3404_v27  ;;  %3465 = vrot.lane.b32.xlu0 %v3404_v27, %s4411_s16 }
 0x281   : > { %v3405_v51 = vmul.f32 %v3371_v43, %v5509_v52  ;;  %v3373_v47 = vpop.permute.xlu0 %3372 }
 0x282   : > { %v3406_v39 = vmul.f32 %v3373_v47, %v5498_v59 }
 0x283   : > { %3422 = vst.msk [vmem:[%s4617_s13 + $0xc8] sm:$0xff] %vm3408_vm1, %v3405_v51  ;;  %3467 = vrot.lane.b32.xlu1 %v3405_v51, %s4411_s16 }
 0x284   : > { %v3375_v54 = vpop.permute.xlu1 %3374  ;;  %3423 = vst.msk [vmem:[%s4617_s13 + $0xe0] sm:$0xff] %vm3408_vm1, %v3406_v39  ;;  %3469 = vrot.lane.b32.xlu0 %v3406_v39, %s4411_s16 }
 0x285   : > { %v3407_v25 = vmul.f32 %v3375_v54, %v5505_v28 }
 0x287   : > { %3424 = vst.msk [vmem:[%s4617_s13 + $0xe8] sm:$0xff] %vm3408_vm1, %v3407_v25  ;;  %3471 = vrot.lane.b32.xlu1 %v3407_v25, %s4411_s16 }
 0x2d7   : > { %v3446_v33 = vpop.permute.xlu0 %3445 }
 0x2d8   : > { %3866 = vst.msk [vmem:[%s4617_s13 + $0x30] sm:$0xff] %vm3408_vm1, %v3446_v33 }
 0x2db   : > { %v3442_v59 = vpop.permute.xlu0 %3441  ;;  %v3448_v52 = vpop.permute.xlu1 %3447 }
 0x2dc   : > { %3864 = vst.msk [vmem:[%s4617_s13 + $0x10] sm:$0xff] %vm3408_vm1, %v3442_v59  ;;  %3867 = vst.msk [vmem:[%s4617_s13 + $0x38] sm:$0xff] %vm3408_vm1, %v3448_v52 }
 0x2df   : > { %v3444_v28 = vpop.permute.xlu1 %3443 }
 0x2e0   : > { %3865 = vst.msk [vmem:[%s4617_s13 + $0x18] sm:$0xff] %vm3408_vm1, %v3444_v28  ;;  %v3454_v42 = vpop.permute.xlu0 %3453 }
 0x2e1   : > { %3870 = vst.msk [vmem:[%s4617_s13 + $0x70] sm:$0xff] %vm3408_vm1, %v3454_v42 }
 0x2e3   : > { %v3456_v15 = vpop.permute.xlu1 %3455 }
 0x2e4   : > { %3871 = vst.msk [vmem:[%s4617_s13 + $0x78] sm:$0xff] %vm3408_vm1, %v3456_v15  ;;  %v3450_v7 = vpop.permute.xlu0 %3449 }
 0x2e5   : > { %3868 = vst.msk [vmem:[%s4617_s13 + $0x50] sm:$0xff] %vm3408_vm1, %v3450_v7 }
 0x2e7   : > { %v3452_v20 = vpop.permute.xlu1 %3451 }
 0x2e8   : > { %3869 = vst.msk [vmem:[%s4617_s13 + $0x58] sm:$0xff] %vm3408_vm1, %v3452_v20  ;;  %v3462_v37 = vpop.permute.xlu0 %3461 }
 0x2e9   : > { %3874 = vst.msk [vmem:[%s4617_s13 + $0xb0] sm:$0xff] %vm3408_vm1, %v3462_v37 }
 0x2eb   : > { %v3464_v32 = vpop.permute.xlu1 %3463 }
 0x2ec   : > { %3875 = vst.msk [vmem:[%s4617_s13 + $0xb8] sm:$0xff] %vm3408_vm1, %v3464_v32  ;;  %v3458_v5 = vpop.permute.xlu0 %3457 }
 0x2ed   : > { %3872 = vst.msk [vmem:[%s4617_s13 + $0x90] sm:$0xff] %vm3408_vm1, %v3458_v5 }
 0x2ef   : > { %v3460_v48 = vpop.permute.xlu1 %3459 }
 0x2f0   : > { %3873 = vst.msk [vmem:[%s4617_s13 + $0x98] sm:$0xff] %vm3408_vm1, %v3460_v48 }
 0x2f2   : > { %v3466_v34 = vpop.permute.xlu0 %3465 }
 0x2f3   : > { %3876 = vst.msk [vmem:[%s4617_s13 + $0xd0] sm:$0xff] %vm3408_vm1, %v3466_v34 }
 0x2f5   : > { %v3468_v26 = vpop.permute.xlu1 %3467 }
 0x2f6   : > { %3877 = vst.msk [vmem:[%s4617_s13 + $0xd8] sm:$0xff] %vm3408_vm1, %v3468_v26  ;;  %v3470_v60 = vpop.permute.xlu0 %3469 }
 0x2f7   : > { %3878 = vst.msk [vmem:[%s4617_s13 + $0xf0] sm:$0xff] %vm3408_vm1, %v3470_v60 }
 0x2f9   : > { %v3472_v16 = vpop.permute.xlu1 %3471 }
 0x2fa   : > { %3879 = vst.msk [vmem:[%s4617_s13 + $0xf8] sm:$0xff] %vm3408_vm1, %v3472_v16 }
 0x2fb PF: > { %s15_s22 = sadd.s32 1, %s4406_s22   ;;  %s5672_s18 = smov %s4398_s20 }
 0x2fc   : > { %p12_p0 = scmp.ge.s32.totalorder %s15_s22, 6   ;;  %s5673_s19 = smov %s4402_s21 }
 0x2fd   : > { %s5674_s20 = smov %s5677_s23  ;;  %s5675_s21 = smov %s5681_s24 }
 0x2fe   :  { %14 = sbr.rel (!%p12_p0) target bundleno = 3 (0x3), region = 105 }

</bundles_post_ra>
